<compile_context>
chip_gen: v7x
topology: tpu7x:2x2x1
jax: 0.10.0
libtpu: 0.0.40
codegen_flags: <defaults>
</compile_context>

<pallas_src>
import functools

import jax
import jax.numpy as jnp
from jax import lax
from jax.experimental import pallas as pl
from jax.experimental.pallas import tpu as pltpu


# ---------------------------------------------------------------------------
# Pallas kernels
# ---------------------------------------------------------------------------

def _proj_qkv_kernel(xee_ref, xeo_ref, xoe_ref, xoo_ref, wdw_ref, gamma_ref,
                     beta_ref, wq_ref, wkv_ref, q_ref, kv_ref, *, ho, wo, hk, wk):
    """Merged projection kernel.

    Inputs are the four parity planes of the zero-padded image (bf16), so
    every conv / pool tap is a contiguous static slice — x is DMA'd once.
    Depthwise 3x3/s2 conv + LayerNorm + proj_q, and 2x2/s2 avg pool + one
    matmul against [Wk | Wv]  (f32 accumulation, bf16 MXU operands).
    """
    f32, bf16 = jnp.float32, jnp.bfloat16
    # planes[row_parity][col_parity], each (Ho+1, Wo+1, C) in f32.
    planes = ((xee_ref[0].astype(f32), xeo_ref[0].astype(f32)),
              (xoe_ref[0].astype(f32), xoo_ref[0].astype(f32)))
    wdw = wdw_ref[...]                                   # (9, C) f32

    # --- depthwise 3x3 / stride-2 conv (pad=1 already applied in wrapper) --
    conv = None
    for ki in range(3):
        for kj in range(3):
            tap = planes[ki % 2][kj % 2][ki // 2:ki // 2 + ho,
                                         kj // 2:kj // 2 + wo, :]
            term = tap * wdw[3 * ki + kj]
            conv = term if conv is None else conv + term
    conv = conv.reshape(ho * wo, conv.shape[-1])         # (Tq, C) f32
    # nn.LayerNorm over channels (eps=1e-5, biased variance), stats in f32.
    mean = jnp.mean(conv, axis=-1, keepdims=True)
    var = jnp.mean((conv - mean) ** 2, axis=-1, keepdims=True)
    normed = (conv - mean) * lax.rsqrt(var + 1e-5)
    normed = normed * gamma_ref[0] + beta_ref[0]
    q_ref[0] = jnp.dot(normed.astype(bf16), wq_ref[...],
                       preferred_element_type=f32).astype(q_ref.dtype)

    # --- 2x2 / stride-2 avg pool (pad=0): taps live on the parity planes ---
    pooled = None
    for ki in range(2):
        for kj in range(2):
            tap = planes[1 - ki][1 - kj][ki:ki + hk, kj:kj + wk, :]
            pooled = tap if pooled is None else pooled + tap
    pooled = (pooled * 0.25).reshape(hk * wk, pooled.shape[-1])   # (Tkv, C)
    kv_ref[0] = jnp.dot(pooled.astype(bf16), wkv_ref[...],
                        preferred_element_type=f32).astype(kv_ref.dtype)


def _fused_attn_kernel(*refs, num_heads, d_head, dim_out, scale, fuse):
    """Per (batch, Tq-tile): scores -> direct fuse mix -> softmax -> ctx -> proj.

    fuse_attn (1x1 conv over 2H channels) is applied as H*2H scalar-weighted
    VPU FMAs directly on the resident (tq, Tkv) f32 score tiles — no kron
    weight, no extra MXU work.  Scores never leave VMEM between stages.
    """
    if fuse:
        (q_ref, kv_ref, res_ref, wf_ref, bf_ref, wp_ref, bp_ref,
         score_ref, out_ref) = refs
    else:
        (q_ref, kv_ref, wp_ref, bp_ref, score_ref, out_ref) = refs

    f32, bf16 = jnp.float32, jnp.bfloat16
    q = q_ref[0]                                         # (tq, dim_out) bf16
    kv = kv_ref[0]                                       # (Tkv, 2*dim_out) bf16

    def head_score(hh):
        qh = q[:, hh * d_head:(hh + 1) * d_head]
        kh = kv[:, hh * d_head:(hh + 1) * d_head]
        return lax.dot_general(qh, kh, (((1,), (1,)), ((), ())),
                               preferred_element_type=f32) * scale

    if fuse:
        # All heads' raw scores + residual blocks are needed for the 2H->H mix.
        raw = [head_score(hh) for hh in range(num_heads)]
        res = [res_ref[0, hh].astype(f32) for hh in range(num_heads)]
        wf = wf_ref[...]                                 # (H, 2H) f32
        bf = bf_ref[...]                                 # (1, H) f32
        scores = []
        for hh in range(num_heads):
            acc = bf[0:1, hh:hh + 1]                     # (1,1) broadcast
            for jj in range(num_heads):
                acc = acc + wf[hh:hh + 1, jj:jj + 1] * raw[jj]
            for jj in range(num_heads):
                acc = acc + wf[hh:hh + 1, num_heads + jj:num_heads + jj + 1] * res[jj]
            scores.append(acc)
    else:
        scores = None                                    # computed per head below

    # --- softmax (f32) + attn @ v, one head at a time (minimal live state) -
    ctx_parts = []
    for hh in range(num_heads):
        s = scores[hh] if fuse else head_score(hh)
        score_ref[0, hh] = s.astype(score_ref.dtype)     # attention-map output
        m = jnp.max(s, axis=-1, keepdims=True)
        e = jnp.exp(s - m)
        p = e * pl.reciprocal(jnp.sum(e, axis=-1, keepdims=True))
        vh = kv[:, dim_out + hh * d_head:dim_out + (hh + 1) * d_head]
        ctx_parts.append(jnp.dot(p.astype(bf16), vh, preferred_element_type=f32))
    ctx = jnp.concatenate(ctx_parts, axis=-1)            # (tq, dim_out) f32

    # --- single K=dim_out output projection -------------------------------
    out_ref[0] = (jnp.dot(ctx.astype(bf16), wp_ref[...],
                          preferred_element_type=f32)
                  + bp_ref[...]).astype(out_ref.dtype)


# ---------------------------------------------------------------------------
# Plain-JAX glue
# ---------------------------------------------------------------------------

def _im2col(x_img, ksize, stride, pad):
    """(reference only) x_img (B,C,H,W) -> patches (B, K*K, T, C)."""
    b, c, hh, ww = x_img.shape
    xp = jnp.pad(x_img, ((0, 0), (0, 0), (pad, pad), (pad, pad)))
    ho = (hh + 2 * pad - ksize) // stride + 1
    wo = (ww + 2 * pad - ksize) // stride + 1
    taps = []
    for ki in range(ksize):
        for kj in range(ksize):
            rows = ki + stride * jnp.arange(ho)
            cols = kj + stride * jnp.arange(wo)
            p = jnp.take(jnp.take(xp, rows, axis=2), cols, axis=3)
            taps.append(p.reshape(b, c, ho * wo))
    patches = jnp.stack(taps, axis=-1)
    return patches.transpose(0, 3, 2, 1), ho, wo


def _upsample2x_bilinear(x):
    """Matches F.interpolate(scale_factor=2, mode='bilinear', align_corners=False)."""
    def up(x, axis):
        m = x.shape[axis]
        dst = jnp.arange(2 * m)
        src = jnp.maximum((dst + 0.5) / 2.0 - 0.5, 0.0)
        i0 = jnp.minimum(jnp.floor(src).astype(jnp.int32), m - 1)
        i1 = jnp.minimum(i0 + 1, m - 1)
        w1 = (src - i0.astype(jnp.float32)).astype(x.dtype)
        w0 = 1.0 - w1
        shp = [1] * x.ndim
        shp[axis] = 2 * m
        return (jnp.take(x, i0, axis=axis) * w0.reshape(shp)
                + jnp.take(x, i1, axis=axis) * w1.reshape(shp))
    return up(up(x, -2), -1)


def _pick_tq_tile(t_q, cap=256):
    """Largest Tq tile <= cap dividing t_q (multiple of 8 when tiling)."""
    if t_q <= cap:
        return t_q
    for t in range(cap, 7, -8):
        if t_q % t == 0:
            return t
    return t_q


# ---------------------------------------------------------------------------
# Parameters (deterministic synthetic init; shapes follow the module __init__)
# ---------------------------------------------------------------------------

def init_params(key, dim_in, dim_out, num_heads):
    ks = jax.random.split(key, 10)
    f32 = jnp.float32
    return dict(
        # depthwise Conv2d(dim_in, dim_in, 3, groups=dim_in) weight, tap-major.
        w_dw=jax.random.normal(ks[0], (9, dim_in), f32) * 0.2,
        gamma=1.0 + 0.05 * jax.random.normal(ks[1], (1, dim_in), f32),
        beta=0.05 * jax.random.normal(ks[2], (1, dim_in), f32),
        # Linear(dim_in, dim_out, bias=False), stored transposed (in, out).
        wq_t=jax.random.normal(ks[3], (dim_in, dim_out), f32) / jnp.sqrt(dim_in),
        wk_t=jax.random.normal(ks[4], (dim_in, dim_out), f32) / jnp.sqrt(dim_in),
        wv_t=jax.random.normal(ks[5], (dim_in, dim_out), f32) / jnp.sqrt(dim_in),
        # output Linear(dim_out, dim_out): transposed weight + bias.
        wp_t=jax.random.normal(ks[6], (dim_out, dim_out), f32) / jnp.sqrt(dim_out),
        bp=0.02 * jax.random.normal(ks[7], (1, dim_out), f32),
        # fuse_attn Conv2d(2H, H, 1): weight (H, 2H), bias (H,).
        wf=jax.random.normal(ks[8], (num_heads, 2 * num_heads), f32)
        / jnp.sqrt(2.0 * num_heads),
        bf=0.02 * jax.random.normal(ks[9], (num_heads,), f32),
    )


# ---------------------------------------------------------------------------
# Forward pass (Pallas)
# ---------------------------------------------------------------------------

def self_attention_forward(params, x, h, w, messages, *, num_heads, dim_out):
    b, n_tok, c = x.shape
    assert n_tok == h * w and h % 4 == 0 and w % 4 == 0
    d_head = dim_out // num_heads
    scale = float(dim_out) ** -0.5
    f32, bf16 = jnp.float32, jnp.bfloat16

    ho, wo = (h + 2 - 3) // 2 + 1, (w + 2 - 3) // 2 + 1      # q tokens (dw conv)
    hk, wk = (h - 2) // 2 + 1, (w - 2) // 2 + 1              # kv tokens (avg pool)
    t_q, t_kv = ho * wo, hk * wk

    # ---- parity planes of the zero-padded image (x is read ~once) ---------
    # plane[row_parity][col_parity][i, j, :] == x_pad[2*i + rp, 2*j + cp, :]
    x_hwc = x.reshape(b, h, w, c).astype(bf16)
    x_pad = jnp.pad(x_hwc, ((0, 0), (1, 1), (1, 1), (0, 0)))
    planes = [x_pad[:, rp::2, cp::2, :] for rp in (0, 1) for cp in (0, 1)]
    hp, pw = planes[0].shape[1], planes[0].shape[2]

    wq_b = params["wq_t"].astype(bf16)
    wkv_b = jnp.concatenate([params["wk_t"], params["wv_t"]], axis=1).astype(bf16)
    wp_b = params["wp_t"].astype(bf16)

    vmem_cap = 48 * 1024 * 1024
    par1 = pltpu.CompilerParams(dimension_semantics=("parallel",),
                                vmem_limit_bytes=vmem_cap)

    # --- kernel 1: merged dw-conv+LN+proj_q and pool+[Wk|Wv] ---------------
    plane_spec = pl.BlockSpec((1, hp, pw, c), lambda i: (i, 0, 0, 0))
    proj_kernel = functools.partial(_proj_qkv_kernel, ho=ho, wo=wo, hk=hk, wk=wk)
    q_tok, kv_tok = pl.pallas_call(
        proj_kernel,
        grid=(b,),
        in_specs=[plane_spec, plane_spec, plane_spec, plane_spec,
                  pl.BlockSpec((9, c), lambda i: (0, 0)),
                  pl.BlockSpec((1, c), lambda i: (0, 0)),
                  pl.BlockSpec((1, c), lambda i: (0, 0)),
                  pl.BlockSpec((c, dim_out), lambda i: (0, 0)),
                  pl.BlockSpec((c, 2 * dim_out), lambda i: (0, 0))],
        out_specs=(pl.BlockSpec((1, t_q, dim_out), lambda i: (i, 0, 0)),
                   pl.BlockSpec((1, t_kv, 2 * dim_out), lambda i: (i, 0, 0))),
        out_shape=(jax.ShapeDtypeStruct((b, t_q, dim_out), bf16),
                   jax.ShapeDtypeStruct((b, t_kv, 2 * dim_out), bf16)),
        compiler_params=par1,
    )(planes[0], planes[1], planes[2], planes[3],
      params["w_dw"], params["gamma"], params["beta"], wq_b, wkv_b)

    # --- kernel 2: fused attention, grid over (batch, Tq tiles) ------------
    tq_tile = _pick_tq_tile(t_q)
    n_tq = t_q // tq_tile
    fuse = messages.get("attn", None) is not None

    args = [q_tok, kv_tok]
    in_specs = [
        pl.BlockSpec((1, tq_tile, dim_out), lambda i, j: (i, j, 0)),
        pl.BlockSpec((1, t_kv, 2 * dim_out), lambda i, j: (i, 0, 0)),
    ]
    if fuse:
        res = messages["attn"]                           # (B, H, *, Tkv)
        sh, sw = h // 4, w // 4
        a = res.shape[-1]
        assert a == t_kv and 4 * sh * sw == t_q
        _x = (res[:, :, : sh * sw, :].reshape(b, num_heads, sh, sw, a)
              .transpose(0, 1, 4, 2, 3).reshape(b * num_heads, a, sh, sw))
        _x = _upsample2x_bilinear(_x)                    # (B*H, a, 2sh, 2sw)
        res_up = (_x.reshape(b, num_heads, a, 2 * sh, 2 * sw)
                  .transpose(0, 1, 3, 4, 2)
                  .reshape(b, num_heads, t_q, a).astype(bf16))
        args += [res_up, params["wf"], params["bf"].reshape(1, num_heads)]
        in_specs += [
            pl.BlockSpec((1, num_heads, tq_tile, t_kv), lambda i, j: (i, 0, j, 0)),
            pl.BlockSpec((num_heads, 2 * num_heads), lambda i, j: (0, 0)),
            pl.BlockSpec((1, num_heads), lambda i, j: (0, 0)),
        ]
    args += [wp_b, params["bp"]]
    in_specs += [pl.BlockSpec((dim_out, dim_out), lambda i, j: (0, 0)),
                 pl.BlockSpec((1, dim_out), lambda i, j: (0, 0))]

    kernel = functools.partial(
        _fused_attn_kernel, num_heads=num_heads, d_head=d_head,
        dim_out=dim_out, scale=scale, fuse=fuse)
    par2 = pltpu.CompilerParams(dimension_semantics=("parallel", "parallel"),
                                vmem_limit_bytes=vmem_cap)

    attn_score, out = pl.pallas_call(
        kernel,
        grid=(b, n_tq),
        in_specs=in_specs,
        out_specs=(
            pl.BlockSpec((1, num_heads, tq_tile, t_kv), lambda i, j: (i, 0, j, 0)),
            pl.BlockSpec((1, tq_tile, dim_out), lambda i, j: (i, j, 0)),
        ),
        out_shape=(
            jax.ShapeDtypeStruct((b, num_heads, t_q, t_kv), bf16),  # bf16 map
            jax.ShapeDtypeStruct((b, t_q, dim_out), f32),
        ),
        compiler_params=par2,
    )(*args)

    new_messages = dict(messages)
    new_messages["attn"] = attn_score
    return out, new_messages


# ---------------------------------------------------------------------------
# Pure-JAX f32 reference (same math, no Pallas) for a correctness smoke test
# ---------------------------------------------------------------------------

def self_attention_reference(params, x, h, w, messages, *, num_heads, dim_out):
    b, _, c = x.shape
    d_head = dim_out // num_heads
    scale = float(dim_out) ** -0.5
    x_img = x.transpose(0, 2, 1).reshape(b, c, h, w)
    qp, _, _ = _im2col(x_img, 3, 2, 1)
    kvp, _, _ = _im2col(x_img, 2, 2, 0)
    conv_q = jnp.einsum("bktc,kc->btc", qp, params["w_dw"])
    mean = conv_q.mean(-1, keepdims=True)
    var = ((conv_q - mean) ** 2).mean(-1, keepdims=True)
    qn = (conv_q - mean) / jnp.sqrt(var + 1e-5) * params["gamma"][0] + params["beta"][0]
    pooled = kvp.mean(axis=1)
    q, k, v = qn @ params["wq_t"], pooled @ params["wk_t"], pooled @ params["wv_t"]

    def split(t):
        return t.reshape(b, -1, num_heads, d_head).transpose(0, 2, 1, 3)

    qh, kh, vh = split(q), split(k), split(v)
    score = jnp.einsum("bhld,bhtd->bhlt", qh, kh) * scale
    if messages.get("attn", None) is not None:
        res = messages["attn"]
        sh, sw = h // 4, w // 4
        a = res.shape[-1]
        _x = (res[:, :, : sh * sw, :].reshape(b, num_heads, sh, sw, a)
              .transpose(0, 1, 4, 2, 3).reshape(b * num_heads, a, sh, sw))
        _x = _upsample2x_bilinear(_x)
        _x = (_x.reshape(b, num_heads, a, 2 * sh, 2 * sw)
              .transpose(0, 1, 3, 4, 2).reshape(b, num_heads, 4 * sh * sw, a))
        multi = jnp.concatenate([score, _x.astype(score.dtype)], axis=1)
        score = (jnp.einsum("oh,bhlt->bolt", params["wf"], multi)
                 + params["bf"][None, :, None, None])
    attn = jax.nn.softmax(score, axis=-1)
    ctx = jnp.einsum("bhlt,bhtd->bhld", attn, vh)
    ctx = ctx.transpose(0, 2, 1, 3).reshape(b, -1, dim_out)
    out = ctx @ params["wp_t"] + params["bp"][0]
    return out, score


# ---------------------------------------------------------------------------

if __name__ == "__main__":
    key = jax.random.PRNGKey(0)
    b, dim_in, dim_out, num_heads = 2, 32, 64, 4
    h = w = 16                                        # x: (2, 256, 32)

    pkey, xkey = jax.random.split(key)
    params = init_params(pkey, dim_in, dim_out, num_heads)
    x = jax.random.normal(xkey, (b, h * w, dim_in), jnp.float32)

    fwd = jax.jit(lambda p, xx, msgs: self_attention_forward(
        p, xx, h, w, msgs, num_heads=num_heads, dim_out=dim_out))

    # Call 1: messages['attn'] is None (no multi-scale fusion).
    out1, messages1 = fwd(params, x, {"attn": None})
    out1 = jax.block_until_ready(out1)

    # Call 2: feed the previous attention back in (exercises fuse_attn branch).
    out2, messages2 = fwd(params, x, messages1)
    out2 = jax.block_until_ready(out2)

    # Sanity check against the pure-JAX f32 reference.
    ref1, _ = self_attention_reference(
        params, x, h, w, {"attn": None}, num_heads=num_heads, dim_out=dim_out)
    ref2, _ = self_attention_reference(
        params, x, h, w, {"attn": messages1["attn"]},
        num_heads=num_heads, dim_out=dim_out)

    t_q = ((h + 2 * 1 - 3) // 2 + 1) * ((w + 2 * 1 - 3) // 2 + 1)
    t_kv = ((h - 2) // 2 + 1) * ((w - 2) // 2 + 1)
    assert out1.shape == (b, t_q, dim_out) and out2.shape == (b, t_q, dim_out)
    assert messages1["attn"].shape == (b, num_heads, t_q, t_kv)
    assert bool(jnp.all(jnp.isfinite(out1))) and bool(jnp.all(jnp.isfinite(out2)))
    assert jnp.allclose(out1, ref1, rtol=2e-2, atol=2e-2), "branch-1 mismatch"
    assert jnp.allclose(out2, ref2, rtol=2e-2, atol=2e-2), "branch-2 mismatch"

    print("KERNEL_OK")
</pallas_src>

<mosaic_0001>
module attributes {stable_mosaic.version = 11 : i64} {
  func.func @_proj_qkv_kernel(%arg0: i32, %arg1: memref<1x9x9x32xbf16, #tpu.memory_space<vmem>>, %arg2: memref<1x9x9x32xbf16, #tpu.memory_space<vmem>>, %arg3: memref<1x9x9x32xbf16, #tpu.memory_space<vmem>>, %arg4: memref<1x9x9x32xbf16, #tpu.memory_space<vmem>>, %arg5: memref<9x32xf32, #tpu.memory_space<vmem>>, %arg6: memref<1x32xf32, #tpu.memory_space<vmem>>, %arg7: memref<1x32xf32, #tpu.memory_space<vmem>>, %arg8: memref<32x64xbf16, #tpu.memory_space<vmem>>, %arg9: memref<32x128xbf16, #tpu.memory_space<vmem>>, %arg10: memref<1x64x64xbf16, #tpu.memory_space<vmem>>, %arg11: memref<1x64x128xbf16, #tpu.memory_space<vmem>>) attributes {dimension_semantics = [#tpu.dimension_semantics<parallel>], iteration_bounds = array<i64: 2>, scalar_prefetch = 0 : i64, scratch_operands = 0 : i64, tpu.core_type = #tpu.core_type<tc>, window_params = [{transform_indices = @transform_0, window_bounds = array<i64: 1, 9, 9, 32>}, {transform_indices = @transform_1, window_bounds = array<i64: 1, 9, 9, 32>}, {transform_indices = @transform_2, window_bounds = array<i64: 1, 9, 9, 32>}, {transform_indices = @transform_3, window_bounds = array<i64: 1, 9, 9, 32>}, {pipeline_mode = #tpu.pipeline_mode<synchronous>, transform_indices = @transform_4, window_bounds = array<i64: 9, 32>}, {pipeline_mode = #tpu.pipeline_mode<synchronous>, transform_indices = @transform_5, window_bounds = array<i64: 1, 32>}, {pipeline_mode = #tpu.pipeline_mode<synchronous>, transform_indices = @transform_6, window_bounds = array<i64: 1, 32>}, {pipeline_mode = #tpu.pipeline_mode<synchronous>, transform_indices = @transform_7, window_bounds = array<i64: 32, 64>}, {pipeline_mode = #tpu.pipeline_mode<synchronous>, transform_indices = @transform_8, window_bounds = array<i64: 32, 128>}, {transform_indices = @transform_9, window_bounds = array<i64: 1, 64, 64>}, {transform_indices = @transform_10, window_bounds = array<i64: 1, 64, 128>}]} {
    %c0 = arith.constant 0 : index
    %c0_0 = arith.constant 0 : index
    %c0_1 = arith.constant 0 : index
    %c0_2 = arith.constant 0 : index
    %0 = vector.load %arg1[%c0, %c0_0, %c0_1, %c0_2] : memref<1x9x9x32xbf16, #tpu.memory_space<vmem>>, vector<1x9x9x32xbf16>
    %1 = vector.shape_cast %0 : vector<1x9x9x32xbf16> to vector<9x9x32xbf16>
    %2 = arith.extf %1 : vector<9x9x32xbf16> to vector<9x9x32xf32>
    %c0_3 = arith.constant 0 : index
    %c0_4 = arith.constant 0 : index
    %c0_5 = arith.constant 0 : index
    %c0_6 = arith.constant 0 : index
    %3 = vector.load %arg2[%c0_3, %c0_4, %c0_5, %c0_6] : memref<1x9x9x32xbf16, #tpu.memory_space<vmem>>, vector<1x9x9x32xbf16>
    %4 = vector.shape_cast %3 : vector<1x9x9x32xbf16> to vector<9x9x32xbf16>
    %5 = arith.extf %4 : vector<9x9x32xbf16> to vector<9x9x32xf32>
    %c0_7 = arith.constant 0 : index
    %c0_8 = arith.constant 0 : index
    %c0_9 = arith.constant 0 : index
    %c0_10 = arith.constant 0 : index
    %6 = vector.load %arg3[%c0_7, %c0_8, %c0_9, %c0_10] : memref<1x9x9x32xbf16, #tpu.memory_space<vmem>>, vector<1x9x9x32xbf16>
    %7 = vector.shape_cast %6 : vector<1x9x9x32xbf16> to vector<9x9x32xbf16>
    %8 = arith.extf %7 : vector<9x9x32xbf16> to vector<9x9x32xf32>
    %c0_11 = arith.constant 0 : index
    %c0_12 = arith.constant 0 : index
    %c0_13 = arith.constant 0 : index
    %c0_14 = arith.constant 0 : index
    %9 = vector.load %arg4[%c0_11, %c0_12, %c0_13, %c0_14] : memref<1x9x9x32xbf16, #tpu.memory_space<vmem>>, vector<1x9x9x32xbf16>
    %10 = vector.shape_cast %9 : vector<1x9x9x32xbf16> to vector<9x9x32xbf16>
    %11 = arith.extf %10 : vector<9x9x32xbf16> to vector<9x9x32xf32>
    %c0_15 = arith.constant 0 : index
    %c0_16 = arith.constant 0 : index
    %12 = vector.load %arg5[%c0_15, %c0_16] : memref<9x32xf32, #tpu.memory_space<vmem>>, vector<9x32xf32>
    %13 = vector.extract_strided_slice %2 {offsets = [0, 0, 0], sizes = [8, 8, 32], strides = [1, 1, 1]} : vector<9x9x32xf32> to vector<8x8x32xf32>
    %14 = vector.extract_strided_slice %12 {offsets = [0, 0], sizes = [1, 32], strides = [1, 1]} : vector<9x32xf32> to vector<1x32xf32>
    %15 = vector.shape_cast %14 : vector<1x32xf32> to vector<32xf32>
    %16 = vector.shape_cast %15 : vector<32xf32> to vector<1x1x32xf32>
    %17 = vector.broadcast %16 : vector<1x1x32xf32> to vector<8x8x32xf32>
    %18 = arith.mulf %13, %17 : vector<8x8x32xf32>
    %19 = vector.extract_strided_slice %5 {offsets = [0, 0, 0], sizes = [8, 8, 32], strides = [1, 1, 1]} : vector<9x9x32xf32> to vector<8x8x32xf32>
    %20 = vector.extract_strided_slice %12 {offsets = [1, 0], sizes = [1, 32], strides = [1, 1]} : vector<9x32xf32> to vector<1x32xf32>
    %21 = vector.shape_cast %20 : vector<1x32xf32> to vector<32xf32>
    %22 = vector.shape_cast %21 : vector<32xf32> to vector<1x1x32xf32>
    %23 = vector.broadcast %22 : vector<1x1x32xf32> to vector<8x8x32xf32>
    %24 = arith.mulf %19, %23 : vector<8x8x32xf32>
    %25 = arith.addf %18, %24 : vector<8x8x32xf32>
    %26 = vector.extract_strided_slice %2 {offsets = [0, 1, 0], sizes = [8, 8, 32], strides = [1, 1, 1]} : vector<9x9x32xf32> to vector<8x8x32xf32>
    %27 = vector.extract_strided_slice %12 {offsets = [2, 0], sizes = [1, 32], strides = [1, 1]} : vector<9x32xf32> to vector<1x32xf32>
    %28 = vector.shape_cast %27 : vector<1x32xf32> to vector<32xf32>
    %29 = vector.shape_cast %28 : vector<32xf32> to vector<1x1x32xf32>
    %30 = vector.broadcast %29 : vector<1x1x32xf32> to vector<8x8x32xf32>
    %31 = arith.mulf %26, %30 : vector<8x8x32xf32>
    %32 = arith.addf %25, %31 : vector<8x8x32xf32>
    %33 = vector.extract_strided_slice %8 {offsets = [0, 0, 0], sizes = [8, 8, 32], strides = [1, 1, 1]} : vector<9x9x32xf32> to vector<8x8x32xf32>
    %34 = vector.extract_strided_slice %12 {offsets = [3, 0], sizes = [1, 32], strides = [1, 1]} : vector<9x32xf32> to vector<1x32xf32>
    %35 = vector.shape_cast %34 : vector<1x32xf32> to vector<32xf32>
    %36 = vector.shape_cast %35 : vector<32xf32> to vector<1x1x32xf32>
    %37 = vector.broadcast %36 : vector<1x1x32xf32> to vector<8x8x32xf32>
    %38 = arith.mulf %33, %37 : vector<8x8x32xf32>
    %39 = arith.addf %32, %38 : vector<8x8x32xf32>
    %40 = vector.extract_strided_slice %11 {offsets = [0, 0, 0], sizes = [8, 8, 32], strides = [1, 1, 1]} : vector<9x9x32xf32> to vector<8x8x32xf32>
    %41 = vector.extract_strided_slice %12 {offsets = [4, 0], sizes = [1, 32], strides = [1, 1]} : vector<9x32xf32> to vector<1x32xf32>
    %42 = vector.shape_cast %41 : vector<1x32xf32> to vector<32xf32>
    %43 = vector.shape_cast %42 : vector<32xf32> to vector<1x1x32xf32>
    %44 = vector.broadcast %43 : vector<1x1x32xf32> to vector<8x8x32xf32>
    %45 = arith.mulf %40, %44 : vector<8x8x32xf32>
    %46 = arith.addf %39, %45 : vector<8x8x32xf32>
    %47 = vector.extract_strided_slice %8 {offsets = [0, 1, 0], sizes = [8, 8, 32], strides = [1, 1, 1]} : vector<9x9x32xf32> to vector<8x8x32xf32>
    %48 = vector.extract_strided_slice %12 {offsets = [5, 0], sizes = [1, 32], strides = [1, 1]} : vector<9x32xf32> to vector<1x32xf32>
    %49 = vector.shape_cast %48 : vector<1x32xf32> to vector<32xf32>
    %50 = vector.shape_cast %49 : vector<32xf32> to vector<1x1x32xf32>
    %51 = vector.broadcast %50 : vector<1x1x32xf32> to vector<8x8x32xf32>
    %52 = arith.mulf %47, %51 : vector<8x8x32xf32>
    %53 = arith.addf %46, %52 : vector<8x8x32xf32>
    %54 = vector.extract_strided_slice %2 {offsets = [1, 0, 0], sizes = [8, 8, 32], strides = [1, 1, 1]} : vector<9x9x32xf32> to vector<8x8x32xf32>
    %55 = vector.extract_strided_slice %12 {offsets = [6, 0], sizes = [1, 32], strides = [1, 1]} : vector<9x32xf32> to vector<1x32xf32>
    %56 = vector.shape_cast %55 : vector<1x32xf32> to vector<32xf32>
    %57 = vector.shape_cast %56 : vector<32xf32> to vector<1x1x32xf32>
    %58 = vector.broadcast %57 : vector<1x1x32xf32> to vector<8x8x32xf32>
    %59 = arith.mulf %54, %58 : vector<8x8x32xf32>
    %60 = arith.addf %53, %59 : vector<8x8x32xf32>
    %61 = vector.extract_strided_slice %5 {offsets = [1, 0, 0], sizes = [8, 8, 32], strides = [1, 1, 1]} : vector<9x9x32xf32> to vector<8x8x32xf32>
    %62 = vector.extract_strided_slice %12 {offsets = [7, 0], sizes = [1, 32], strides = [1, 1]} : vector<9x32xf32> to vector<1x32xf32>
    %63 = vector.shape_cast %62 : vector<1x32xf32> to vector<32xf32>
    %64 = vector.shape_cast %63 : vector<32xf32> to vector<1x1x32xf32>
    %65 = vector.broadcast %64 : vector<1x1x32xf32> to vector<8x8x32xf32>
    %66 = arith.mulf %61, %65 : vector<8x8x32xf32>
    %67 = arith.addf %60, %66 : vector<8x8x32xf32>
    %68 = vector.extract_strided_slice %2 {offsets = [1, 1, 0], sizes = [8, 8, 32], strides = [1, 1, 1]} : vector<9x9x32xf32> to vector<8x8x32xf32>
    %69 = vector.extract_strided_slice %12 {offsets = [8, 0], sizes = [1, 32], strides = [1, 1]} : vector<9x32xf32> to vector<1x32xf32>
    %70 = vector.shape_cast %69 : vector<1x32xf32> to vector<32xf32>
    %71 = vector.shape_cast %70 : vector<32xf32> to vector<1x1x32xf32>
    %72 = vector.broadcast %71 : vector<1x1x32xf32> to vector<8x8x32xf32>
    %73 = arith.mulf %68, %72 : vector<8x8x32xf32>
    %74 = arith.addf %67, %73 : vector<8x8x32xf32>
    %75 = vector.shape_cast %74 : vector<8x8x32xf32> to vector<64x32xf32>
    %cst = arith.constant dense<0.000000e+00> : vector<64xf32>
    %76 = vector.multi_reduction <add>, %75, %cst [1] : vector<64x32xf32> to vector<64xf32>
    %77 = vector.shape_cast %76 : vector<64xf32> to vector<64x1xf32>
    %cst_17 = arith.constant 3.200000e+01 : f32
    %78 = vector.broadcast %cst_17 : f32 to vector<64x1xf32>
    %79 = arith.divf %77, %78 : vector<64x1xf32>
    %80 = vector.broadcast %79 : vector<64x1xf32> to vector<64x32xf32>
    %81 = arith.subf %75, %80 : vector<64x32xf32>
    %82 = arith.mulf %81, %81 : vector<64x32xf32>
    %cst_18 = arith.constant dense<0.000000e+00> : vector<64xf32>
    %83 = vector.multi_reduction <add>, %82, %cst_18 [1] : vector<64x32xf32> to vector<64xf32>
    %84 = vector.shape_cast %83 : vector<64xf32> to vector<64x1xf32>
    %cst_19 = arith.constant 3.200000e+01 : f32
    %85 = vector.broadcast %cst_19 : f32 to vector<64x1xf32>
    %86 = arith.divf %84, %85 : vector<64x1xf32>
    %87 = vector.broadcast %79 : vector<64x1xf32> to vector<64x32xf32>
    %88 = arith.subf %75, %87 : vector<64x32xf32>
    %cst_20 = arith.constant 9.99999974E-6 : f32
    %89 = vector.broadcast %cst_20 : f32 to vector<64x1xf32>
    %90 = arith.addf %86, %89 : vector<64x1xf32>
    %91 = math.rsqrt %90 : vector<64x1xf32>
    %92 = vector.broadcast %91 : vector<64x1xf32> to vector<64x32xf32>
    %93 = arith.mulf %88, %92 : vector<64x32xf32>
    %c0_21 = arith.constant 0 : index
    %c0_22 = arith.constant 0 : index
    %94 = vector.load %arg6[%c0_21, %c0_22] : memref<1x32xf32, #tpu.memory_space<vmem>>, vector<1x32xf32>
    %95 = vector.shape_cast %94 : vector<1x32xf32> to vector<32xf32>
    %96 = vector.shape_cast %95 : vector<32xf32> to vector<1x32xf32>
    %97 = vector.broadcast %96 : vector<1x32xf32> to vector<64x32xf32>
    %98 = arith.mulf %93, %97 : vector<64x32xf32>
    %c0_23 = arith.constant 0 : index
    %c0_24 = arith.constant 0 : index
    %99 = vector.load %arg7[%c0_23, %c0_24] : memref<1x32xf32, #tpu.memory_space<vmem>>, vector<1x32xf32>
    %100 = vector.shape_cast %99 : vector<1x32xf32> to vector<32xf32>
    %101 = vector.shape_cast %100 : vector<32xf32> to vector<1x32xf32>
    %102 = vector.broadcast %101 : vector<1x32xf32> to vector<64x32xf32>
    %103 = arith.addf %98, %102 : vector<64x32xf32>
    %104 = arith.truncf %103 : vector<64x32xf32> to vector<64x32xbf16>
    %c0_25 = arith.constant 0 : index
    %c0_26 = arith.constant 0 : index
    %105 = vector.load %arg8[%c0_25, %c0_26] : memref<32x64xbf16, #tpu.memory_space<vmem>>, vector<32x64xbf16>
    %cst_27 = arith.constant dense<0.000000e+00> : vector<64x64xf32>
    %106 = tpu.matmul %104, %105, %cst_27 {dimension_numbers = #tpu.dot_dimension_numbers<[1], [0], [0], [1], [0, 0, 1, 1], [], []>} : vector<64x32xbf16>, vector<32x64xbf16>, vector<64x64xf32> -> vector<64x64xf32>
    %107 = arith.truncf %106 : vector<64x64xf32> to vector<64x64xbf16>
    %c0_28 = arith.constant 0 : index
    %c0_29 = arith.constant 0 : index
    %c0_30 = arith.constant 0 : index
    %108 = vector.load %arg10[%c0_28, %c0_29, %c0_30] : memref<1x64x64xbf16, #tpu.memory_space<vmem>>, vector<1x64x64xbf16>
    %109 = vector.shape_cast %108 : vector<1x64x64xbf16> to vector<64x64xbf16>
    %110 = vector.shape_cast %107 : vector<64x64xbf16> to vector<1x64x64xbf16>
    tpu.vector_store %arg10[%c0_28, %c0_29, %c0_30], %110 {strides = array<i32>} : memref<1x64x64xbf16, #tpu.memory_space<vmem>>, vector<1x64x64xbf16>,
    %111 = vector.extract_strided_slice %11 {offsets = [0, 0, 0], sizes = [8, 8, 32], strides = [1, 1, 1]} : vector<9x9x32xf32> to vector<8x8x32xf32>
    %112 = vector.extract_strided_slice %8 {offsets = [0, 1, 0], sizes = [8, 8, 32], strides = [1, 1, 1]} : vector<9x9x32xf32> to vector<8x8x32xf32>
    %113 = arith.addf %111, %112 : vector<8x8x32xf32>
    %114 = vector.extract_strided_slice %5 {offsets = [1, 0, 0], sizes = [8, 8, 32], strides = [1, 1, 1]} : vector<9x9x32xf32> to vector<8x8x32xf32>
    %115 = arith.addf %113, %114 : vector<8x8x32xf32>
    %116 = vector.extract_strided_slice %2 {offsets = [1, 1, 0], sizes = [8, 8, 32], strides = [1, 1, 1]} : vector<9x9x32xf32> to vector<8x8x32xf32>
    %117 = arith.addf %115, %116 : vector<8x8x32xf32>
    %cst_31 = arith.constant 2.500000e-01 : f32
    %118 = vector.broadcast %cst_31 : f32 to vector<8x8x32xf32>
    %119 = arith.mulf %117, %118 : vector<8x8x32xf32>
    %120 = vector.shape_cast %119 : vector<8x8x32xf32> to vector<64x32xf32>
    %121 = arith.truncf %120 : vector<64x32xf32> to vector<64x32xbf16>
    %c0_32 = arith.constant 0 : index
    %c0_33 = arith.constant 0 : index
    %122 = vector.load %arg9[%c0_32, %c0_33] : memref<32x128xbf16, #tpu.memory_space<vmem>>, vector<32x128xbf16>
    %cst_34 = arith.constant dense<0.000000e+00> : vector<64x128xf32>
    %123 = tpu.matmul %121, %122, %cst_34 {dimension_numbers = #tpu.dot_dimension_numbers<[1], [0], [0], [1], [0, 0, 1, 1], [], []>} : vector<64x32xbf16>, vector<32x128xbf16>, vector<64x128xf32> -> vector<64x128xf32>
    %124 = arith.truncf %123 : vector<64x128xf32> to vector<64x128xbf16>
    %c0_35 = arith.constant 0 : index
    %c0_36 = arith.constant 0 : index
    %c0_37 = arith.constant 0 : index
    %125 = vector.load %arg11[%c0_35, %c0_36, %c0_37] : memref<1x64x128xbf16, #tpu.memory_space<vmem>>, vector<1x64x128xbf16>
    %126 = vector.shape_cast %125 : vector<1x64x128xbf16> to vector<64x128xbf16>
    %127 = vector.shape_cast %124 : vector<64x128xbf16> to vector<1x64x128xbf16>
    tpu.vector_store %arg11[%c0_35, %c0_36, %c0_37], %127 {strides = array<i32>} : memref<1x64x128xbf16, #tpu.memory_space<vmem>>, vector<1x64x128xbf16>,
    return
  }
  func.func @transform_0(%arg0: i32) -> (i32, i32, i32, i32) {
    %c0_i32 = arith.constant 0 : i32
    %c0_i32_0 = arith.constant 0 : i32
    %c0_i32_1 = arith.constant 0 : i32
    %c0_i32_2 = arith.constant 0 : i32
    return %arg0, %c0_i32, %c0_i32_0, %c0_i32_1 : i32, i32, i32, i32
  }
  func.func @transform_1(%arg0: i32) -> (i32, i32, i32, i32) {
    %c0_i32 = arith.constant 0 : i32
    %c0_i32_0 = arith.constant 0 : i32
    %c0_i32_1 = arith.constant 0 : i32
    %c0_i32_2 = arith.constant 0 : i32
    return %arg0, %c0_i32, %c0_i32_0, %c0_i32_1 : i32, i32, i32, i32
  }
  func.func @transform_2(%arg0: i32) -> (i32, i32, i32, i32) {
    %c0_i32 = arith.constant 0 : i32
    %c0_i32_0 = arith.constant 0 : i32
    %c0_i32_1 = arith.constant 0 : i32
    %c0_i32_2 = arith.constant 0 : i32
    return %arg0, %c0_i32, %c0_i32_0, %c0_i32_1 : i32, i32, i32, i32
  }
  func.func @transform_3(%arg0: i32) -> (i32, i32, i32, i32) {
    %c0_i32 = arith.constant 0 : i32
    %c0_i32_0 = arith.constant 0 : i32
    %c0_i32_1 = arith.constant 0 : i32
    %c0_i32_2 = arith.constant 0 : i32
    return %arg0, %c0_i32, %c0_i32_0, %c0_i32_1 : i32, i32, i32, i32
  }
  func.func @transform_4(%arg0: i32) -> (i32, i32) {
    %c0_i32 = arith.constant 0 : i32
    %c0_i32_0 = arith.constant 0 : i32
    %c0_i32_1 = arith.constant 0 : i32
    return %c0_i32, %c0_i32_0 : i32, i32
  }
  func.func @transform_5(%arg0: i32) -> (i32, i32) {
    %c0_i32 = arith.constant 0 : i32
    %c0_i32_0 = arith.constant 0 : i32
    %c0_i32_1 = arith.constant 0 : i32
    return %c0_i32, %c0_i32_0 : i32, i32
  }
  func.func @transform_6(%arg0: i32) -> (i32, i32) {
    %c0_i32 = arith.constant 0 : i32
    %c0_i32_0 = arith.constant 0 : i32
    %c0_i32_1 = arith.constant 0 : i32
    return %c0_i32, %c0_i32_0 : i32, i32
  }
  func.func @transform_7(%arg0: i32) -> (i32, i32) {
    %c0_i32 = arith.constant 0 : i32
    %c0_i32_0 = arith.constant 0 : i32
    %c0_i32_1 = arith.constant 0 : i32
    return %c0_i32, %c0_i32_0 : i32, i32
  }
  func.func @transform_8(%arg0: i32) -> (i32, i32) {
    %c0_i32 = arith.constant 0 : i32
    %c0_i32_0 = arith.constant 0 : i32
    %c0_i32_1 = arith.constant 0 : i32
    return %c0_i32, %c0_i32_0 : i32, i32
  }
  func.func @transform_9(%arg0: i32) -> (i32, i32, i32) {
    %c0_i32 = arith.constant 0 : i32
    %c0_i32_0 = arith.constant 0 : i32
    %c0_i32_1 = arith.constant 0 : i32
    return %arg0, %c0_i32, %c0_i32_0 : i32, i32, i32
  }
  func.func @transform_10(%arg0: i32) -> (i32, i32, i32) {
    %c0_i32 = arith.constant 0 : i32
    %c0_i32_0 = arith.constant 0 : i32
    %c0_i32_1 = arith.constant 0 : i32
    return %arg0, %c0_i32, %c0_i32_0 : i32, i32, i32
  }
}

module attributes {stable_mosaic.version = 11 : i64} {
  func.func @_fused_attn_kernel(%arg0: i32, %arg1: i32, %arg2: memref<1x64x64xbf16, #tpu.memory_space<vmem>>, %arg3: memref<1x64x128xbf16, #tpu.memory_space<vmem>>, %arg4: memref<64x64xbf16, #tpu.memory_space<vmem>>, %arg5: memref<1x64xf32, #tpu.memory_space<vmem>>, %arg6: memref<1x4x64x64xbf16, #tpu.memory_space<vmem>>, %arg7: memref<1x64x64xf32, #tpu.memory_space<vmem>>) attributes {dimension_semantics = [#tpu.dimension_semantics<parallel>, #tpu.dimension_semantics<parallel>], iteration_bounds = array<i64: 2, 1>, scalar_prefetch = 0 : i64, scratch_operands = 0 : i64, tpu.core_type = #tpu.core_type<tc>, window_params = [{transform_indices = @transform_0, window_bounds = array<i64: 1, 64, 64>}, {transform_indices = @transform_1, window_bounds = array<i64: 1, 64, 128>}, {pipeline_mode = #tpu.pipeline_mode<synchronous>, transform_indices = @transform_2, window_bounds = array<i64: 64, 64>}, {pipeline_mode = #tpu.pipeline_mode<synchronous>, transform_indices = @transform_3, window_bounds = array<i64: 1, 64>}, {transform_indices = @transform_4, window_bounds = array<i64: 1, 4, 64, 64>}, {transform_indices = @transform_5, window_bounds = array<i64: 1, 64, 64>}]} {
    %c0 = arith.constant 0 : index
    %c0_0 = arith.constant 0 : index
    %c0_1 = arith.constant 0 : index
    %0 = vector.load %arg2[%c0, %c0_0, %c0_1] : memref<1x64x64xbf16, #tpu.memory_space<vmem>>, vector<1x64x64xbf16>
    %1 = vector.shape_cast %0 : vector<1x64x64xbf16> to vector<64x64xbf16>
    %c0_2 = arith.constant 0 : index
    %c0_3 = arith.constant 0 : index
    %c0_4 = arith.constant 0 : index
    %2 = vector.load %arg3[%c0_2, %c0_3, %c0_4] : memref<1x64x128xbf16, #tpu.memory_space<vmem>>, vector<1x64x128xbf16>
    %3 = vector.shape_cast %2 : vector<1x64x128xbf16> to vector<64x128xbf16>
    %4 = vector.extract_strided_slice %1 {offsets = [0, 0], sizes = [64, 16], strides = [1, 1]} : vector<64x64xbf16> to vector<64x16xbf16>
    %5 = vector.extract_strided_slice %3 {offsets = [0, 0], sizes = [64, 16], strides = [1, 1]} : vector<64x128xbf16> to vector<64x16xbf16>
    %cst = arith.constant dense<0.000000e+00> : vector<64x64xf32>
    %6 = tpu.matmul %4, %5, %cst {dimension_numbers = #tpu.dot_dimension_numbers<[1], [1], [0], [0], [0, 0, 1, 0], [], []>} : vector<64x16xbf16>, vector<64x16xbf16>, vector<64x64xf32> -> vector<64x64xf32>
    %cst_5 = arith.constant 1.250000e-01 : f32
    %7 = vector.broadcast %cst_5 : f32 to vector<64x64xf32>
    %8 = arith.mulf %6, %7 : vector<64x64xf32>
    %9 = arith.truncf %8 : vector<64x64xf32> to vector<64x64xbf16>
    %c0_6 = arith.constant 0 : index
    %c0_7 = arith.constant 0 : index
    %c0_8 = arith.constant 0 : index
    %c0_9 = arith.constant 0 : index
    %10 = vector.load %arg6[%c0_6, %c0_7, %c0_8, %c0_9] : memref<1x4x64x64xbf16, #tpu.memory_space<vmem>>, vector<1x1x64x64xbf16>
    %11 = vector.shape_cast %10 : vector<1x1x64x64xbf16> to vector<64x64xbf16>
    %12 = vector.shape_cast %9 : vector<64x64xbf16> to vector<1x1x64x64xbf16>
    tpu.vector_store %arg6[%c0_6, %c0_7, %c0_8, %c0_9], %12 {strides = array<i32>} : memref<1x4x64x64xbf16, #tpu.memory_space<vmem>>, vector<1x1x64x64xbf16>,
    %cst_10 = arith.constant dense<0xFF800000> : vector<64xf32>
    %13 = vector.multi_reduction <maximumf>, %8, %cst_10 [1] : vector<64x64xf32> to vector<64xf32>
    %14 = vector.shape_cast %13 : vector<64xf32> to vector<64x1xf32>
    %15 = vector.broadcast %14 : vector<64x1xf32> to vector<64x64xf32>
    %16 = arith.subf %8, %15 : vector<64x64xf32>
    %17 = math.exp %16 : vector<64x64xf32>
    %cst_11 = arith.constant dense<0.000000e+00> : vector<64xf32>
    %18 = vector.multi_reduction <add>, %17, %cst_11 [1] : vector<64x64xf32> to vector<64xf32>
    %19 = vector.shape_cast %18 : vector<64xf32> to vector<64x1xf32>
    %20 = tpu.reciprocal %19 : vector<64x1xf32> -> vector<64x1xf32>
    %21 = vector.broadcast %20 : vector<64x1xf32> to vector<64x64xf32>
    %22 = arith.mulf %17, %21 : vector<64x64xf32>
    %23 = vector.extract_strided_slice %3 {offsets = [0, 64], sizes = [64, 16], strides = [1, 1]} : vector<64x128xbf16> to vector<64x16xbf16>
    %24 = arith.truncf %22 : vector<64x64xf32> to vector<64x64xbf16>
    %cst_12 = arith.constant dense<0.000000e+00> : vector<64x16xf32>
    %25 = tpu.matmul %24, %23, %cst_12 {dimension_numbers = #tpu.dot_dimension_numbers<[1], [0], [0], [1], [0, 0, 1, 1], [], []>} : vector<64x64xbf16>, vector<64x16xbf16>, vector<64x16xf32> -> vector<64x16xf32>
    %26 = vector.extract_strided_slice %1 {offsets = [0, 16], sizes = [64, 16], strides = [1, 1]} : vector<64x64xbf16> to vector<64x16xbf16>
    %27 = vector.extract_strided_slice %3 {offsets = [0, 16], sizes = [64, 16], strides = [1, 1]} : vector<64x128xbf16> to vector<64x16xbf16>
    %cst_13 = arith.constant dense<0.000000e+00> : vector<64x64xf32>
    %28 = tpu.matmul %26, %27, %cst_13 {dimension_numbers = #tpu.dot_dimension_numbers<[1], [1], [0], [0], [0, 0, 1, 0], [], []>} : vector<64x16xbf16>, vector<64x16xbf16>, vector<64x64xf32> -> vector<64x64xf32>
    %cst_14 = arith.constant 1.250000e-01 : f32
    %29 = vector.broadcast %cst_14 : f32 to vector<64x64xf32>
    %30 = arith.mulf %28, %29 : vector<64x64xf32>
    %31 = arith.truncf %30 : vector<64x64xf32> to vector<64x64xbf16>
    %c0_15 = arith.constant 0 : index
    %c1 = arith.constant 1 : index
    %c0_16 = arith.constant 0 : index
    %c0_17 = arith.constant 0 : index
    %32 = vector.load %arg6[%c0_15, %c1, %c0_16, %c0_17] : memref<1x4x64x64xbf16, #tpu.memory_space<vmem>>, vector<1x1x64x64xbf16>
    %33 = vector.shape_cast %32 : vector<1x1x64x64xbf16> to vector<64x64xbf16>
    %34 = vector.shape_cast %31 : vector<64x64xbf16> to vector<1x1x64x64xbf16>
    tpu.vector_store %arg6[%c0_15, %c1, %c0_16, %c0_17], %34 {strides = array<i32>} : memref<1x4x64x64xbf16, #tpu.memory_space<vmem>>, vector<1x1x64x64xbf16>,
    %cst_18 = arith.constant dense<0xFF800000> : vector<64xf32>
    %35 = vector.multi_reduction <maximumf>, %30, %cst_18 [1] : vector<64x64xf32> to vector<64xf32>
    %36 = vector.shape_cast %35 : vector<64xf32> to vector<64x1xf32>
    %37 = vector.broadcast %36 : vector<64x1xf32> to vector<64x64xf32>
    %38 = arith.subf %30, %37 : vector<64x64xf32>
    %39 = math.exp %38 : vector<64x64xf32>
    %cst_19 = arith.constant dense<0.000000e+00> : vector<64xf32>
    %40 = vector.multi_reduction <add>, %39, %cst_19 [1] : vector<64x64xf32> to vector<64xf32>
    %41 = vector.shape_cast %40 : vector<64xf32> to vector<64x1xf32>
    %42 = tpu.reciprocal %41 : vector<64x1xf32> -> vector<64x1xf32>
    %43 = vector.broadcast %42 : vector<64x1xf32> to vector<64x64xf32>
    %44 = arith.mulf %39, %43 : vector<64x64xf32>
    %45 = vector.extract_strided_slice %3 {offsets = [0, 80], sizes = [64, 16], strides = [1, 1]} : vector<64x128xbf16> to vector<64x16xbf16>
    %46 = arith.truncf %44 : vector<64x64xf32> to vector<64x64xbf16>
    %cst_20 = arith.constant dense<0.000000e+00> : vector<64x16xf32>
    %47 = tpu.matmul %46, %45, %cst_20 {dimension_numbers = #tpu.dot_dimension_numbers<[1], [0], [0], [1], [0, 0, 1, 1], [], []>} : vector<64x64xbf16>, vector<64x16xbf16>, vector<64x16xf32> -> vector<64x16xf32>
    %48 = vector.extract_strided_slice %1 {offsets = [0, 32], sizes = [64, 16], strides = [1, 1]} : vector<64x64xbf16> to vector<64x16xbf16>
    %49 = vector.extract_strided_slice %3 {offsets = [0, 32], sizes = [64, 16], strides = [1, 1]} : vector<64x128xbf16> to vector<64x16xbf16>
    %cst_21 = arith.constant dense<0.000000e+00> : vector<64x64xf32>
    %50 = tpu.matmul %48, %49, %cst_21 {dimension_numbers = #tpu.dot_dimension_numbers<[1], [1], [0], [0], [0, 0, 1, 0], [], []>} : vector<64x16xbf16>, vector<64x16xbf16>, vector<64x64xf32> -> vector<64x64xf32>
    %cst_22 = arith.constant 1.250000e-01 : f32
    %51 = vector.broadcast %cst_22 : f32 to vector<64x64xf32>
    %52 = arith.mulf %50, %51 : vector<64x64xf32>
    %53 = arith.truncf %52 : vector<64x64xf32> to vector<64x64xbf16>
    %c0_23 = arith.constant 0 : index
    %c2 = arith.constant 2 : index
    %c0_24 = arith.constant 0 : index
    %c0_25 = arith.constant 0 : index
    %54 = vector.load %arg6[%c0_23, %c2, %c0_24, %c0_25] : memref<1x4x64x64xbf16, #tpu.memory_space<vmem>>, vector<1x1x64x64xbf16>
    %55 = vector.shape_cast %54 : vector<1x1x64x64xbf16> to vector<64x64xbf16>
    %56 = vector.shape_cast %53 : vector<64x64xbf16> to vector<1x1x64x64xbf16>
    tpu.vector_store %arg6[%c0_23, %c2, %c0_24, %c0_25], %56 {strides = array<i32>} : memref<1x4x64x64xbf16, #tpu.memory_space<vmem>>, vector<1x1x64x64xbf16>,
    %cst_26 = arith.constant dense<0xFF800000> : vector<64xf32>
    %57 = vector.multi_reduction <maximumf>, %52, %cst_26 [1] : vector<64x64xf32> to vector<64xf32>
    %58 = vector.shape_cast %57 : vector<64xf32> to vector<64x1xf32>
    %59 = vector.broadcast %58 : vector<64x1xf32> to vector<64x64xf32>
    %60 = arith.subf %52, %59 : vector<64x64xf32>
    %61 = math.exp %60 : vector<64x64xf32>
    %cst_27 = arith.constant dense<0.000000e+00> : vector<64xf32>
    %62 = vector.multi_reduction <add>, %61, %cst_27 [1] : vector<64x64xf32> to vector<64xf32>
    %63 = vector.shape_cast %62 : vector<64xf32> to vector<64x1xf32>
    %64 = tpu.reciprocal %63 : vector<64x1xf32> -> vector<64x1xf32>
    %65 = vector.broadcast %64 : vector<64x1xf32> to vector<64x64xf32>
    %66 = arith.mulf %61, %65 : vector<64x64xf32>
    %67 = vector.extract_strided_slice %3 {offsets = [0, 96], sizes = [64, 16], strides = [1, 1]} : vector<64x128xbf16> to vector<64x16xbf16>
    %68 = arith.truncf %66 : vector<64x64xf32> to vector<64x64xbf16>
    %cst_28 = arith.constant dense<0.000000e+00> : vector<64x16xf32>
    %69 = tpu.matmul %68, %67, %cst_28 {dimension_numbers = #tpu.dot_dimension_numbers<[1], [0], [0], [1], [0, 0, 1, 1], [], []>} : vector<64x64xbf16>, vector<64x16xbf16>, vector<64x16xf32> -> vector<64x16xf32>
    %70 = vector.extract_strided_slice %1 {offsets = [0, 48], sizes = [64, 16], strides = [1, 1]} : vector<64x64xbf16> to vector<64x16xbf16>
    %71 = vector.extract_strided_slice %3 {offsets = [0, 48], sizes = [64, 16], strides = [1, 1]} : vector<64x128xbf16> to vector<64x16xbf16>
    %cst_29 = arith.constant dense<0.000000e+00> : vector<64x64xf32>
    %72 = tpu.matmul %70, %71, %cst_29 {dimension_numbers = #tpu.dot_dimension_numbers<[1], [1], [0], [0], [0, 0, 1, 0], [], []>} : vector<64x16xbf16>, vector<64x16xbf16>, vector<64x64xf32> -> vector<64x64xf32>
    %cst_30 = arith.constant 1.250000e-01 : f32
    %73 = vector.broadcast %cst_30 : f32 to vector<64x64xf32>
    %74 = arith.mulf %72, %73 : vector<64x64xf32>
    %75 = arith.truncf %74 : vector<64x64xf32> to vector<64x64xbf16>
    %c0_31 = arith.constant 0 : index
    %c3 = arith.constant 3 : index
    %c0_32 = arith.constant 0 : index
    %c0_33 = arith.constant 0 : index
    %76 = vector.load %arg6[%c0_31, %c3, %c0_32, %c0_33] : memref<1x4x64x64xbf16, #tpu.memory_space<vmem>>, vector<1x1x64x64xbf16>
    %77 = vector.shape_cast %76 : vector<1x1x64x64xbf16> to vector<64x64xbf16>
    %78 = vector.shape_cast %75 : vector<64x64xbf16> to vector<1x1x64x64xbf16>
    tpu.vector_store %arg6[%c0_31, %c3, %c0_32, %c0_33], %78 {strides = array<i32>} : memref<1x4x64x64xbf16, #tpu.memory_space<vmem>>, vector<1x1x64x64xbf16>,
    %cst_34 = arith.constant dense<0xFF800000> : vector<64xf32>
    %79 = vector.multi_reduction <maximumf>, %74, %cst_34 [1] : vector<64x64xf32> to vector<64xf32>
    %80 = vector.shape_cast %79 : vector<64xf32> to vector<64x1xf32>
    %81 = vector.broadcast %80 : vector<64x1xf32> to vector<64x64xf32>
    %82 = arith.subf %74, %81 : vector<64x64xf32>
    %83 = math.exp %82 : vector<64x64xf32>
    %cst_35 = arith.constant dense<0.000000e+00> : vector<64xf32>
    %84 = vector.multi_reduction <add>, %83, %cst_35 [1] : vector<64x64xf32> to vector<64xf32>
    %85 = vector.shape_cast %84 : vector<64xf32> to vector<64x1xf32>
    %86 = tpu.reciprocal %85 : vector<64x1xf32> -> vector<64x1xf32>
    %87 = vector.broadcast %86 : vector<64x1xf32> to vector<64x64xf32>
    %88 = arith.mulf %83, %87 : vector<64x64xf32>
    %89 = vector.extract_strided_slice %3 {offsets = [0, 112], sizes = [64, 16], strides = [1, 1]} : vector<64x128xbf16> to vector<64x16xbf16>
    %90 = arith.truncf %88 : vector<64x64xf32> to vector<64x64xbf16>
    %cst_36 = arith.constant dense<0.000000e+00> : vector<64x16xf32>
    %91 = tpu.matmul %90, %89, %cst_36 {dimension_numbers = #tpu.dot_dimension_numbers<[1], [0], [0], [1], [0, 0, 1, 1], [], []>} : vector<64x64xbf16>, vector<64x16xbf16>, vector<64x16xf32> -> vector<64x16xf32>
    %92 = tpu.concatenate %25, %47, %69, %91 in 1 : vector<64x16xf32>, vector<64x16xf32>, vector<64x16xf32>, vector<64x16xf32> -> vector<64x64xf32>
    %93 = arith.truncf %92 : vector<64x64xf32> to vector<64x64xbf16>
    %c0_37 = arith.constant 0 : index
    %c0_38 = arith.constant 0 : index
    %94 = vector.load %arg4[%c0_37, %c0_38] : memref<64x64xbf16, #tpu.memory_space<vmem>>, vector<64x64xbf16>
    %cst_39 = arith.constant dense<0.000000e+00> : vector<64x64xf32>
    %95 = tpu.matmul %93, %94, %cst_39 {dimension_numbers = #tpu.dot_dimension_numbers<[1], [0], [0], [1], [0, 0, 1, 1], [], []>} : vector<64x64xbf16>, vector<64x64xbf16>, vector<64x64xf32> -> vector<64x64xf32>
    %c0_40 = arith.constant 0 : index
    %c0_41 = arith.constant 0 : index
    %96 = vector.load %arg5[%c0_40, %c0_41] : memref<1x64xf32, #tpu.memory_space<vmem>>, vector<1x64xf32>
    %97 = vector.broadcast %96 : vector<1x64xf32> to vector<64x64xf32>
    %98 = arith.addf %95, %97 : vector<64x64xf32>
    %c0_42 = arith.constant 0 : index
    %c0_43 = arith.constant 0 : index
    %c0_44 = arith.constant 0 : index
    %99 = vector.load %arg7[%c0_42, %c0_43, %c0_44] : memref<1x64x64xf32, #tpu.memory_space<vmem>>, vector<1x64x64xf32>
    %100 = vector.shape_cast %99 : vector<1x64x64xf32> to vector<64x64xf32>
    %101 = vector.shape_cast %98 : vector<64x64xf32> to vector<1x64x64xf32>
    tpu.vector_store %arg7[%c0_42, %c0_43, %c0_44], %101 {strides = array<i32>} : memref<1x64x64xf32, #tpu.memory_space<vmem>>, vector<1x64x64xf32>,
    return
  }
  func.func @transform_0(%arg0: i32, %arg1: i32) -> (i32, i32, i32) {
    %c0_i32 = arith.constant 0 : i32
    %c0_i32_0 = arith.constant 0 : i32
    return %arg0, %arg1, %c0_i32 : i32, i32, i32
  }
  func.func @transform_1(%arg0: i32, %arg1: i32) -> (i32, i32, i32) {
    %c0_i32 = arith.constant 0 : i32
    %c0_i32_0 = arith.constant 0 : i32
    %c0_i32_1 = arith.constant 0 : i32
    return %arg0, %c0_i32, %c0_i32_0 : i32, i32, i32
  }
  func.func @transform_2(%arg0: i32, %arg1: i32) -> (i32, i32) {
    %c0_i32 = arith.constant 0 : i32
    %c0_i32_0 = arith.constant 0 : i32
    %c0_i32_1 = arith.constant 0 : i32
    return %c0_i32, %c0_i32_0 : i32, i32
  }
  func.func @transform_3(%arg0: i32, %arg1: i32) -> (i32, i32) {
    %c0_i32 = arith.constant 0 : i32
    %c0_i32_0 = arith.constant 0 : i32
    %c0_i32_1 = arith.constant 0 : i32
    return %c0_i32, %c0_i32_0 : i32, i32
  }
  func.func @transform_4(%arg0: i32, %arg1: i32) -> (i32, i32, i32, i32) {
    %c0_i32 = arith.constant 0 : i32
    %c0_i32_0 = arith.constant 0 : i32
    %c0_i32_1 = arith.constant 0 : i32
    return %arg0, %c0_i32, %arg1, %c0_i32_0 : i32, i32, i32, i32
  }
  func.func @transform_5(%arg0: i32, %arg1: i32) -> (i32, i32, i32) {
    %c0_i32 = arith.constant 0 : i32
    %c0_i32_0 = arith.constant 0 : i32
    return %arg0, %arg1, %c0_i32 : i32, i32, i32
  }
}

</mosaic_0001>

<bundles_post_ra>
// kernel: _lambda_.2
= control target key start
LH: loop header
LB: loop body
LE: loop exit
PB: predicated region body
PF: predicated region fallthrough
CT: control target
= control target key end

     0   :  { %s1757_s13 = smov 0   ;;  %s2407_s0 = inlined_call_operand.vmem [shape: bf16[2,9,9,32], index: 0, kind: input, shape index: {}]   ;;  %s2408_s1 = inlined_call_operand.vmem [shape: bf16[2,9,9,32], index: 1, kind: input, shape index: {}]   ;;  %s2409_s2 = inlined_call_operand.vmem [shape: bf16[2,9,9,32], index: 2, kind: input, shape index: {}]   ;;  %s2410_s3 = inlined_call_operand.vmem [shape: bf16[2,9,9,32], index: 3, kind: input, shape index: {}]   ;;  %s2411_s4 = inlined_call_operand.vmem [shape: f32[9,32], index: 4, kind: input, shape index: {}]   ;;  %s2412_s5 = inlined_call_operand.vmem [shape: f32[1,32], index: 5, kind: input, shape index: {}]   ;;  %s2413_s6 = inlined_call_operand.vmem [shape: f32[1,32], index: 6, kind: input, shape index: {}]   ;;  %s2414_s7 = inlined_call_operand.vmem [shape: bf16[32,64], index: 7, kind: input, shape index: {}]   ;;  %s2415_s8 = inlined_call_operand.vmem [shape: bf16[32,128], index: 8, kind: input, shape index: {}]   ;;  %s2416_s9 = inlined_call_operand.vmem [shape: bf16[2,64,64], index: 9, kind: output, shape index: {0}]   ;;  %s2417_s10 = inlined_call_operand.vmem [shape: bf16[2,64,128], index: 10, kind: output, shape index: {1}]  }
   0x1 LB: > { %s1542_s14 = sadd.s32 4294967295, %s1700_s13   ;;  %p1546_p0 = scmp.ge.s32.totalorder %s1700_s13, 1  ;;  %s1700_s13 = sphi %s1757_s13, %s21_s13  }
   0x2   : > { %p345_p1 = scmp.lt.s32.totalorder %s1700_s13, 3 }
   0x4   : > { %p346_p2 = pnand %p1546_p0, %p345_p1 }
   0x6   : > { %349 = sbr.rel (%p346_p2) target bundleno = 638 (0x27e), region = 56 }
   0xd   : > { %p403_p3 = scmp.lt.s32.totalorder %s1542_s14, 1  ;;  %v538_v0 = vlaneseq  ;;  %v1768_v1 = vld [vmem:[%s2411_s4] sm:$0xff]  ;;  %vm606_vm0 = vcmask 1046528   ;;  %v1845_v34 = vld [vmem:[%s2411_s4 + $0x8] ss:$0 sm:$0xff]  ;;  %vm879_vm1 = vcmask 261120  }
   0xe   : > { %vm1144_vm2 = vcmask 519168  }
   0xf   : > { %s2508_s14 = smov (!%p403_p3, %s1542_s14), 1  ;;  %v1772_v2 = vshrl.u32 %v538_v0, 7 }
  0x10   : > { %s1665_s17 = smul.u32 72, %s2508_s14 }
  0x11   : > { %v540_v3 = vsub.s32 0, %v1772_v2  ;;  %v552_v4 = vsub.s32 1, %v1772_v2  ;;  %v572_v5 = vsub.s32 2, %v1772_v2  ;;  %v649_v6 = vsub.s32 3, %v1772_v2 }
  0x12   : > { %v669_v7 = vsub.s32 4, %v1772_v2  ;;  %v689_v8 = vsub.s32 5, %v1772_v2  ;;  %s1784_s20 = scalar_lea.vmem %s2407_s0, %s1665_s17  ;;  %s1789_s23 = scalar_lea.vmem %s2408_s1, %s1665_s17  ;;  %v765_v11 = vsub.s32 6, %v1772_v2  ;;  %v785_v37 = vsub.s32 7, %v1772_v2 }
  0x13   : > { %v1792_v9 = vrot.slane %v1768_v1, %v540_v3  ;;  %v1795_v10 = vrot.slane %v1768_v1, %v572_v5  ;;  %s1801_s26 = scalar_lea.vmem %s2409_s2, %s1665_s17  ;;  %s1806_s29 = scalar_lea.vmem %s2410_s3, %s1665_s17  ;;  %v434_v12 = vld [vmem:[%s1784_s20] ss:$8 sps:$4 sm:$0xff]   ;;  %v435_v13 = vld [vmem:[%s1784_s20 + $0x4] sm:$0x1]  ;;  %v437_v14 = vld [vmem:[%s1784_s20 + $0xc] sm:$0x1]  ;;  %v1812_v15 = vrot.slane %v1768_v1, %v552_v4  ;;  %v1815_v16 = vrot.slane %v1768_v1, %v649_v6 }
  0x14   : > { %v452_v17 = vunpack.c.l.bf16 %v434_v12  ;;  %v453_v18 = vunpack.c.l.bf16 %v435_v13  ;;  %v470_v19 = vld [vmem:[%s1789_s23] ss:$8 sps:$4 sm:$0xff]   ;;  %v1820_v21 = vld [vmem:[%s1801_s26 + $0x4] sm:$0x1]  ;;  %v1823_v22 = vrot.slane %v1768_v1, %v669_v7  ;;  %v1826_v23 = vrot.slane %v1768_v1, %v689_v8  ;;  %v438_v42 = vld [vmem:[%s1784_s20 + $0x10] ss:$8 sps:$4 sm:$0xff]  }
  0x15   : > { %v488_v20 = vld [vmem:[%s1801_s26] ss:$16 sps:$4 sm:$0xff]   ;;  %v1828_v24 = vunpack.c.l.bf16 %v437_v14  ;;  %v479_v25 = vunpack.c.l.bf16 %v470_v19  ;;  %v2423_v27 = vunpack.c.l.bf16 %v1820_v21  ;;  %v1840_v33 = vunpack.c.h.bf16 %v434_v12  ;;  %v439_v47 = vld [vmem:[%s1784_s20 + $0x14] sm:$0x1]  ;;  %v441_v5 = vld [vmem:[%s1784_s20 + $0x1c] sm:$0x1] }
  0x16   : > { %v1830_v26 = vunpack.c.l.bf16 %v488_v20  ;;  %v1834_v28 = vld [vmem:[%s1806_s29] ss:$16 sps:$4 sm:$0xff]   ;;  %v542_v30 = vmul.f32 %v1792_v9, %v452_v17  ;;  %v574_v31 = vmul.f32 %v1795_v10, %v452_v17  ;;  %v575_v32 = vmul.f32 %v1795_v10, %v453_v18  ;;  %v1888_v60 = vld [vmem:[%s1801_s26 + $0x14] sm:$0x1] }
  0x17   : > { %v2421_v29 = vunpack.c.l.bf16 %v1834_v28  ;;  %v554_v35 = vmul.f32 %v1812_v15, %v479_v25  ;;  %v1849_v36 = vrot.slane %v1768_v1, %v765_v11  ;;  %v1852_v38 = vunpack.c.h.bf16 %v470_v19  ;;  %v472_v52 = vld [vmem:[%s1789_s23 + $0x10] ss:$8 sps:$4 sm:$0xff]  }
  0x18   : > { %v607_v39 = vrot.slane %v574_v31, 1  ;;  %v608_v40 = vrot.slane %v575_v32, 1  ;;  %v691_v41 = vmul.f32 %v1826_v23, %v1830_v26  ;;  %v1859_v44 = vmul.f32 %v1795_v10, %v1828_v24 }
  0x19   : > { %v562_v43 = vadd.f32 %v554_v35, %v542_v30  ;;  %v651_v45 = vmul.f32 %v1815_v16, %v1830_v26  ;;  %v692_v46 = vmul.f32 %v1826_v23, %v2423_v27  ;;  %v671_v49 = vmul.f32 %v1823_v22, %v2421_v29 }
  0x1a   : > { %v609_v48 = vsel %vm606_vm0, %v607_v39, %v608_v40  ;;  %v723_v50 = vrot.slane %v691_v41, 1  ;;  %v807_v51 = vmul.f32 %v1845_v34, %v1840_v33  ;;  %v808_v55 = vmul.f32 %v1845_v34, %v1828_v24 }
  0x1b   : > { %v639_v53 = vadd.f32 %v609_v48, %v562_v43  ;;  %v724_v54 = vrot.slane %v692_v46, 1  ;;  %v1876_v56 = vunpack.c.l.bf16 %v438_v42  ;;  %v1880_v57 = vmul.f32 %v1812_v15, %v1852_v38  ;;  %v1927_v43 = vld [vmem:[%s1801_s26 + $0xc] sm:$0x1] }
  0x1c   : > { %v1883_v58 = vrot.slane %v1768_v1, %v785_v37  ;;  %v1885_v59 = vunpack.c.l.bf16 %v439_v47  ;;  %v611_v61 = vrot.slane %v1859_v44, 1  ;;  %v767_v63 = vmul.f32 %v1849_v36, %v1840_v33 }
  0x1d   : > { %v659_v62 = vadd.f32 %v651_v45, %v639_v53  ;;  %v1893_v0 = vunpack.c.l.bf16 %v472_v52  ;;  %v725_v2 = vsel %vm606_vm0, %v723_v50, %v724_v54  ;;  %v839_v3 = vrot.slane %v807_v51, 1 }
  0x1e   : > { %2452 = vst [vmem:[#allocation2_spill] sm:$0xff] %v1885_v59  ;;  %v840_v4 = vrot.slane %v808_v55, 1  ;;  %v1897_v1 = vunpack.c.h.bf16 %v488_v20  ;;  %v2426_v7 = vunpack.c.l.bf16 %v1888_v60  ;;  %v544_v8 = vmul.f32 %v1792_v9, %v1876_v56 }
  0x1f   : > { %2453 = vst [vmem:[#allocation3_spill] sm:$0xff] %v1893_v0  ;;  %v679_v6 = vadd.f32 %v671_v49, %v659_v62  ;;  %v556_v11 = vmul.f32 %v1812_v15, %v1893_v0  ;;  %v787_v12 = vmul.f32 %v1883_v58, %v1852_v38  ;;  %v1906_v13 = vunpack.c.h.bf16 %v438_v42  ;;  %v490_v42 = vld [vmem:[%s1801_s26 + $0x8] ss:$16 sps:$4 sm:$0xff]  }
  0x20   : > { %v578_v14 = vmul.f32 %v1795_v10, %v1876_v56  ;;  %v579_v17 = vmul.f32 %v1795_v10, %v1885_v59  ;;  %v1912_v19 = vunpack.c.l.bf16 %v441_v5  ;;  %v2418_v20 = vunpack.c.h.bf16 %v1834_v28 }
  0x21   : > { %2454 = vst [vmem:[#allocation4_spill] sm:$0xff] %v1906_v13  ;;  %v755_v18 = vadd.f32 %v725_v2, %v679_v6  ;;  %v564_v25 = vadd.f32 %v556_v11, %v544_v8  ;;  %v1915_v30 = vunpack.c.h.bf16 %v472_v52  ;;  %v695_v35 = vmul.f32 %v1826_v23, %v1897_v1 }
  0x22   : > { %2455 = vst [vmem:[#allocation5_spill] sm:$0xff] %v1912_v19  ;;  %v613_v31 = vrot.slane %v578_v14, 1  ;;  %v614_v32 = vrot.slane %v579_v17, 1  ;;  %v841_v39 = vsel %vm606_vm0, %v839_v3, %v840_v4  ;;  %v653_v40 = vmul.f32 %v1815_v16, %v1897_v1 }
  0x23   : > { %2456 = vst [vmem:[#allocation6_spill] sm:$0xff] %v1915_v30  ;;  %v775_v37 = vadd.f32 %v767_v63, %v755_v18  ;;  %v696_v41 = vmul.f32 %v1826_v23, %v2426_v7  ;;  %v729_v46 = vrot.slane %v695_v35, 1  ;;  %v811_v47 = vmul.f32 %v1845_v34, %v1906_v13  ;;  %v1947_v63 = vld [vmem:[%s1806_s29 + $0x8] ss:$16 sps:$4 sm:$0xff]  }
  0x24   : > { %v615_v45 = vsel %vm606_vm0, %v613_v31, %v614_v32  ;;  %v812_v48 = vmul.f32 %v1845_v34, %v1912_v19  ;;  %v673_v51 = vmul.f32 %v1823_v22, %v2418_v20  ;;  %v557_v53 = vmul.f32 %v1812_v15, %v1915_v30 }
  0x25   : > { %v795_v49 = vadd.f32 %v787_v12, %v775_v37  ;;  %v641_v50 = vadd.f32 %v615_v45, %v564_v25  ;;  %v730_v52 = vrot.slane %v696_v41, 1  ;;  %v1941_v54 = vmul.f32 %v1795_v10, %v1912_v19 }
  0x26   : > { %v1943_v55 = vunpack.c.l.bf16 %v490_v42  ;;  %v2422_v62 = vunpack.c.l.bf16 %v1927_v43  ;;  %v769_v4 = vmul.f32 %v1849_v36, %v1906_v13  ;;  %v845_v5 = vrot.slane %v811_v47, 1 }
  0x27   : > { %v1949_v2 = vadd.f32 %v841_v39, %v795_v49  ;;  %v661_v3 = vadd.f32 %v653_v40, %v641_v50  ;;  %v731_v6 = vsel %vm606_vm0, %v729_v46, %v730_v52  ;;  %v846_v8 = vrot.slane %v812_v48, 1  ;;  %v1975_v46 = vld [vmem:[%s1784_s20 + $0x20] ss:$8 sps:$4 sm:$0xff]   ;;  %v1982_v50 = vld [vmem:[%s1801_s26 + $0x1c] sm:$0x1] }
  0x28   : > { %v543_v11 = vmul.f32 %v1792_v9, %v1840_v33  ;;  %v576_v12 = vmul.f32 %v1795_v10, %v1840_v33  ;;  %v2420_v18 = vunpack.c.l.bf16 %v1947_v63  ;;  %v693_v25 = vmul.f32 %v1826_v23, %v1943_v55 }
  0x29   : > { %v880_v14 = vsel %vm879_vm1, %v1949_v2, 0.0  ;;  %v681_v17 = vadd.f32 %v673_v51, %v661_v3  ;;  %v617_v31 = vrot.slane %v1941_v54, 1  ;;  %v694_v37 = vmul.f32 %v1826_v23, %v2422_v62 }
  0x2a   : > { %881 = vadd.xlane.f32.xlu0 %v880_v14  ;;  %v563_v32 = vadd.f32 %v1880_v57, %v543_v11  ;;  %v610_v35 = vrot.slane %v576_v12, 1  ;;  %v789_v40 = vmul.f32 %v1883_v58, %v1915_v30  ;;  %v652_v41 = vmul.f32 %v1815_v16, %v1943_v55  ;;  %v474_v14 = vld [vmem:[%s1789_s23 + $0x20] ss:$8 sps:$4 sm:$0xff]  }
  0x2b   : > { %v757_v39 = vadd.f32 %v731_v6, %v681_v17  ;;  %v809_v45 = vmul.f32 %v1845_v34, %v1876_v56  ;;  %v847_v57 = vsel %vm606_vm0, %v845_v5, %v846_v8  ;;  %v726_v48 = vrot.slane %v693_v25, 1 }
  0x2c   : > { %v612_v47 = vsel %vm606_vm0, %v610_v35, %v611_v61  ;;  %v727_v49 = vrot.slane %v694_v37, 1  ;;  %v672_v54 = vmul.f32 %v1823_v22, %v2420_v18  ;;  %v810_v3 = vmul.f32 %v1845_v34, %v1885_v59  ;;  %v443_v61 = vld [vmem:[%s1784_s20 + $0x24] sm:$0x1]  ;;  %v2048_v18 = vld [vmem:[%s1806_s29 + $0x20] ss:$8 sps:$4 sm:$0xff]  }
  0x2d   : > { %v777_v51 = vadd.f32 %v769_v4, %v757_v39  ;;  %v640_v52 = vadd.f32 %v612_v47, %v563_v32  ;;  %v768_v5 = vmul.f32 %v1849_v36, %v1876_v56  ;;  %v788_v44 = vmul.f32 %v1883_v58, %v1893_v0  ;;  %2462 = vst [vmem:[#allocation12_spill] sm:$0xff] %v2048_v18 }
  0x2e   : > { %v1995_v6 = vunpack.c.l.bf16 %v1975_v46  ;;  %v1997_v8 = vunpack.c.h.bf16 %v490_v42  ;;  %v842_v12 = vrot.slane %v809_v45, 1  ;;  %v2424_v17 = vunpack.c.l.bf16 %v1982_v50 }
  0x2f   : > { %v797_v4 = vadd.f32 %v789_v40, %v777_v51  ;;  %v660_v11 = vadd.f32 %v652_v41, %v640_v52  ;;  %v728_v25 = vsel %vm606_vm0, %v726_v48, %v727_v49  ;;  %v2419_v32 = vunpack.c.h.bf16 %v1947_v63 }
  0x30   : > { %2457 = vst [vmem:[#allocation7_spill] sm:$0xff] %v1995_v6  ;;  %v545_v35 = vmul.f32 %v1792_v9, %v1906_v13  ;;  %v580_v37 = vmul.f32 %v1795_v10, %v1906_v13  ;;  %v843_v40 = vrot.slane %v810_v3, 1  ;;  %v2009_v41 = vunpack.c.l.bf16 %v443_v61 }
  0x31   : > { %v2007_v39 = vadd.f32 %v847_v57, %v797_v4  ;;  %v680_v42 = vadd.f32 %v672_v54, %v660_v11  ;;  %v2011_v45 = vunpack.c.l.bf16 %v474_v14  ;;  %v697_v49 = vmul.f32 %v1826_v23, %v1997_v8  ;;  %v445_v4 = vld [vmem:[%s1784_s20 + $0x2c] sm:$0x1] }
  0x32   : > { %2458 = vst [vmem:[#allocation8_spill] sm:$0xff] %v2009_v41  ;;  %v565_v47 = vadd.f32 %v557_v53, %v545_v35  ;;  %v616_v48 = vrot.slane %v580_v37, 1  ;;  %v654_v57 = vmul.f32 %v1815_v16, %v1997_v8  ;;  %v698_v54 = vmul.f32 %v1826_v23, %v2424_v17  ;;  %v476_v17 = vld [vmem:[%s1789_s23 + $0x30] ss:$8 sps:$4 sm:$0xff]  }
  0x33   : > { %2459 = vst [vmem:[#allocation9_spill] sm:$0xff] %v2011_v45  ;;  %v886_v51 = vsel %vm879_vm1, %v2007_v39, 0.0  ;;  %v756_v52 = vadd.f32 %v728_v25, %v680_v42  ;;  %v674_v3 = vmul.f32 %v1823_v22, %v2419_v32  ;;  %v732_v61 = vrot.slane %v697_v49, 1  ;;  %v496_v42 = vld [vmem:[%s1801_s26 + $0x20] ss:$8 sps:$4 sm:$0xff]  }
  0x34   : > { %887 = vadd.xlane.f32.xlu1 %v886_v51  ;;  %v618_v53 = vsel %vm606_vm0, %v616_v48, %v617_v31  ;;  %v733_v25 = vrot.slane %v698_v54, 1  ;;  %v813_v37 = vmul.f32 %v1845_v34, %v1995_v6  ;;  %v844_v20 = vsel %vm606_vm0, %v842_v12, %v843_v40  ;;  %v2038_v49 = vld [vmem:[%s1801_s26 + $0x24] sm:$0x1] }
  0x35   : > { %v776_v11 = vadd.f32 %v768_v5, %v756_v52  ;;  %v642_v35 = vadd.f32 %v618_v53, %v565_v47  ;;  %v558_v51 = vmul.f32 %v1812_v15, %v2011_v45  ;;  %v583_v31 = vmul.f32 %v1795_v10, %v2009_v41 }
  0x36   : > { %v814_v48 = vmul.f32 %v1845_v34, %v2009_v41  ;;  %v770_v52 = vmul.f32 %v1849_v36, %v1995_v6  ;;  %v2042_v54 = vunpack.c.l.bf16 %v445_v4  ;;  %v734_v12 = vsel %vm606_vm0, %v732_v61, %v733_v25 }
  0x37   : > { %v796_v5 = vadd.f32 %v788_v44, %v776_v11  ;;  %v662_v47 = vadd.f32 %v654_v57, %v642_v35  ;;  %v848_v40 = vrot.slane %v813_v37, 1  ;;  %v2045_v32 = vunpack.c.l.bf16 %v496_v42 }
  0x38   : > { %2460 = vst [vmem:[#allocation10_spill] sm:$0xff] %v2042_v54  ;;  %v849_v53 = vrot.slane %v814_v48, 1  ;;  %v2425_v27 = vunpack.c.l.bf16 %v2038_v49  ;;  %v546_v44 = vmul.f32 %v1792_v9, %v1995_v6  ;;  %v620_v57 = vrot.slane %v583_v31, 1 }
  0x39   : > { %2461 = vst [vmem:[#allocation11_spill] sm:$0xff] %v2045_v32  ;;  %v2050_v29 = vadd.f32 %v844_v20, %v796_v5  ;;  %v682_v62 = vadd.f32 %v674_v3, %v662_v47  ;;  %v790_v4 = vmul.f32 %v1883_v58, %v2011_v45  ;;  %v2058_v61 = vunpack.c.h.bf16 %v1975_v46 }
  0x3a   : > { %v582_v11 = vmul.f32 %v1795_v10, %v1995_v6  ;;  %v2428_v35 = vunpack.c.l.bf16 %v2048_v18  ;;  %v566_v25 = vadd.f32 %v558_v51, %v546_v44  ;;  %v2065_v37 = vunpack.c.h.bf16 %v474_v14  ;;  %v447_v51 = vld [vmem:[%s1784_s20 + $0x34] sm:$0x1] }
  0x3b   : > { %2463 = vst [vmem:[#allocation13_spill] sm:$0xff] %v2058_v61  ;;  %v883_v20 = vsel %vm879_vm1, %v2050_v29, 0.0  ;;  %v758_v3 = vadd.f32 %v734_v12, %v682_v62  ;;  %v585_v31 = vmul.f32 %v1795_v10, %v2042_v54  ;;  %v699_v46 = vmul.f32 %v1826_v23, %v2045_v32 }
  0x3c   : > { %884 = vadd.xlane.f32.xlu0 %v883_v20  ;;  %2464 = vst [vmem:[#allocation14_spill] sm:$0xff] %v2065_v37  ;;  %v619_v48 = vrot.slane %v582_v11, 1  ;;  %v850_v47 = vsel %vm606_vm0, %v848_v40, %v849_v53  ;;  %v655_v62 = vmul.f32 %v1815_v16, %v2045_v32  ;;  %v700_v14 = vmul.f32 %v1826_v23, %v2425_v27  ;;  %v2088_v27 = vld [vmem:[%s1801_s26 + $0x2c] sm:$0x1] }
  0x3d   : > { %v778_v5 = vadd.f32 %v770_v52, %v758_v3  ;;  %v735_v44 = vrot.slane %v699_v46, 1  ;;  %v815_v11 = vmul.f32 %v1845_v34, %v2058_v61  ;;  %v816_v52 = vmul.f32 %v1845_v34, %v2042_v54 }
  0x3e   : > { %v621_v12 = vsel %vm606_vm0, %v619_v48, %v620_v57  ;;  %v675_v53 = vmul.f32 %v1823_v22, %v2428_v35  ;;  %v736_v3 = vrot.slane %v700_v14, 1  ;;  %v559_v57 = vmul.f32 %v1812_v15, %v2065_v37 }
  0x3f   : > { %v798_v20 = vadd.f32 %v790_v4, %v778_v5  ;;  %v643_v40 = vadd.f32 %v621_v12, %v566_v25  ;;  %v623_v48 = vrot.slane %v585_v31, 1  ;;  %v771_v46 = vmul.f32 %v1849_v36, %v2058_v61  ;;  %v446_v12 = vld [vmem:[%s1784_s20 + $0x30] ss:$8 sps:$4 sm:$0xff]  }
  0x40   : > { %v2094_v7 = vunpack.c.l.bf16 %v447_v51  ;;  %v851_v25 = vrot.slane %v815_v11, 1  ;;  %v852_v5 = vrot.slane %v816_v52, 1  ;;  %v737_v14 = vsel %vm606_vm0, %v735_v44, %v736_v3 }
  0x41   : > { %v2096_v54 = vadd.f32 %v850_v47, %v798_v20  ;;  %v663_v4 = vadd.f32 %v655_v62, %v643_v40  ;;  %v2100_v35 = vunpack.c.l.bf16 %v476_v17  ;;  %v2102_v32 = vunpack.c.h.bf16 %v496_v42 }
  0x42   : > { %2465 = vst [vmem:[#allocation15_spill] sm:$0xff] %v2094_v7  ;;  %v2433_v41 = vunpack.c.l.bf16 %v2088_v27  ;;  %v547_v47 = vmul.f32 %v1792_v9, %v2058_v61  ;;  %v791_v62 = vmul.f32 %v1883_v58, %v2065_v37  ;;  %v2112_v44 = vunpack.c.l.bf16 %v446_v12 }
  0x43   : > { %2466 = vst [vmem:[#allocation16_spill] sm:$0xff] %v2100_v35  ;;  %2467 = vst [vmem:[#allocation17_spill] sm:$0xff] %v2102_v32  ;;  %v889_v31 = vsel %vm879_vm1, %v2096_v54, 0.0  ;;  %v683_v6 = vadd.f32 %v675_v53, %v663_v4  ;;  %v584_v42 = vmul.f32 %v1795_v10, %v2058_v61  ;;  %v587_v11 = vmul.f32 %v1795_v10, %v2094_v7  ;;  %v500_v61 = vld [vmem:[%s1801_s26 + $0x30] ss:$8 sps:$4 sm:$0xff]  }
  0x44   : > { %890 = vadd.xlane.f32.xlu1 %v889_v31  ;;  %2468 = vst [vmem:[#allocation18_spill] sm:$0xff] %v2112_v44  ;;  %v567_v20 = vadd.f32 %v559_v57, %v547_v47  ;;  %v701_v40 = vmul.f32 %v1826_v23, %v2102_v32  ;;  %v702_v53 = vmul.f32 %v1826_v23, %v2433_v41  ;;  %v449_v41 = vld [vmem:[%s1784_s20 + $0x3c] sm:$0x1] }
  0x45   : > { %v759_v52 = vadd.f32 %v737_v14, %v683_v6  ;;  %v853_v3 = vsel %vm606_vm0, %v851_v25, %v852_v5  ;;  %v560_v4 = vmul.f32 %v1812_v15, %v2100_v35  ;;  %v622_v31 = vrot.slane %v584_v42, 1 }
  0x46   : > { %v656_v51 = vmul.f32 %v1815_v16, %v2102_v32  ;;  %v626_v57 = vrot.slane %v587_v11, 1  ;;  %v2469_v14 = vunpack.c.h.bf16 %v2048_v18  ;;  %v817_v37 = vmul.f32 %v1845_v34, %v2112_v44  ;;  %v2139_v32 = vld [vmem:[%s1801_s26 + $0x34] sm:$0x1]  ;;  %v2144_v18 = vld [vmem:[%s1806_s29 + $0x30] ss:$8 sps:$4 sm:$0xff]  }
  0x47   : > { %v779_v6 = vadd.f32 %v771_v46, %v759_v52  ;;  %v624_v25 = vsel %vm606_vm0, %v622_v31, %v623_v48  ;;  %v738_v5 = vrot.slane %v701_v40, 1  ;;  %v739_v45 = vrot.slane %v702_v53, 1 }
  0x48   : > { %v676_v47 = vmul.f32 %v1823_v22, %v2469_v14  ;;  %v818_v42 = vmul.f32 %v1845_v34, %v2094_v7  ;;  %v644_v11 = vadd.f32 %v624_v25, %v567_v20  ;;  %v772_v52 = vmul.f32 %v1849_v36, %v2112_v44 }
  0x49   : > { %v799_v46 = vadd.f32 %v791_v62, %v779_v6  ;;  %v854_v14 = vrot.slane %v817_v37, 1  ;;  %v792_v19 = vmul.f32 %v1883_v58, %v2100_v35  ;;  %v2148_v48 = vunpack.c.l.bf16 %v449_v41  ;;  %v478_v35 = vld [vmem:[%s1789_s23 + $0x40] sm:$0xf] }
  0x4a   : > { %v855_v13 = vrot.slane %v818_v42, 1  ;;  %v2150_v40 = vunpack.c.l.bf16 %v500_v61  ;;  %v664_v31 = vadd.f32 %v656_v51, %v644_v11  ;;  %v2154_v7 = vunpack.c.h.bf16 %v476_v17 }
  0x4b   : > { %2470 = vst [vmem:[#allocation19_spill] sm:$0xff] %v2148_v48  ;;  %v2152_v53 = vadd.f32 %v853_v3, %v799_v46  ;;  %v2443_v62 = vunpack.c.l.bf16 %v2139_v32  ;;  %v740_v20 = vsel %vm606_vm0, %v738_v5, %v739_v45  ;;  %v2445_v37 = vunpack.c.l.bf16 %v2144_v18 }
  0x4c   : > { %2471 = vst [vmem:[#allocation20_spill] sm:$0xff] %v2150_v40  ;;  %2472 = vst [vmem:[#allocation21_spill] sm:$0xff] %v2154_v7  ;;  %v548_v6 = vmul.f32 %v1792_v9, %v2112_v44  ;;  %v586_v41 = vmul.f32 %v1795_v10, %v2112_v44  ;;  %v684_v3 = vadd.f32 %v676_v47, %v664_v31  ;;  %v2166_v51 = vunpack.c.h.bf16 %v446_v12 }
  0x4d   : > { %v892_v25 = vsel %vm879_vm1, %v2152_v53, 0.0  ;;  %v856_v17 = vsel %vm606_vm0, %v854_v14, %v855_v13  ;;  %v589_v45 = vmul.f32 %v1795_v10, %v2148_v48  ;;  %v703_v46 = vmul.f32 %v1826_v23, %v2150_v40 }
  0x4e   : > { %893 = vadd.xlane.f32.xlu0 %v892_v25  ;;  %v568_v42 = vadd.f32 %v560_v4, %v548_v6  ;;  %v625_v5 = vrot.slane %v586_v41, 1  ;;  %v760_v11 = vadd.f32 %v740_v20, %v684_v3  ;;  %v561_v47 = vmul.f32 %v1812_v15, %v2154_v7  ;;  %v450_v6 = vld [vmem:[%s1784_s20 + $0x40] sm:$0xf] }
  0x4f   : > { %v657_v13 = vmul.f32 %v1815_v16, %v2150_v40  ;;  %v704_v12 = vmul.f32 %v1826_v23, %v2443_v62  ;;  %v677_v14 = vmul.f32 %v1823_v22, %v2445_v37  ;;  %v741_v31 = vrot.slane %v703_v46, 1  ;;  %v503_v62 = vld [vmem:[%s1801_s26 + $0x3c] sm:$0x1]  ;;  %v2195_v37 = vld [vmem:[%s1784_s20 + $0x44] sm:$0x1]  ;;  %s1588_s26 = sshll.u32 %s2508_s14, 5 }
  0x50   : > { %v627_v4 = vsel %vm606_vm0, %v625_v5, %v626_v57  ;;  %v819_v20 = vmul.f32 %v1845_v34, %v2166_v51  ;;  %v780_v15 = vadd.f32 %v772_v52, %v760_v11  ;;  %v820_v3 = vmul.f32 %v1845_v34, %v2148_v48  ;;  %s432_s29 = scalar_lea.vmem %s2417_s10, %s1588_s26  ;;  %s427_s11 = scalar_lea.vmem %s2416_s9, %s1588_s26 }
  0x51   : > { %v645_v41 = vadd.f32 %v627_v4, %v568_v42  ;;  %v742_v25 = vrot.slane %v704_v12, 1  ;;  %v629_v44 = vrot.slane %v589_v45, 1  ;;  %v773_v57 = vmul.f32 %v1849_v36, %v2166_v51 }
  0x52   : > { %v793_v5 = vmul.f32 %v1883_v58, %v2154_v7  ;;  %v857_v46 = vrot.slane %v819_v20, 1  ;;  %v800_v40 = vadd.f32 %v792_v19, %v780_v15  ;;  %v858_v52 = vrot.slane %v820_v3, 1 }
  0x53   : > { %v665_v30 = vadd.f32 %v657_v13, %v645_v41  ;;  %v2197_v42 = vunpack.c.l.bf16 %v450_v6  ;;  %v743_v11 = vsel %vm606_vm0, %v741_v31, %v742_v25  ;;  %v487_v12 = vunpack.c.l.bf16 %v478_v35 }
  0x54   : > { %v518_v4 = vunpack.c.h.bf16 %v500_v61  ;;  %v519_v48 = vunpack.c.l.bf16 %v503_v62  ;;  %v2200_v45 = vadd.f32 %v856_v17, %v800_v40  ;;  %v469_v0 = vunpack.c.l.bf16 %v2195_v37  ;;  %v1677_v37 = vld [vmem:[%s2414_s7 + $0x8] sm:$0xff]  }
  0x55   : > { %v685_v59 = vadd.f32 %v677_v14, %v665_v30  ;;  %v549_v20 = vmul.f32 %v1792_v9, %v2166_v51  ;;  %v859_v7 = vsel %vm606_vm0, %v857_v46, %v858_v52  ;;  %v535_v19 = vunpack.c.h.bf16 %v2144_v18 }
  0x56   : > { %v588_v13 = vmul.f32 %v1795_v10, %v2166_v51  ;;  %v705_v31 = vmul.f32 %v1826_v23, %v518_v4  ;;  %v895_v61 = vsel %vm879_vm1, %v2200_v45, 0.0  ;;  %v706_v30 = vmul.f32 %v1826_v23, %v519_v48 }
  0x57   : > { %v761_v35 = vadd.f32 %v743_v11, %v685_v59  ;;  %v569_v40 = vadd.f32 %v561_v47, %v549_v20  ;;  %896 = vadd.xlane.f32.xlu1 %v895_v61  ;;  %v658_v9 = vmul.f32 %v1815_v16, %v518_v4  ;;  %v794_v14 = vmul.f32 %v1883_v58, %v487_v12 }
  0x58   : > { %v628_v62 = vrot.slane %v588_v13, 1  ;;  %v744_v17 = vrot.slane %v705_v31, 1  ;;  %v745_v15 = vrot.slane %v706_v30, 1  ;;  %v821_v10 = vmul.f32 %v1845_v34, %v2197_v42 }
  0x59   : > { %v781_v6 = vadd.f32 %v773_v57, %v761_v35  ;;  %v822_v41 = vmul.f32 %v1845_v34, %v469_v0  ;;  %v678_v23 = vmul.f32 %v1823_v22, %v535_v19  ;;  %v1190_v47 = vrot.slane %v518_v4, 1 }
  0x5a   : > { %v630_v59 = vsel %vm606_vm0, %v628_v62, %v629_v44  ;;  %v1191_v25 = vrot.slane %v519_v48, 1  ;;  %v746_v46 = vsel %vm606_vm0, %v744_v17, %v745_v15  ;;  %v860_v58 = vrot.slane %v821_v10, 1 }
  0x5b   : > { %v801_v3 = vadd.f32 %v793_v5, %v781_v6  ;;  %v646_v16 = vadd.f32 %v630_v59, %v569_v40  ;;  %v861_v57 = vrot.slane %v822_v41, 1  ;;  %v774_v22 = vmul.f32 %v1849_v36, %v2197_v42 }
  0x5c   : > { %v1192_v52 = vsel %vm606_vm0, %v1190_v47, %v1191_v25 }
  0x5d   : > { %v877_v11 = vadd.f32 %v859_v7, %v801_v3  ;;  %v666_v20 = vadd.f32 %v658_v9, %v646_v16  ;;  %v1208_v13 = vadd.f32 %v1192_v52, %v535_v19  ;;  %v862_v31 = vsel %vm606_vm0, %v860_v58, %v861_v57 }
  0x5f   : > { %v898_v34 = vsel %vm879_vm1, %v877_v11, 0.0  ;;  %v686_v44 = vadd.f32 %v678_v23, %v666_v20  ;;  %v2228_v48 = vadd.f32 %v1208_v13, %v487_v12 }
  0x60   : > { %899 = vadd.xlane.f32.xlu0 %v898_v34 }
  0x61   : > { %v762_v5 = vadd.f32 %v746_v46, %v686_v44 }
  0x63   : > { %v782_v4 = vadd.f32 %v774_v22, %v762_v5 }
  0x65   : > { %v802_v61 = vadd.f32 %v794_v14, %v782_v4 }
  0x67   : > { %v878_v35 = vadd.f32 %v862_v31, %v802_v61 }
  0x69   : > { %v901_v40 = vsel %vm879_vm1, %v878_v35, 0.0 }
  0x6a   : > { %902 = vadd.xlane.f32.xlu1 %v901_v40 }
  0xb7   : > { %v882_v7 = vpop.xlane.xlu0 %881 }
  0xb8   : > { %v905_v19 = vmul.f32 0.03125, %v882_v7 }
  0xba   : > { %v2232_v30 = vsub.f32 %v1949_v2, %v905_v19  ;;  %v2473_v19 = vunpack.c.l.bf16 %v1888_v60  ;;  %v1178_v60 = vrot.slane %v1997_v8, 1 }
  0xbc   : > { %v921_v62 = vmul.f32 %v2232_v30, %v2232_v30 }
  0xbe   : > { %v929_v36 = vsel %vm879_vm1, %v921_v62, 0.0  ;;  %v2474_v62 = vunpack.c.l.bf16 %v1982_v50  ;;  %v2478_v50 = vunpack.c.l.bf16 %v2088_v27  ;;  %v1674_v27 = vld [vmem:[%s2415_s8] sm:$0xff]  }
  0xbf   : > { %930 = vadd.xlane.f32.xlu0 %v929_v36  ;;  %1653 = vmatprep.subr.bf16.mxu1 %v1674_v27 }
  0xc0   : > { %v1179_v36 = vrot.slane %v2474_v62, 1  ;;  %1654 = vmatpush3.bf16.msra.mxu1 %v1674_v27 }
  0xc1   : > { %v888_v12 = vpop.xlane.xlu1 %887 }
  0xc2   : > { %v907_v9 = vmul.f32 0.03125, %v888_v12  ;;  %v1169_v12 = vrot.slane %v1830_v26, 1  ;;  %v2479_v26 = vunpack.c.l.bf16 %v2139_v32  ;;  %v1180_v8 = vsel %vm606_vm0, %v1178_v60, %v1179_v36  ;;  %v1676_v36 = vld [vmem:[%s2415_s8 + $0x8] sm:$0xff]  }
  0xc3   : > { %v1233_v32 = vrot.slane %v1840_v33, 1  ;;  %v2486_v33 = vld [vmem:[#allocation6_spill] sm:$0xff]  ;;  %1655 = vmatprep.subr.bf16.mxu1 %v1676_v36 }
  0xc4   : > { %v2238_v17 = vsub.f32 %v2007_v39, %v907_v9  ;;  %v2475_v9 = vunpack.c.l.bf16 %v1820_v21  ;;  %1656 = vmatpush3.bf16.msra.mxu1 %v1676_v36  ;;  %v1254_v36 = vrot.slane %v2197_v42, 1 }
  0xc6   : > { %v923_v14 = vmul.f32 %v2238_v17, %v2238_v17 }
  0xc8   : > { %v935_v6 = vsel %vm879_vm1, %v923_v14, 0.0  ;;  %v1170_v14 = vrot.slane %v2475_v9, 1 }
  0xc9   : > { %v885_v15 = vpop.xlane.xlu0 %884  ;;  %936 = vadd.xlane.f32.xlu0 %v935_v6  ;;  %v2476_v6 = vunpack.c.l.bf16 %v1927_v43  ;;  %v2480_v43 = vunpack.c.l.bf16 %v1834_v28 }
  0xca   : > { %v906_v2 = vmul.f32 0.03125, %v885_v15  ;;  %v1171_v21 = vsel %vm606_vm0, %v1169_v12, %v1170_v14  ;;  %v2491_v14 = vld [vmem:[#allocation8_spill] sm:$0xff] }
  0xcb   : > { %v1173_v15 = vrot.slane %v2476_v6, 1  ;;  %v2492_v6 = vld [vmem:[#allocation11_spill] sm:$0xff] }
  0xcc   : > { %v2244_v10 = vsub.f32 %v2050_v29, %v906_v2  ;;  %v2477_v2 = vunpack.c.l.bf16 %v2038_v49  ;;  %v2481_v49 = vunpack.c.l.bf16 %v1947_v63 }
  0xce   : > { %v922_v41 = vmul.f32 %v2244_v10, %v2244_v10 }
  0xd0   : > { %v932_v59 = vsel %vm879_vm1, %v922_v41, 0.0  ;;  %v1182_v41 = vrot.slane %v2477_v2, 1  ;;  %v1255_v2 = vrot.slane %v469_v0, 1 }
  0xd1   : > { %v891_v23 = vpop.xlane.xlu1 %890  ;;  %933 = vadd.xlane.f32.xlu1 %v932_v59  ;;  %v1175_v59 = vrot.slane %v1897_v1, 1 }
  0xd2   : > { %v908_v39 = vmul.f32 0.03125, %v891_v23  ;;  %v1185_v23 = vrot.slane %v2478_v50, 1  ;;  %v2493_v50 = vld [vmem:[#allocation17_spill] sm:$0xff] }
  0xd4   : > { %v2250_v47 = vsub.f32 %v2096_v54, %v908_v39  ;;  %v2295_v39 = vrot.slane %v2479_v26, 1  ;;  %v1184_v26 = vrot.slane %v2493_v50, 1 }
  0xd6   : > { %v924_v25 = vmul.f32 %v2250_v47, %v2250_v47 }
  0xd8   : > { %v938_v3 = vsel %vm879_vm1, %v924_v25, 0.0  ;;  %v1201_v25 = vadd.f32 %v1171_v21, %v2480_v43 }
  0xd9   : > { %939 = vadd.xlane.f32.xlu1 %v938_v3 }
  0xdb   : > { %v894_v16 = vpop.xlane.xlu0 %893 }
  0xdc   : > { %v909_v29 = vmul.f32 0.03125, %v894_v16  ;;  %v1234_v16 = vrot.slane %v1828_v24, 1  ;;  %v2487_v24 = vld [vmem:[#allocation4_spill] sm:$0xff] }
  0xde   : > { %v2256_v46 = vsub.f32 %v2152_v53, %v909_v29  ;;  %v1236_v29 = vrot.slane %v1876_v56, 1  ;;  %v2488_v56 = vld [vmem:[#allocation5_spill] sm:$0xff] }
  0xe0   : > { %v925_v58 = vmul.f32 %v2256_v46, %v2256_v46 }
  0xe2   : > { %v941_v57 = vsel %vm879_vm1, %v925_v58, 0.0  ;;  %v2482_v58 = vunpack.c.h.bf16 %v1834_v28  ;;  %v1675_v28 = vld [vmem:[%s2414_s7] sm:$0xff]  }
  0xe3   : > { %942 = vadd.xlane.f32.xlu0 %v941_v57  ;;  %1641 = vmatprep.subr.bf16.mxu0 %v1675_v28 }
  0xe4   : > { %v897_v52 = vpop.xlane.xlu1 %896  ;;  %1642 = vmatpush3.bf16.msra.mxu0 %v1675_v28 }
  0xe5   : > { %v910_v54 = vmul.f32 0.03125, %v897_v52  ;;  %v1209_v52 = vadd.f32 %v1201_v25, %v1852_v38  ;;  %v2494_v25 = vld [vmem:[#allocation20_spill] sm:$0xff]  ;;  %1643 = vmatprep.subr.bf16.mxu0 %v1677_v37 }
  0xe7   : > { %v2262_v20 = vsub.f32 %v2200_v45, %v910_v54  ;;  %v2483_v54 = vld [vmem:[#allocation3_spill] sm:$0xff] }
  0xe8   : > { %1644 = vmatpush3.bf16.msra.mxu0 %v1677_v37 }
  0xe9   : > { %v926_v13 = vmul.f32 %v2262_v20, %v2262_v20 }
  0xeb   : > { %v944_v31 = vsel %vm879_vm1, %v926_v13, 0.0 }
  0xec   : > { %945 = vadd.xlane.f32.xlu1 %v944_v31  ;;  %v2484_v31 = vld [vmem:[#allocation2_spill] sm:$0xff] }
  0xed   : > { %v900_v34 = vpop.xlane.xlu0 %899 }
  0xee   : > { %v911_v53 = vmul.f32 0.03125, %v900_v34  ;;  %v1237_v34 = vrot.slane %v2484_v31, 1  ;;  %v2500_v31 = vld [vmem:[#allocation14_spill] sm:$0xff] }
  0xf0   : > { %v2267_v44 = vsub.f32 %v877_v11, %v911_v53  ;;  %v1176_v11 = vrot.slane %v2473_v19, 1  ;;  %v2485_v53 = vunpack.c.h.bf16 %v1947_v63  ;;  %v1238_v38 = vsel %vm606_vm0, %v1236_v29, %v1237_v34  ;;  %v2489_v19 = vld [vmem:[#allocation9_spill] sm:$0xff] }
  0xf2   : > { %v927_v22 = vmul.f32 %v2267_v44, %v2267_v44  ;;  %v1177_v1 = vsel %vm606_vm0, %v1175_v59, %v1176_v11  ;;  %v2490_v11 = vld [vmem:[#allocation7_spill] sm:$0xff] }
  0xf3   : > { %v1203_v57 = vadd.f32 %v1177_v1, %v2482_v58  ;;  %v1242_v62 = vrot.slane %v2490_v11, 1  ;;  %v1186_v1 = vsel %vm606_vm0, %v1184_v26, %v1185_v23  ;;  %v2503_v23 = vld [vmem:[#allocation16_spill] sm:$0xff]  ;;  %v2505_v11 = vld [vmem:[#allocation19_spill] sm:$0xff] }
  0xf4   : > { %v947_v5 = vsel %vm879_vm1, %v927_v22, 0.0  ;;  %v1204_v22 = vadd.f32 %v1180_v8, %v2485_v53  ;;  %v2495_v8 = vld [vmem:[#allocation12_spill] sm:$0xff]  ;;  %v2501_v53 = vld [vmem:[#allocation18_spill] sm:$0xff] }
  0xf5   : > { %948 = vadd.xlane.f32.xlu0 %v947_v5  ;;  %v1235_v5 = vsel %vm606_vm0, %v1233_v32, %v1234_v16  ;;  %v2496_v27 = vunpack.c.l.bf16 %v2495_v8  ;;  %v2497_v29 = vunpack.c.h.bf16 %v2495_v8 }
  0xf6   : > { %v1212_v63 = vadd.f32 %v1204_v22, %v2489_v19  ;;  %v1248_v22 = vrot.slane %v2501_v53, 1 }
  0xf7   : > { %v903_v4 = vpop.xlane.xlu1 %902  ;;  %v1206_v58 = vadd.f32 %v1186_v1, %v2497_v29 }
  0xf8   : > { %v912_v61 = vmul.f32 0.03125, %v903_v4  ;;  %v1211_v4 = vadd.f32 %v1203_v57, %v2486_v33  ;;  %v2498_v57 = vld [vmem:[#allocation13_spill] sm:$0xff] }
  0xfa   : > { %v2272_v45 = vsub.f32 %v878_v35, %v912_v61  ;;  %v1172_v35 = vrot.slane %v1943_v55, 1  ;;  %v1239_v61 = vrot.slane %v2487_v24, 1 }
  0xfc   : > { %v928_v40 = vmul.f32 %v2272_v45, %v2272_v45  ;;  %v1174_v55 = vsel %vm606_vm0, %v1172_v35, %v1173_v15  ;;  %v1243_v35 = vrot.slane %v2491_v14, 1  ;;  %v1181_v15 = vrot.slane %v2492_v6, 1 }
  0xfd   : > { %v1202_v3 = vadd.f32 %v1174_v55, %v2481_v49  ;;  %v1187_v49 = vrot.slane %v2494_v25, 1 }
  0xfe   : > { %v950_v7 = vsel %vm879_vm1, %v928_v40, 0.0  ;;  %v1240_v40 = vrot.slane %v2488_v56, 1  ;;  %v1244_v55 = vsel %vm606_vm0, %v1242_v62, %v1243_v35  ;;  %v1183_v43 = vsel %vm606_vm0, %v1181_v15, %v1182_v41 }
  0xff   : > { %951 = vadd.xlane.f32.xlu1 %v950_v7  ;;  %v1210_v13 = vadd.f32 %v1202_v3, %v2483_v54  ;;  %v1265_v7 = vadd.f32 %v1235_v5, %v1209_v52  ;;  %v1268_v0 = vadd.f32 %v1244_v55, %v1212_v63  ;;  %v1205_v32 = vadd.f32 %v1183_v43, %v2496_v27  ;;  %v2499_v52 = vld [vmem:[#allocation10_spill] sm:$0xff]  ;;  %v2502_v5 = vld [vmem:[#allocation15_spill] sm:$0xff] }
 0x100   : > { %v1241_v9 = vsel %vm606_vm0, %v1239_v61, %v1240_v40  ;;  %v1245_v41 = vrot.slane %v2498_v57, 1  ;;  %v1246_v54 = vrot.slane %v2499_v52, 1  ;;  %v1249_v33 = vrot.slane %v2502_v5, 1  ;;  %v1556_v27 = vld [vmem:[%s2412_s5] ss:$0 sm:$0xff] }
 0x101   : > { %v1266_v12 = vadd.f32 %v1238_v38, %v1210_v13  ;;  %v1273_v59 = vmul.f32 0.25, %v1265_v7  ;;  %v1267_v60 = vadd.f32 %v1241_v9, %v1211_v4  ;;  %v1276_v13 = vmul.f32 0.25, %v1268_v0  ;;  %v2506_v9 = vld [vmem:[#allocation21_spill] sm:$0xff]  ;;  %v1557_v57 = vld [vmem:[%s2413_s6] ss:$0 sm:$0xff] }
 0x102   : > { %v1213_v34 = vadd.f32 %v1205_v32, %v2500_v31  ;;  %v1214_v4 = vadd.f32 %v1206_v58, %v2503_v23  ;;  %v1247_v24 = vsel %vm606_vm0, %v1245_v41, %v1246_v54  ;;  %v1189_v61 = vsel %vm606_vm0, %v1187_v49, %v2295_v39 }
 0x103   : > { %v1274_v21 = vmul.f32 0.25, %v1266_v12  ;;  %v1275_v3 = vmul.f32 0.25, %v1267_v60  ;;  %v1251_v56 = vrot.slane %v2166_v51, 1  ;;  %v1250_v28 = vsel %vm606_vm0, %v1248_v22, %v1249_v33 }
 0x104   : > { %v1269_v38 = vadd.f32 %v1247_v24, %v1213_v34  ;;  %v2504_v7 = vunpack.c.l.bf16 %v2144_v18  ;;  %v1270_v63 = vadd.f32 %v1250_v28, %v1214_v4  ;;  %v1252_v62 = vrot.slane %v2505_v11, 1 }
 0x105   : > { %v1281_v16 = vpack.c.bf16 %v1274_v21, %v1273_v59  ;;  %v1282_v40 = vpack.c.bf16 %v1276_v13, %v1275_v3  ;;  %v1256_v35 = vsel %vm606_vm0, %v1254_v36, %v1255_v2 }
 0x106   : > { %v1207_v19 = vadd.f32 %v1189_v61, %v2504_v7  ;;  %v1277_v12 = vmul.f32 0.25, %v1269_v38  ;;  %v1278_v39 = vmul.f32 0.25, %v1270_v63  ;;  %v1253_v51 = vsel %vm606_vm0, %v1251_v56, %v1252_v62 }
 0x107   : > { %1657 = vmatprep.mubr.msk.bf16.mxu1 %vm879_vm1, %v1281_v16  ;;  %v1272_v15 = vadd.f32 %v1256_v35, %v2228_v48 }
 0x108   : > { %1658 = vmatmul.mubr.msk.bf16.vlgmr.msra.gmra.mrb[0].mxu1 %vm879_vm1, %v1282_v40  ;;  %v1215_v14 = vadd.f32 %v1207_v19, %v2506_v9  ;;  %v1283_v18 = vpack.c.bf16 %v1278_v39, %v1277_v12 }
 0x109   : > { %v1280_v60 = vmul.f32 0.25, %v1272_v15 }
 0x10a   : > { %v1271_v6 = vadd.f32 %v1253_v51, %v1215_v14  ;;  %1661 = vmatprep.mubr.msk.bf16.mxu1 %vm879_vm1, %v1283_v18 }
 0x10c   : > { %v1279_v59 = vmul.f32 0.25, %v1271_v6 }
 0x10e   : > { %v1284_v50 = vpack.c.bf16 %v1280_v60, %v1279_v59 }
 0x110   : > { %1662 = vmatmul.mubr.msk.bf16.gmra.mrb[4].mxu1 %vm879_vm1, %v1284_v50 }
 0x14c   : > { %v931_v42 = vpop.xlane.xlu0 %930 }
 0x14d   : > { %v953_v26 = vmul.f32 0.03125, %v931_v42 }
 0x14f   : > { %v961_v21 = vadd.f32 1e-05, %v953_v26 }
 0x151   : > { %1678 = vrsqrt.f32 %v961_v21 }
 0x156   : > { %v937_v55 = vpop.xlane.xlu0 %936 }
 0x157   : > { %v955_v43 = vmul.f32 0.03125, %v937_v55 }
 0x159   : > { %v963_v37 = vadd.f32 1e-05, %v955_v43 }
 0x15b   : > { %v1679_v0 = vpop.eup %1678 }
 0x15c   : > { %v977_v8 = vmul.f32 %v1679_v0, %v2232_v30 }
 0x15e   : > { %v934_v25 = vpop.xlane.xlu1 %933  ;;  %v992_v29 = vmul.f32 %v1556_v27, %v977_v8 }
 0x15f   : > { %v954_v49 = vmul.f32 0.03125, %v934_v25 }
 0x160   : > { %v1007_v30 = vadd.f32 %v1557_v57, %v992_v29 }
 0x161   : > { %v962_v2 = vadd.f32 1e-05, %v954_v49 }
 0x163   : > { %1680 = vrsqrt.f32 %v962_v2 }
 0x164   : > { %1682 = vrsqrt.f32 %v963_v37 }
 0x166   : > { %v940_v48 = vpop.xlane.xlu1 %939 }
 0x167   : > { %v956_v3 = vmul.f32 0.03125, %v940_v48 }
 0x169   : > { %v964_v1 = vadd.f32 1e-05, %v956_v3 }
 0x16b   : > { %1684 = vrsqrt.f32 %v964_v1 }
 0x16d   : > { %v1681_v32 = vpop.eup %1680 }
 0x16e   : > { %v978_v16 = vmul.f32 %v1681_v32, %v2244_v10  ;;  %v1683_v58 = vpop.eup %1682 }
 0x16f   : > { %v979_v13 = vmul.f32 %v1683_v58, %v2238_v17 }
 0x170   : > { %v943_v41 = vpop.xlane.xlu0 %942  ;;  %v993_v52 = vmul.f32 %v1556_v27, %v978_v16 }
 0x171   : > { %v957_v54 = vmul.f32 0.03125, %v943_v41  ;;  %v994_v10 = vmul.f32 %v1556_v27, %v979_v13 }
 0x172   : > { %v1008_v31 = vadd.f32 %v1557_v57, %v993_v52 }
 0x173   : > { %v965_v22 = vadd.f32 1e-05, %v957_v54  ;;  %v1009_v4 = vadd.f32 %v1557_v57, %v994_v10 }
 0x174   : > { %v1015_v34 = vpack.c.bf16 %v1008_v31, %v1007_v30 }
 0x175   : > { %v1685_v53 = vpop.eup %1684  ;;  %1686 = vrsqrt.f32 %v965_v22 }
 0x176   : > { %v980_v5 = vmul.f32 %v1685_v53, %v2250_v47  ;;  %1645 = vmatprep.mubr.msk.bf16.mxu0 %vm879_vm1, %v1015_v34 }
 0x178   : > { %v995_v33 = vmul.f32 %v1556_v27, %v980_v5 }
 0x179   : > { %v946_v23 = vpop.xlane.xlu1 %945 }
 0x17a   : > { %v1010_v24 = vadd.f32 %v1557_v57, %v995_v33  ;;  %v958_v61 = vmul.f32 0.03125, %v946_v23 }
 0x17c   : > { %v1016_v56 = vpack.c.bf16 %v1010_v24, %v1009_v4  ;;  %v966_v40 = vadd.f32 1e-05, %v958_v61 }
 0x17e   : > { %1646 = vmatmul.mubr.msk.bf16.vlgmr.msra.gmra.mrb[0].mxu0 %vm879_vm1, %v1016_v56  ;;  %1688 = vrsqrt.f32 %v966_v40 }
 0x17f   : > { %v1687_v28 = vpop.eup %1686 }
 0x180   : > { %v981_v7 = vmul.f32 %v1687_v28, %v2256_v46 }
 0x182   : > { %v949_v17 = vpop.xlane.xlu0 %948  ;;  %v996_v11 = vmul.f32 %v1556_v27, %v981_v7 }
 0x183   : > { %v959_v38 = vmul.f32 0.03125, %v949_v17 }
 0x184   : > { %v1011_v9 = vadd.f32 %v1557_v57, %v996_v11 }
 0x185   : > { %v967_v47 = vadd.f32 1e-05, %v959_v38 }
 0x187   : > { %1690 = vrsqrt.f32 %v967_v47 }
 0x188   : > { %v1689_v19 = vpop.eup %1688 }
 0x189   : > { %v982_v63 = vmul.f32 %v1689_v19, %v2262_v20 }
 0x18b   : > { %v997_v36 = vmul.f32 %v1556_v27, %v982_v63 }
 0x18c   : > { %v952_v62 = vpop.xlane.xlu1 %951 }
 0x18d   : > { %v960_v12 = vmul.f32 0.03125, %v952_v62  ;;  %v1012_v14 = vadd.f32 %v1557_v57, %v997_v36 }
 0x18f   : > { %v968_v39 = vadd.f32 1e-05, %v960_v12  ;;  %v1017_v51 = vpack.c.bf16 %v1012_v14, %v1011_v9 }
 0x191   : > { %1692 = vrsqrt.f32 %v968_v39  ;;  %1649 = vmatprep.mubr.msk.bf16.mxu0 %vm879_vm1, %v1017_v51  ;;  %v1691_v35 = vpop.eup %1690 }
 0x192   : > { %v983_v46 = vmul.f32 %v1691_v35, %v2267_v44 }
 0x194   : > { %v998_v20 = vmul.f32 %v1556_v27, %v983_v46 }
 0x196   : > { %v1013_v59 = vadd.f32 %v1557_v57, %v998_v20 }
 0x19b   : > { %v1693_v6 = vpop.eup %1692 }
 0x19c   : > { %v984_v15 = vmul.f32 %v1693_v6, %v2272_v45 }
 0x19e   : > { %v999_v18 = vmul.f32 %v1556_v27, %v984_v15 }
 0x1a0   : > { %v1014_v60 = vadd.f32 %v1557_v57, %v999_v18 }
 0x1a2   : > { %v1018_v50 = vpack.c.bf16 %v1014_v60, %v1013_v59 }
 0x1a4   : > { %1650 = vmatmul.mubr.msk.bf16.gmra.mrb[4].mxu0 %vm879_vm1, %v1018_v50 }
 0x1db   : > { %v1659_v42 = vpop.f32.mrb[0].mxu1 }
 0x1dc   : > { %v1347_v26 = vpop.f32.mrb[1].mxu1 }
 0x1dd   : > { %v1660_v21 = vpop.f32.mrb[2].mxu1 }
 0x1de   : > { %v1614_v55 = vpack.c.bf16 %v1660_v21, %v1659_v42  ;;  %v1350_v44 = vpop.f32.mrb[3].mxu1 }
 0x1df   : > { %v1609_v43 = vpack.c.bf16 %v1350_v44, %v1347_v26 }
 0x1e0   : > { %1626 = vst [vmem:[%s432_s29 + $0x8] sm:$0xff] %v1614_v55  }
 0x1e1   : > { %1610 = vst [vmem:[%s432_s29] sm:$0xff] %v1609_v43  }
 0x1e3   : > { %v1663_v45 = vpop.f32.mrb[4].mxu1 }
 0x1e4   : > { %v1363_v25 = vpop.f32.mrb[5].mxu1 }
 0x1e5   : > { %v1664_v49 = vpop.f32.mrb[6].mxu1 }
 0x1e6   : > { %v1624_v2 = vpack.c.bf16 %v1664_v49, %v1663_v45  ;;  %v1366_v37 = vpop.f32.mrb[7].mxu1 }
 0x1e7   : > { %v1619_v48 = vpack.c.bf16 %v1366_v37, %v1363_v25 }
 0x1e8   : > { %1628 = vst [vmem:[%s432_s29 + $0x18] sm:$0xff] %v1624_v2  }
 0x1e9   : > { %1627 = vst [vmem:[%s432_s29 + $0x10] sm:$0xff] %v1619_v48  }
 0x251   : > { %v1647_v0 = vpop.f32.mrb[0].mxu0 }
 0x252   : > { %v1592_v3 = vpack.c.bf16 %v1647_v0, %v1647_v0  ;;  %v1081_v1 = vpop.f32.mrb[1].mxu0 }
 0x253   : > { %v1590_v8 = vpack.c.bf16 %v1081_v1, %v1081_v1  ;;  %v1648_v27 = vpop.f32.mrb[2].mxu0 }
 0x254   : > { %1147 = vst.msk [vmem:[%s427_s11 + $0x8] sm:$0xf] %vm1144_vm2, %v1592_v3  ;;  %v1593_v32 = vpack.c.bf16 %v1648_v27, %v1648_v27  ;;  %v1084_v16 = vpop.f32.mrb[3].mxu0 }
 0x255   : > { %1145 = vst.msk [vmem:[%s427_s11] sm:$0xf] %vm1144_vm2, %v1590_v8  ;;  %v1591_v29 = vpack.c.bf16 %v1084_v16, %v1084_v16 }
 0x256   : > { %1148 = vst.msk [vmem:[%s427_s11 + $0xc] sm:$0xf] %vm1144_vm2, %v1593_v32 }
 0x257   : > { %1146 = vst.msk [vmem:[%s427_s11 + $0x4] sm:$0xf] %vm1144_vm2, %v1591_v29 }
 0x277   : > { %v1651_v58 = vpop.f32.mrb[4].mxu0 }
 0x278   : > { %v1596_v57 = vpack.c.bf16 %v1651_v58, %v1651_v58  ;;  %v1097_v41 = vpop.f32.mrb[5].mxu0 }
 0x279   : > { %v1594_v52 = vpack.c.bf16 %v1097_v41, %v1097_v41  ;;  %v1652_v54 = vpop.f32.mrb[6].mxu0 }
 0x27a   : > { %1151 = vst.msk [vmem:[%s427_s11 + $0x18] sm:$0xf] %vm1144_vm2, %v1596_v57  ;;  %v1597_v13 = vpack.c.bf16 %v1652_v54, %v1652_v54  ;;  %v1100_v30 = vpop.f32.mrb[7].mxu0 }
 0x27b   : > { %1149 = vst.msk [vmem:[%s427_s11 + $0x10] sm:$0xf] %vm1144_vm2, %v1594_v52  ;;  %v1595_v31 = vpack.c.bf16 %v1100_v30, %v1100_v30 }
 0x27c   : > { %1152 = vst.msk [vmem:[%s427_s11 + $0x1c] sm:$0xf] %vm1144_vm2, %v1597_v13 }
 0x27d   : > { %1150 = vst.msk [vmem:[%s427_s11 + $0x14] sm:$0xf] %vm1144_vm2, %v1595_v31 }
 0x27e PF: > { %s21_s13 = sadd.s32 1, %s1700_s13  }
 0x27f   : > { %p18_p4 = scmp.ge.s32.totalorder %s21_s13, 4  }
 0x281   :  { %20 = sbr.rel (!%p18_p4) target bundleno = 1 (0x1), region = 107 }

// kernel: _lambda_.3
= control target key start
LH: loop header
LB: loop body
LE: loop exit
PB: predicated region body
PF: predicated region fallthrough
CT: control target
= control target key end

     0   :  { %11 = vsyncpa [#allocation3], 0  ;;  %s3652_s0 = inlined_call_operand.vmem [shape: bf16[2,64,64], index: 0, kind: input, shape index: {}]   ;;  %s3653_s1 = inlined_call_operand.vmem [shape: bf16[2,64,128], index: 1, kind: input, shape index: {}]   ;;  %s3654_s2 = inlined_call_operand.vmem [shape: bf16[64,64], index: 2, kind: input, shape index: {}]   ;;  %s3655_s3 = inlined_call_operand.vmem [shape: f32[1,64], index: 3, kind: input, shape index: {}]   ;;  %s3656_s4 = inlined_call_operand.hbm [shape: bf16[2,4,64,64], index: 4, kind: output, shape index: {0}]   ;;  %s3657_s5 = inlined_call_operand.hbm [shape: f32[2,64,64], index: 5, kind: output, shape index: {1}]  }
   0x1   :  { %13 = vsyncpa [#allocation3 + $0x1], 0 }
   0x2   :  { %14 = vsyncpa [#allocation5], 0 }
   0x3   :  { %16 = vsyncpa [#allocation5 + $0x1], 0  ;;  %s2918_s18 = smov 0   ;;  %s2920_s19 = smov 0  }
   0x4   :  { %s2922_s20 = smov 0   ;;  %s2924_s21 = smov 0  }
   0x5   :  { %s2926_s22 = smov 0   ;;  %s2928_s23 = smov 0  }
   0x6 LB: > { %s2086_s24 = sadd.s32 4294967295, %s2874_s23   ;;  %s2087_s25 = sadd.s32 4294967294, %s2874_s23   ;;  %s2874_s23 = sphi %s2928_s23, %s22_s23   ;;  %s2870_s22 = sphi %s2926_s22, %s3664_s22   ;;  %s2866_s21 = sphi %s2924_s21, %s3663_s21   ;;  %s2862_s20 = sphi %s2922_s20, %s3662_s20   ;;  %s2858_s19 = sphi %s2920_s19, %s3661_s19   ;;  %s2854_s18 = sphi %s2918_s18, %s3660_s18  }
   0x7   : > { %s34_s26 = sadd.s32 1, %s2870_s22  ;;  %s139_s27 = sadd.s32 1, %s2862_s20 }
   0x8   : > { %p36_p0 = scmp.ge.s32.totalorder %s34_s26, 2  ;;  %p149_p1 = scmp.ne.s32.totalorder %s2862_s20, %s2858_s19 }
   0x9   : > { %p150_p2 = scmp.eq.s32.totalorder %s2086_s24, 1  ;;  %p155_p3 = scmp.ne.s32.totalorder %s2858_s19, %s2854_s18 }
   0xa   : > { %s3666_s26 = smov (%p36_p0, %s34_s26), 0  ;;  %p156_p5 = scmp.eq.s32.totalorder %s2087_s25, 1 }
   0xb   : > { %p2958_p4 = por %p150_p2, %p149_p1  ;;  %s134_s29 = ssub.s32 %s2870_s22, %s3666_s26 }
   0xc   : > { %p2090_p6 = scmp.ge.s32.totalorder %s2874_s23, 1  ;;  %p137_p7 = scmp.eq.s32.totalorder %s134_s29, 0 }
   0xd   : > { %p2965_p8 = por %p156_p5, %p155_p3  ;;  %p229_p9 = scmp.lt.s32.totalorder %s2874_s23, 3 }
   0xe   : > { %s2971_s6 = scalar_select %p137_p7, %s2862_s20, %s139_s27  }
   0xf   : > { %p230_p10 = pnand %p2090_p6, %p229_p9 }
  0x10   : > { %p272_p11 = scmp.lt.s32.totalorder (!%p230_p10), %s2866_s21, 1  ;;  %vm345_vm0 = vcmask (!%p230_p10), 130048   ;;  %s3034_s15 = sand.u32 (!%p230_p10), 1, %s2858_s19   ;;  %vm484_vm1 = vcmask (!%p230_p10), 523264   ;;  %vm475_vm2 = vcmask (!%p230_p10), 519168   ;;  %vm1775_vm3 = vcmask (!%p230_p10), 261120  }
  0x11   : > { %233 = sbr.rel (%p230_p10) target bundleno = 3073 (0xc01), region = 36  ;;  %s2091_s16 = sshll.u32 (!%p230_p10), %s3034_s15, 7  ;;  %vm1784_vm4 = vcmask (!%p230_p10), 392192  }
  0x12   : > { %s3039_s17 = scalar_lea.vmem (!%p230_p10), [#allocation2], %s2091_s16  ;;  %s2876_s24 = smov (!%p230_p10), 64  }
  0x13   : > { %s2877_s25 = smov (!%p230_p10), 112   ;;  %s2878_s27 = smov (!%p230_p10), 48  }
  0x14   : > { %s2879_s29 = smov (!%p230_p10), 96   ;;  %s2882_s9 = smov (!%p230_p10), 16  }
  0x15   : > { %s2883_s13 = smov (!%p230_p10), [#allocation2]  }
  0x18   : > { %s273_s7 = scalar_select %p272_p11, %s2866_s21, 1 }
  0x1a   : > { %s2210_s8 = sshll.u32 %s273_s7, 5  ;;  %s2880_s7 = smov 32  }
  0x1b   : > { %s2978_s11 = scalar_lea.vmem %s3653_s1, %s2210_s8  ;;  %s2989_s14 = scalar_lea.vmem %s3652_s0, %s2210_s8 }
  0x1c   : > { %v2981_v0 = vld [vmem:[%s2978_s11] sm:$0xff]   ;;  %v2984_v1 = vld [vmem:[%s2978_s11 + $0x8] sm:$0xff]   ;;  %v3005_v5 = vld [vmem:[%s2978_s11 + $0x10] sm:$0xff]   ;;  %s2881_s8 = smov 80  }
  0x1d   : > { %2470 = vmatprep.subr.msk.bf16.mxu0 %vm345_vm0, %v2981_v0  ;;  %v359_v2 = vsel %vm345_vm0, %v2981_v0, 0  ;;  %v2998_v3 = vld [vmem:[%s2989_s14] sm:$0xff]   ;;  %v362_v4 = vsel %vm345_vm0, %v2984_v1, 0  ;;  %v365_v6 = vsel %vm345_vm0, %v3005_v5, 0  ;;  %v3012_v7 = vld [vmem:[%s2978_s11 + $0x18] sm:$0xff]   ;;  %v3019_v9 = vld [vmem:[%s2989_s14 + $0x8] sm:$0xff]  }
  0x1e   : > { %2319 = vmatpush3.bf16.xpose.msra.mxu0 %v359_v2  ;;  %2326 = vmatprep.mubr.msk.bf16.mxu0 %vm345_vm0, %v2998_v3  ;;  %v368_v8 = vsel %vm345_vm0, %v3012_v7, 0  ;;  %v3022_v10 = vld [vmem:[%s2989_s14 + $0x10] sm:$0xff]   ;;  %v3029_v11 = vld [vmem:[%s2989_s14 + $0x18] sm:$0xff]  }
  0x1f   : > { %2471 = vmatprep.subr.msk.bf16.mxu0 %vm345_vm0, %v2984_v1 }
  0x26   : > { %2321 = vmatpush3.bf16.xpose.msra.mxu0 %v362_v4 }
  0x27   : > { %2472 = vmatprep.subr.msk.bf16.mxu0 %vm345_vm0, %v3005_v5 }
  0x2e   : > { %2323 = vmatpush3.bf16.xpose.msra.mxu0 %v365_v6 }
  0x2f   : > { %2473 = vmatprep.subr.msk.bf16.mxu0 %vm345_vm0, %v3012_v7 }
  0x36   : > { %2325 = vmatpush3.bf16.xpose.msra.mxu0 %v368_v8 }
  0x3d   : > { %2327 = vmatmul.mubr.msk.bf16.vlgmr.msra.gmra.mrb[0].mxu0 %vm345_vm0, %v3019_v9 }
  0x3e   : > { %2330 = vmatprep.mubr.msk.bf16.mxu0 %vm345_vm0, %v3022_v10 }
  0x45   : > { %2331 = vmatmul.mubr.msk.bf16.gmra.mrb[4].mxu0 %vm345_vm0, %v3029_v11 }
 0x110   : > { %v2328_v12 = vpop.f32.mrb[0].mxu0 }
 0x111   : > { %v437_v13 = vmul.f32 0.125, %v2328_v12  ;;  %v404_v14 = vpop.f32.mrb[1].mxu0 }
 0x112   : > { %v435_v15 = vmul.f32 0.125, %v404_v14  ;;  %v2329_v16 = vpop.f32.mrb[2].mxu0 }
 0x113   : > { %v2214_v17 = vpack.c.bf16 %v437_v13, %v437_v13  ;;  %v438_v18 = vmul.f32 0.125, %v2329_v16  ;;  %v407_v19 = vpop.f32.mrb[3].mxu0  ;;  %v491_v20 = vsel %vm484_vm1, %v437_v13, -inf }
 0x114   : > { %v2212_v21 = vpack.c.bf16 %v435_v15, %v435_v15  ;;  %v436_v22 = vmul.f32 0.125, %v407_v19  ;;  %492 = vmax.xlane.f32.xlu1 %v491_v20  ;;  %v485_v23 = vsel %vm484_vm1, %v435_v15, -inf }
 0x115   : > { %478 = vst.msk [vmem:[%s3039_s17 + $0x8] sm:$0xf] %vm475_vm2, %v2214_v17  ;;  %v2215_v24 = vpack.c.bf16 %v438_v18, %v438_v18  ;;  %486 = vmax.xlane.f32.xlu0 %v485_v23  ;;  %v494_v26 = vsel %vm484_vm1, %v438_v18, -inf }
 0x116   : > { %476 = vst.msk [vmem:[%s3039_s17] sm:$0xf] %vm475_vm2, %v2212_v21  ;;  %v2213_v25 = vpack.c.bf16 %v436_v22, %v436_v22  ;;  %v488_v27 = vsel %vm484_vm1, %v436_v22, -inf }
 0x117   : > { %479 = vst.msk [vmem:[%s3039_s17 + $0xc] sm:$0xf] %vm475_vm2, %v2215_v24 }
 0x118   : > { %477 = vst.msk [vmem:[%s3039_s17 + $0x4] sm:$0xf] %vm475_vm2, %v2213_v25  ;;  %495 = vmax.xlane.f32.xlu1 %v494_v26  ;;  %v2332_v28 = vpop.f32.mrb[4].mxu0 }
 0x119   : > { %489 = vmax.xlane.f32.xlu0 %v488_v27  ;;  %v441_v29 = vmul.f32 0.125, %v2332_v28  ;;  %v420_v30 = vpop.f32.mrb[5].mxu0 }
 0x11a   : > { %v439_v31 = vmul.f32 0.125, %v420_v30  ;;  %v2333_v32 = vpop.f32.mrb[6].mxu0 }
 0x11b   : > { %v2218_v33 = vpack.c.bf16 %v441_v29, %v441_v29  ;;  %v503_v34 = vsel %vm484_vm1, %v441_v29, -inf  ;;  %v3052_v35 = vmul.f32 0.125, %v2333_v32  ;;  %v423_v36 = vpop.f32.mrb[7].mxu0 }
 0x11c   : > { %v2216_v37 = vpack.c.bf16 %v439_v31, %v439_v31  ;;  %v3054_v38 = vmul.f32 0.125, %v423_v36  ;;  %v497_v40 = vsel %vm484_vm1, %v439_v31, -inf }
 0x11d   : > { %482 = vst.msk [vmem:[%s3039_s17 + $0x18] sm:$0xf] %vm475_vm2, %v2218_v33  ;;  %504 = vmax.xlane.f32.xlu0 %v503_v34  ;;  %v2219_v39 = vpack.c.bf16 %v3052_v35, %v3052_v35  ;;  %v506_v42 = vsel %vm484_vm1, %v3052_v35, -inf }
 0x11e   : > { %480 = vst.msk [vmem:[%s3039_s17 + $0x10] sm:$0xf] %vm475_vm2, %v2216_v37  ;;  %v2217_v41 = vpack.c.bf16 %v3054_v38, %v3054_v38  ;;  %v500_v43 = vsel %vm484_vm1, %v3054_v38, -inf }
 0x11f   : > { %483 = vst.msk [vmem:[%s3039_s17 + $0x1c] sm:$0xf] %vm475_vm2, %v2219_v39 }
 0x120   : > { %481 = vst.msk [vmem:[%s3039_s17 + $0x14] sm:$0xf] %vm475_vm2, %v2217_v41 }
 0x121   : > { %498 = vmax.xlane.f32.xlu0 %v497_v40 }
 0x129   : > { %579 = vrot.lane.b32.xlu1 %v2984_v1, %s2876_s24 }
 0x12d   : > { %581 = vrot.lane.b32.xlu1 %v3005_v5, %s2876_s24 }
 0x137   : > { %577 = vrot.lane.b32.xlu0 %v2981_v0, %s2876_s24 }
 0x151   : > { %507 = vmax.xlane.f32.xlu1 %v506_v42 }
 0x155   : > { %501 = vmax.xlane.f32.xlu1 %v500_v43 }
 0x166   : > { %583 = vrot.lane.b32.xlu1 %v3012_v7, %s2876_s24 }
 0x1a1   : > { %v493_v44 = vpop.xlane.xlu1 %492 }
 0x1a2   : > { %v511_v45 = vsub.f32 %v437_v13, %v493_v44  ;;  %v487_v46 = vpop.xlane.xlu0 %486 }
 0x1a3   : > { %v509_v47 = vsub.f32 %v435_v15, %v487_v46 }
 0x1a4   : > { %v521_v48 = vmul.f32 1.442695, %v511_v45 }
 0x1a5   : > { %v517_v49 = vmul.f32 1.442695, %v509_v47  ;;  %v496_v50 = vpop.xlane.xlu1 %495 }
 0x1a6   : > { %2628 = vpow2.f32 %v521_v48  ;;  %v512_v51 = vsub.f32 %v438_v18, %v496_v50  ;;  %v490_v52 = vpop.xlane.xlu0 %489 }
 0x1a7   : > { %v510_v53 = vsub.f32 %v436_v22, %v490_v52  ;;  %2630 = vpow2.f32 %v517_v49 }
 0x1a8   : > { %v523_v54 = vmul.f32 1.442695, %v512_v51 }
 0x1a9   : > { %v519_v55 = vmul.f32 1.442695, %v510_v53  ;;  %v580_v4 = vpop.permute.xlu1 %579 }
 0x1aa   : > { %2632 = vpow2.f32 %v523_v54  ;;  %v505_v56 = vpop.xlane.xlu0 %504 }
 0x1ab   : > { %v515_v57 = vsub.f32 %v441_v29, %v505_v56  ;;  %2634 = vpow2.f32 %v519_v55 }
 0x1ad   : > { %v529_v58 = vmul.f32 1.442695, %v515_v57  ;;  %v582_v15 = vpop.permute.xlu1 %581 }
 0x1ae   : > { %v499_v59 = vpop.xlane.xlu0 %498 }
 0x1af   : > { %2636 = vpow2.f32 %v529_v58  ;;  %v513_v60 = vsub.f32 %v439_v31, %v499_v59 }
 0x1b0   : > { %v3081_v61 = vpop.eup %2628 }
 0x1b1   : > { %v525_v62 = vmul.f32 1.442695, %v513_v60  ;;  %v539_v63 = vsel %vm484_vm1, %v3081_v61, 0.0  ;;  %v3085_v2 = vpop.eup %2630 }
 0x1b2   : > { %540 = vadd.xlane.f32.xlu0 %v539_v63  ;;  %v578_v6 = vpop.permute.xlu0 %577  ;;  %v533_v12 = vsel %vm484_vm1, %v3085_v2, 0.0 }
 0x1b3   : > { %2638 = vpow2.f32 %v525_v62  ;;  %2334 = vmatprep.subr.bf16.mxu1 %v578_v6 }
 0x1b4   : > { %v2633_v8 = vpop.eup %2632  ;;  %2335 = vmatpush3.bf16.msra.mxu1 %v578_v6 }
 0x1b5   : > { %2336 = vmatprep.subr.bf16.mxu1 %v580_v4  ;;  %v542_v13 = vsel %vm484_vm1, %v2633_v8, 0.0  ;;  %v2635_v14 = vpop.eup %2634 }
 0x1b6   : > { %534 = vadd.xlane.f32.xlu0 %v533_v12  ;;  %543 = vadd.xlane.f32.xlu1 %v542_v13  ;;  %v536_v17 = vsel %vm484_vm1, %v2635_v14, 0.0 }
 0x1b8   : > { %2337 = vmatpush3.bf16.msra.mxu1 %v580_v4 }
 0x1b9   : > { %v3090_v16 = vpop.eup %2636  ;;  %2338 = vmatprep.subr.bf16.mxu1 %v582_v15 }
 0x1ba   : > { %537 = vadd.xlane.f32.xlu1 %v536_v17  ;;  %v551_v18 = vsel %vm484_vm1, %v3090_v16, 0.0 }
 0x1bb   : > { %552 = vadd.xlane.f32.xlu0 %v551_v18 }
 0x1bc   : > { %2339 = vmatpush3.bf16.msra.mxu1 %v582_v15 }
 0x1bd   : > { %v3095_v19 = vpop.eup %2638 }
 0x1be   : > { %v545_v20 = vsel %vm484_vm1, %v3095_v19, 0.0 }
 0x1bf   : > { %546 = vadd.xlane.f32.xlu0 %v545_v20 }
 0x1cb   : > { %676 = vrot.lane.b32.xlu1 %v2984_v1, %s2877_s25 }
 0x1cf   : > { %678 = vrot.lane.b32.xlu1 %v3005_v5, %s2877_s25 }
 0x1de   : > { %v508_v21 = vpop.xlane.xlu1 %507 }
 0x1df   : > { %v516_v22 = vsub.f32 %v3052_v35, %v508_v21 }
 0x1e1   : > { %v531_v23 = vmul.f32 1.442695, %v516_v22 }
 0x1e2   : > { %v502_v24 = vpop.xlane.xlu1 %501 }
 0x1e3   : > { %2640 = vpow2.f32 %v531_v23  ;;  %v514_v25 = vsub.f32 %v3054_v38, %v502_v24 }
 0x1e5   : > { %v527_v26 = vmul.f32 1.442695, %v514_v25 }
 0x1e6   : > { %v584_v27 = vpop.permute.xlu1 %583 }
 0x1e7   : > { %2642 = vpow2.f32 %v527_v26  ;;  %2340 = vmatprep.subr.bf16.mxu1 %v584_v27 }
 0x1e8   : > { %2341 = vmatpush3.bf16.msra.mxu1 %v584_v27 }
 0x1ed   : > { %v2641_v28 = vpop.eup %2640 }
 0x1ee   : > { %v554_v29 = vsel %vm484_vm1, %v2641_v28, 0.0 }
 0x1ef   : > { %555 = vadd.xlane.f32.xlu0 %v554_v29 }
 0x1f1   : > { %v2643_v30 = vpop.eup %2642 }
 0x1f2   : > { %v548_v31 = vsel %vm484_vm1, %v2643_v30, 0.0 }
 0x1f3   : > { %549 = vadd.xlane.f32.xlu1 %v548_v31 }
 0x204   : > { %680 = vrot.lane.b32.xlu1 %v3012_v7, %s2877_s25 }
 0x205   : > { %674 = vrot.lane.b32.xlu0 %v2981_v0, %s2877_s25 }
 0x208   : > { %668 = vrot.lane.b32.xlu1 %v3019_v9, %s2877_s25 }
 0x209   : > { %666 = vrot.lane.b32.xlu0 %v2998_v3, %s2877_s25 }
 0x20c   : > { %672 = vrot.lane.b32.xlu1 %v3029_v11, %s2877_s25 }
 0x20d   : > { %670 = vrot.lane.b32.xlu0 %v3022_v10, %s2877_s25 }
 0x23f   : > { %v541_v32 = vpop.xlane.xlu0 %540 }
 0x243   : > { %v535_v33 = vpop.xlane.xlu0 %534  ;;  %v544_v34 = vpop.xlane.xlu1 %543 }
 0x244   : > { %2644 = vrcp.f32 %v544_v34 }
 0x245   : > { %2646 = vrcp.f32 %v535_v33 }
 0x246   : > { %2648 = vrcp.f32 %v541_v32 }
 0x247   : > { %v538_v35 = vpop.xlane.xlu1 %537 }
 0x248   : > { %2650 = vrcp.f32 %v538_v35  ;;  %v553_v46 = vpop.xlane.xlu0 %552 }
 0x24b   : > { %v677_v47 = vpop.permute.xlu1 %676 }
 0x24c   : > { %v547_v48 = vpop.xlane.xlu0 %546  ;;  %v698_v56 = vsel %vm345_vm0, %v677_v47, 0 }
 0x24e   : > { %v2645_v36 = vpop.eup %2644 }
 0x24f   : > { %v2647_v37 = vpop.eup %2646  ;;  %v568_v40 = vmul.f32 %v2645_v36, %v2633_v8  ;;  %v679_v49 = vpop.permute.xlu1 %678 }
 0x250   : > { %v2649_v38 = vpop.eup %2648  ;;  %v565_v41 = vmul.f32 %v2647_v37, %v3085_v2  ;;  %v701_v8 = vsel %vm345_vm0, %v679_v49, 0 }
 0x251   : > { %v567_v43 = vmul.f32 %v2649_v38, %v3081_v61 }
 0x252   : > { %v2651_v39 = vpop.eup %2650 }
 0x253   : > { %v566_v42 = vmul.f32 %v2651_v39, %v2635_v14  ;;  %v574_v45 = vpack.c.bf16 %v568_v40, %v567_v43 }
 0x255   : > { %v573_v44 = vpack.c.bf16 %v566_v42, %v565_v41 }
 0x257   : > { %2342 = vmatprep.mubr.msk.bf16.mxu1 %vm484_vm1, %v573_v44 }
 0x258   : > { %2343 = vmatmul.mubr.msk.bf16.vlgmr.msra.gmra.mrb[0].mxu1 %vm484_vm1, %v574_v45 }
 0x27c   : > { %v556_v50 = vpop.xlane.xlu0 %555 }
 0x27d   : > { %2652 = vrcp.f32 %v556_v50 }
 0x27e   : > { %2654 = vrcp.f32 %v547_v48 }
 0x27f   : > { %2656 = vrcp.f32 %v553_v46 }
 0x280   : > { %v675_v51 = vpop.permute.xlu0 %674  ;;  %v550_v52 = vpop.xlane.xlu1 %549 }
 0x281   : > { %v695_v53 = vsel %vm345_vm0, %v675_v51, 0  ;;  %2658 = vrcp.f32 %v550_v52  ;;  %2474 = vmatprep.subr.msk.bf16.mxu1 %vm345_vm0, %v675_v51 }
 0x282   : > { %2351 = vmatpush3.bf16.xpose.msra.mxu1 %v695_v53 }
 0x283   : > { %2475 = vmatprep.subr.msk.bf16.mxu1 %vm345_vm0, %v677_v47 }
 0x284   : > { %v667_v4 = vpop.permute.xlu0 %666  ;;  %v681_v6 = vpop.permute.xlu1 %680 }
 0x285   : > { %v704_v12 = vsel %vm345_vm0, %v681_v6, 0 }
 0x287   : > { %v2653_v54 = vpop.eup %2652 }
 0x288   : > { %v2655_v55 = vpop.eup %2654  ;;  %v572_v59 = vmul.f32 %v2653_v54, %v2641_v28  ;;  %v669_v13 = vpop.permute.xlu1 %668 }
 0x289   : > { %v2657_v57 = vpop.eup %2656  ;;  %v569_v60 = vmul.f32 %v2655_v55, %v3095_v19  ;;  %v671_v14 = vpop.permute.xlu0 %670 }
 0x28a   : > { %2353 = vmatpush3.bf16.xpose.msra.mxu1 %v698_v56  ;;  %v571_v62 = vmul.f32 %v2657_v57, %v3090_v16 }
 0x28b   : > { %v2659_v58 = vpop.eup %2658  ;;  %2476 = vmatprep.subr.msk.bf16.mxu1 %vm345_vm0, %v679_v49 }
 0x28c   : > { %v570_v61 = vmul.f32 %v2659_v58, %v2643_v30  ;;  %v576_v2 = vpack.c.bf16 %v572_v59, %v571_v62  ;;  %v673_v15 = vpop.permute.xlu1 %672 }
 0x28e   : > { %v575_v63 = vpack.c.bf16 %v570_v61, %v569_v60 }
 0x290   : > { %2346 = vmatprep.mubr.msk.bf16.mxu1 %vm484_vm1, %v575_v63 }
 0x291   : > { %2347 = vmatmul.mubr.msk.bf16.gmra.mrb[4].mxu1 %vm484_vm1, %v576_v2 }
 0x292   : > { %2355 = vmatpush3.bf16.xpose.msra.mxu1 %v701_v8  ;;  %2358 = vmatprep.mubr.msk.bf16.mxu1 %vm345_vm0, %v667_v4 }
 0x293   : > { %2477 = vmatprep.subr.msk.bf16.mxu1 %vm345_vm0, %v681_v6 }
 0x29a   : > { %2357 = vmatpush3.bf16.xpose.msra.mxu1 %v704_v12 }
 0x2a1   : > { %2359 = vmatmul.mubr.msk.bf16.vlgmr.msra.gmra.mrb[8].mxu1 %vm345_vm0, %v669_v13 }
 0x2a2   : > { %2362 = vmatprep.mubr.msk.bf16.mxu1 %vm345_vm0, %v671_v14 }
 0x2a9   : > { %2363 = vmatmul.mubr.msk.bf16.gmra.mrb[12].mxu1 %vm345_vm0, %v673_v15 }
 0x32b   : > { %v3131_v16 = vpop.f32.mrb[0].mxu1 }
 0x32c   : > { %v3133_v17 = vpop.f32.mrb[1].mxu1 }
 0x32d   : > { %v3135_v18 = vpop.f32.mrb[2].mxu1 }
 0x32e   : > { %v3137_v19 = vpop.f32.mrb[3].mxu1 }
 0x364   : > { %v3139_v20 = vpop.f32.mrb[4].mxu1 }
 0x365   : > { %v3141_v21 = vpop.f32.mrb[5].mxu1 }
 0x366   : > { %v3143_v22 = vpop.f32.mrb[6].mxu1 }
 0x367   : > { %v3145_v23 = vpop.f32.mrb[7].mxu1 }
 0x374   : > { %v2360_v24 = vpop.f32.mrb[8].mxu1 }
 0x375   : > { %v773_v25 = vmul.f32 0.125, %v2360_v24  ;;  %v740_v26 = vpop.f32.mrb[9].mxu1 }
 0x376   : > { %v771_v27 = vmul.f32 0.125, %v740_v26  ;;  %v2361_v28 = vpop.f32.mrb[10].mxu1 }
 0x377   : > { %v2222_v29 = vpack.c.bf16 %v773_v25, %v773_v25  ;;  %v774_v30 = vmul.f32 0.125, %v2361_v28  ;;  %v743_v31 = vpop.f32.mrb[11].mxu1  ;;  %v826_v32 = vsel %vm484_vm1, %v773_v25, -inf }
 0x378   : > { %v2220_v33 = vpack.c.bf16 %v771_v27, %v771_v27  ;;  %v772_v34 = vmul.f32 0.125, %v743_v31  ;;  %827 = vmax.xlane.f32.xlu0 %v826_v32  ;;  %v820_v38 = vsel %vm484_vm1, %v771_v27, -inf }
 0x379   : > { %2135 = vst.msk [vmem:[%s3039_s17 + $0x28] sm:$0xf] %vm475_vm2, %v2222_v29  ;;  %v2223_v35 = vpack.c.bf16 %v774_v30, %v774_v30  ;;  %v829_v44 = vsel %vm484_vm1, %v774_v30, -inf }
 0x37a   : > { %2133 = vst.msk [vmem:[%s3039_s17 + $0x20] sm:$0xf] %vm475_vm2, %v2220_v33  ;;  %v2221_v36 = vpack.c.bf16 %v772_v34, %v772_v34  ;;  %v823_v37 = vsel %vm484_vm1, %v772_v34, -inf }
 0x37b   : > { %2136 = vst.msk [vmem:[%s3039_s17 + $0x2c] sm:$0xf] %vm475_vm2, %v2223_v35  ;;  %824 = vmax.xlane.f32.xlu1 %v823_v37 }
 0x37c   : > { %2134 = vst.msk [vmem:[%s3039_s17 + $0x24] sm:$0xf] %vm475_vm2, %v2221_v36  ;;  %821 = vmax.xlane.f32.xlu0 %v820_v38  ;;  %v2364_v39 = vpop.f32.mrb[12].mxu1 }
 0x37d   : > { %v777_v40 = vmul.f32 0.125, %v2364_v39  ;;  %v756_v41 = vpop.f32.mrb[13].mxu1 }
 0x37e   : > { %v775_v42 = vmul.f32 0.125, %v756_v41  ;;  %v2365_v43 = vpop.f32.mrb[14].mxu1 }
 0x37f   : > { %v2226_v45 = vpack.c.bf16 %v777_v40, %v777_v40  ;;  %v3159_v46 = vmul.f32 0.125, %v2365_v43  ;;  %v759_v47 = vpop.f32.mrb[15].mxu1  ;;  %v838_v50 = vsel %vm484_vm1, %v777_v40, -inf }
 0x380   : > { %830 = vmax.xlane.f32.xlu0 %v829_v44  ;;  %v2224_v48 = vpack.c.bf16 %v775_v42, %v775_v42  ;;  %v3161_v49 = vmul.f32 0.125, %v759_v47  ;;  %v832_v53 = vsel %vm484_vm1, %v775_v42, -inf }
 0x381   : > { %2139 = vst.msk [vmem:[%s3039_s17 + $0x38] sm:$0xf] %vm475_vm2, %v2226_v45  ;;  %v2227_v51 = vpack.c.bf16 %v3159_v46, %v3159_v46  ;;  %v841_v54 = vsel %vm484_vm1, %v3159_v46, -inf }
 0x382   : > { %2137 = vst.msk [vmem:[%s3039_s17 + $0x30] sm:$0xf] %vm475_vm2, %v2224_v48  ;;  %v2225_v52 = vpack.c.bf16 %v3161_v49, %v3161_v49  ;;  %v835_v55 = vsel %vm484_vm1, %v3161_v49, -inf }
 0x383   : > { %2140 = vst.msk [vmem:[%s3039_s17 + $0x3c] sm:$0xf] %vm475_vm2, %v2227_v51 }
 0x384   : > { %839 = vmax.xlane.f32.xlu0 %v838_v50  ;;  %2138 = vst.msk [vmem:[%s3039_s17 + $0x34] sm:$0xf] %vm475_vm2, %v2225_v52 }
 0x388   : > { %833 = vmax.xlane.f32.xlu0 %v832_v53 }
 0x38c   : > { %914 = vrot.lane.b32.xlu1 %v2984_v1, %s2878_s27 }
 0x390   : > { %916 = vrot.lane.b32.xlu1 %v3005_v5, %s2878_s27 }
 0x39e   : > { %912 = vrot.lane.b32.xlu0 %v2981_v0, %s2878_s27 }
 0x3b4   : > { %842 = vmax.xlane.f32.xlu1 %v841_v54 }
 0x3b8   : > { %836 = vmax.xlane.f32.xlu1 %v835_v55 }
 0x3c9   : > { %918 = vrot.lane.b32.xlu1 %v3012_v7, %s2878_s27 }
 0x405   : > { %v828_v56 = vpop.xlane.xlu0 %827 }
 0x406   : > { %v846_v57 = vsub.f32 %v773_v25, %v828_v56 }
 0x408   : > { %v856_v58 = vmul.f32 1.442695, %v846_v57  ;;  %v825_v59 = vpop.xlane.xlu1 %824 }
 0x409   : > { %v822_v60 = vpop.xlane.xlu0 %821  ;;  %v845_v62 = vsub.f32 %v772_v34, %v825_v59 }
 0x40a   : > { %2660 = vpow2.f32 %v856_v58  ;;  %v844_v61 = vsub.f32 %v771_v27, %v822_v60 }
 0x40b   : > { %v854_v6 = vmul.f32 1.442695, %v845_v62 }
 0x40c   : > { %v852_v63 = vmul.f32 1.442695, %v844_v61  ;;  %v915_v29 = vpop.permute.xlu1 %914 }
 0x40d   : > { %v831_v2 = vpop.xlane.xlu0 %830 }
 0x40e   : > { %2662 = vpow2.f32 %v852_v63  ;;  %v847_v4 = vsub.f32 %v774_v30, %v831_v2 }
 0x410   : > { %v858_v8 = vmul.f32 1.442695, %v847_v4  ;;  %v917_v35 = vpop.permute.xlu1 %916 }
 0x411   : > { %v840_v12 = vpop.xlane.xlu0 %839 }
 0x412   : > { %2664 = vpow2.f32 %v858_v8  ;;  %v850_v13 = vsub.f32 %v777_v40, %v840_v12 }
 0x413   : > { %2666 = vpow2.f32 %v854_v6 }
 0x414   : > { %v3189_v14 = vpop.eup %2660  ;;  %v864_v15 = vmul.f32 1.442695, %v850_v13 }
 0x415   : > { %v834_v24 = vpop.xlane.xlu0 %833  ;;  %v874_v25 = vsel %vm484_vm1, %v3189_v14, 0.0 }
 0x416   : > { %2668 = vpow2.f32 %v864_v15  ;;  %v848_v26 = vsub.f32 %v775_v42, %v834_v24  ;;  %875 = vadd.xlane.f32.xlu0 %v874_v25 }
 0x418   : > { %v3193_v27 = vpop.eup %2662  ;;  %v860_v28 = vmul.f32 1.442695, %v848_v26 }
 0x419   : > { %v913_v30 = vpop.permute.xlu0 %912  ;;  %v868_v31 = vsel %vm484_vm1, %v3193_v27, 0.0 }
 0x41a   : > { %2670 = vpow2.f32 %v860_v28  ;;  %869 = vadd.xlane.f32.xlu0 %v868_v31  ;;  %2366 = vmatprep.subr.bf16.mxu0 %v913_v30 }
 0x41b   : > { %2367 = vmatpush3.bf16.msra.mxu0 %v913_v30 }
 0x41c   : > { %v2665_v32 = vpop.eup %2664  ;;  %2368 = vmatprep.subr.bf16.mxu0 %v915_v29 }
 0x41d   : > { %v877_v33 = vsel %vm484_vm1, %v2665_v32, 0.0  ;;  %v2667_v34 = vpop.eup %2666 }
 0x41e   : > { %878 = vadd.xlane.f32.xlu1 %v877_v33  ;;  %v871_v38 = vsel %vm484_vm1, %v2667_v34, 0.0 }
 0x41f   : > { %2369 = vmatpush3.bf16.msra.mxu0 %v915_v29 }
 0x420   : > { %v3198_v36 = vpop.eup %2668  ;;  %2370 = vmatprep.subr.bf16.mxu0 %v917_v35 }
 0x421   : > { %v886_v37 = vsel %vm484_vm1, %v3198_v36, 0.0 }
 0x422   : > { %887 = vadd.xlane.f32.xlu0 %v886_v37  ;;  %872 = vadd.xlane.f32.xlu1 %v871_v38 }
 0x423   : > { %2371 = vmatpush3.bf16.msra.mxu0 %v917_v35 }
 0x424   : > { %v3203_v39 = vpop.eup %2670 }
 0x425   : > { %v880_v40 = vsel %vm484_vm1, %v3203_v39, 0.0 }
 0x426   : > { %881 = vadd.xlane.f32.xlu0 %v880_v40 }
 0x433   : > { %1011 = vrot.lane.b32.xlu1 %v2984_v1, %s2879_s29 }
 0x437   : > { %1013 = vrot.lane.b32.xlu1 %v3005_v5, %s2879_s29 }
 0x441   : > { %v843_v41 = vpop.xlane.xlu1 %842 }
 0x442   : > { %v851_v42 = vsub.f32 %v3159_v46, %v843_v41 }
 0x444   : > { %v866_v43 = vmul.f32 1.442695, %v851_v42 }
 0x445   : > { %v837_v44 = vpop.xlane.xlu1 %836 }
 0x446   : > { %2672 = vpow2.f32 %v866_v43  ;;  %v849_v45 = vsub.f32 %v3161_v49, %v837_v44 }
 0x448   : > { %v862_v47 = vmul.f32 1.442695, %v849_v45 }
 0x449   : > { %v919_v48 = vpop.permute.xlu1 %918 }
 0x44a   : > { %2372 = vmatprep.subr.bf16.mxu0 %v919_v48  ;;  %2674 = vpow2.f32 %v862_v47 }
 0x44b   : > { %2373 = vmatpush3.bf16.msra.mxu0 %v919_v48 }
 0x450   : > { %v2673_v50 = vpop.eup %2672 }
 0x451   : > { %v889_v51 = vsel %vm484_vm1, %v2673_v50, 0.0 }
 0x452   : > { %890 = vadd.xlane.f32.xlu0 %v889_v51 }
 0x454   : > { %v2675_v52 = vpop.eup %2674 }
 0x455   : > { %v883_v53 = vsel %vm484_vm1, %v2675_v52, 0.0 }
 0x45b   : > { %884 = vadd.xlane.f32.xlu1 %v883_v53 }
 0x468   : > { %1009 = vrot.lane.b32.xlu0 %v2981_v0, %s2879_s29 }
 0x46c   : > { %1015 = vrot.lane.b32.xlu1 %v3012_v7, %s2879_s29  ;;  %1001 = vrot.lane.b32.xlu0 %v2998_v3, %s2879_s29 }
 0x470   : > { %1003 = vrot.lane.b32.xlu1 %v3019_v9, %s2879_s29  ;;  %1005 = vrot.lane.b32.xlu0 %v3022_v10, %s2879_s29 }
 0x474   : > { %1007 = vrot.lane.b32.xlu1 %v3029_v11, %s2879_s29 }
 0x4a3   : > { %v876_v46 = vpop.xlane.xlu0 %875 }
 0x4a7   : > { %v870_v54 = vpop.xlane.xlu0 %869 }
 0x4ab   : > { %v879_v49 = vpop.xlane.xlu1 %878 }
 0x4ac   : > { %2676 = vrcp.f32 %v879_v49 }
 0x4ad   : > { %2678 = vrcp.f32 %v870_v54 }
 0x4ae   : > { %2680 = vrcp.f32 %v876_v46 }
 0x4af   : > { %v873_v55 = vpop.xlane.xlu1 %872  ;;  %v888_v62 = vpop.xlane.xlu0 %887 }
 0x4b0   : > { %2682 = vrcp.f32 %v873_v55 }
 0x4b3   : > { %v882_v63 = vpop.xlane.xlu0 %881  ;;  %v1012_v2 = vpop.permute.xlu1 %1011 }
 0x4b6   : > { %v2677_v56 = vpop.eup %2676 }
 0x4b7   : > { %v2679_v57 = vpop.eup %2678  ;;  %v903_v60 = vmul.f32 %v2677_v56, %v2665_v32  ;;  %v1014_v8 = vpop.permute.xlu1 %1013 }
 0x4b8   : > { %v2681_v58 = vpop.eup %2680  ;;  %v900_v3 = vmul.f32 %v2679_v57, %v3193_v27  ;;  %v1036_v29 = vsel %vm345_vm0, %v1014_v8, 0 }
 0x4b9   : > { %v902_v10 = vmul.f32 %v2681_v58, %v3189_v14  ;;  %v1033_v14 = vsel %vm345_vm0, %v1012_v2, 0 }
 0x4ba   : > { %v2683_v59 = vpop.eup %2682 }
 0x4bb   : > { %v901_v9 = vmul.f32 %v2683_v59, %v2667_v34  ;;  %v909_v11 = vpack.c.bf16 %v903_v60, %v902_v10 }
 0x4bd   : > { %v908_v61 = vpack.c.bf16 %v901_v9, %v900_v3 }
 0x4bf   : > { %2374 = vmatprep.mubr.msk.bf16.mxu0 %vm484_vm1, %v908_v61 }
 0x4c0   : > { %2375 = vmatmul.mubr.msk.bf16.vlgmr.msra.gmra.mrb[8].mxu0 %vm484_vm1, %v909_v11 }
 0x4df   : > { %v891_v4 = vpop.xlane.xlu0 %890 }
 0x4e0   : > { %2684 = vrcp.f32 %v891_v4 }
 0x4e1   : > { %2686 = vrcp.f32 %v882_v63 }
 0x4e2   : > { %2688 = vrcp.f32 %v888_v62 }
 0x4e3   : > { %v1010_v6 = vpop.permute.xlu0 %1009 }
 0x4e4   : > { %v1030_v12 = vsel %vm345_vm0, %v1010_v6, 0  ;;  %2478 = vmatprep.subr.msk.bf16.mxu0 %vm345_vm0, %v1010_v6 }
 0x4e5   : > { %2383 = vmatpush3.bf16.xpose.msra.mxu0 %v1030_v12 }
 0x4e6   : > { %2479 = vmatprep.subr.msk.bf16.mxu0 %vm345_vm0, %v1012_v2 }
 0x4e7   : > { %v1002_v35 = vpop.permute.xlu0 %1001 }
 0x4e8   : > { %v885_v13 = vpop.xlane.xlu1 %884 }
 0x4e9   : > { %2690 = vrcp.f32 %v885_v13 }
 0x4ea   : > { %v2685_v15 = vpop.eup %2684 }
 0x4eb   : > { %v2687_v24 = vpop.eup %2686  ;;  %v907_v27 = vmul.f32 %v2685_v15, %v2673_v50 }
 0x4ec   : > { %v2689_v25 = vpop.eup %2688  ;;  %v1016_v28 = vpop.permute.xlu1 %1015  ;;  %v904_v30 = vmul.f32 %v2687_v24, %v3203_v39 }
 0x4ed   : > { %2385 = vmatpush3.bf16.xpose.msra.mxu0 %v1033_v14  ;;  %v906_v32 = vmul.f32 %v2689_v25, %v3198_v36  ;;  %v1039_v37 = vsel %vm345_vm0, %v1016_v28, 0  ;;  %v1006_v39 = vpop.permute.xlu0 %1005 }
 0x4ee   : > { %2480 = vmatprep.subr.msk.bf16.mxu0 %vm345_vm0, %v1014_v8 }
 0x4ef   : > { %v911_v34 = vpack.c.bf16 %v907_v27, %v906_v32 }
 0x4f0   : > { %v1004_v38 = vpop.permute.xlu1 %1003 }
 0x4f3   : > { %v2691_v26 = vpop.eup %2690 }
 0x4f4   : > { %v905_v31 = vmul.f32 %v2691_v26, %v2675_v52  ;;  %v1008_v36 = vpop.permute.xlu1 %1007 }
 0x4f5   : > { %2387 = vmatpush3.bf16.xpose.msra.mxu0 %v1036_v29 }
 0x4f6   : > { %v910_v33 = vpack.c.bf16 %v905_v31, %v904_v30  ;;  %2481 = vmatprep.subr.msk.bf16.mxu0 %vm345_vm0, %v1016_v28 }
 0x4f8   : > { %2378 = vmatprep.mubr.msk.bf16.mxu0 %vm484_vm1, %v910_v33 }
 0x4f9   : > { %2379 = vmatmul.mubr.msk.bf16.gmra.mrb[12].mxu0 %vm484_vm1, %v911_v34 }
 0x4fa   : > { %2390 = vmatprep.mubr.msk.bf16.mxu0 %vm345_vm0, %v1002_v35 }
 0x4fd   : > { %2389 = vmatpush3.bf16.xpose.msra.mxu0 %v1039_v37 }
 0x504   : > { %2391 = vmatmul.mubr.msk.bf16.vlgmr.msra.gmra.mrb[16].mxu0 %vm345_vm0, %v1004_v38 }
 0x505   : > { %2394 = vmatprep.mubr.msk.bf16.mxu0 %vm345_vm0, %v1006_v39 }
 0x50c   : > { %2395 = vmatmul.mubr.msk.bf16.gmra.mrb[20].mxu0 %vm345_vm0, %v1008_v36 }
 0x593   : > { %v3239_v40 = vpop.f32.mrb[8].mxu0 }
 0x594   : > { %v3241_v41 = vpop.f32.mrb[9].mxu0 }
 0x595   : > { %v3243_v42 = vpop.f32.mrb[10].mxu0 }
 0x596   : > { %v2566_v43 = vpack.i.bf16 %v3243_v42, %v3239_v40  ;;  %v3247_v44 = vpop.f32.mrb[11].mxu0 }
 0x597   : > { %v2556_v45 = vpack.i.bf16 %v3247_v44, %v3241_v41 }
 0x5cc   : > { %v3251_v47 = vpop.f32.mrb[12].mxu0 }
 0x5cd   : > { %v3253_v48 = vpop.f32.mrb[13].mxu0 }
 0x5ce   : > { %v3255_v50 = vpop.f32.mrb[14].mxu0 }
 0x5cf   : > { %v2571_v51 = vpack.i.bf16 %v3255_v50, %v3251_v47  ;;  %v3259_v52 = vpop.f32.mrb[15].mxu0 }
 0x5d0   : > { %v2561_v53 = vpack.i.bf16 %v3259_v52, %v3253_v48 }
 0x5d7   : > { %v2392_v46 = vpop.f32.mrb[16].mxu0 }
 0x5d8   : > { %v1108_v49 = vmul.f32 0.125, %v2392_v46  ;;  %v1075_v54 = vpop.f32.mrb[17].mxu0 }
 0x5d9   : > { %v1106_v55 = vmul.f32 0.125, %v1075_v54  ;;  %v2393_v56 = vpop.f32.mrb[18].mxu0 }
 0x5da   : > { %v2230_v57 = vpack.c.bf16 %v1108_v49, %v1108_v49  ;;  %v1109_v58 = vmul.f32 0.125, %v2393_v56  ;;  %v1078_v59 = vpop.f32.mrb[19].mxu0  ;;  %v1161_v60 = vsel %vm484_vm1, %v1108_v49, -inf }
 0x5db   : > { %v2228_v3 = vpack.c.bf16 %v1106_v55, %v1106_v55  ;;  %v1107_v9 = vmul.f32 0.125, %v1078_v59  ;;  %1162 = vmax.xlane.f32.xlu0 %v1161_v60  ;;  %v1155_v62 = vsel %vm484_vm1, %v1106_v55, -inf }
 0x5dc   : > { %2159 = vst.msk [vmem:[%s3039_s17 + $0x48] sm:$0xf] %vm475_vm2, %v2230_v57  ;;  %v2231_v10 = vpack.c.bf16 %v1109_v58, %v1109_v58  ;;  %v1164_v12 = vsel %vm484_vm1, %v1109_v58, -inf }
 0x5dd   : > { %2157 = vst.msk [vmem:[%s3039_s17 + $0x40] sm:$0xf] %vm475_vm2, %v2228_v3  ;;  %v2229_v61 = vpack.c.bf16 %v1107_v9, %v1107_v9  ;;  %v1158_v11 = vsel %vm484_vm1, %v1107_v9, -inf }
 0x5de   : > { %2160 = vst.msk [vmem:[%s3039_s17 + $0x4c] sm:$0xf] %vm475_vm2, %v2231_v10  ;;  %1159 = vmax.xlane.f32.xlu1 %v1158_v11 }
 0x5df   : > { %2158 = vst.msk [vmem:[%s3039_s17 + $0x44] sm:$0xf] %vm475_vm2, %v2229_v61  ;;  %1156 = vmax.xlane.f32.xlu0 %v1155_v62  ;;  %v2396_v63 = vpop.f32.mrb[20].mxu0 }
 0x5e0   : > { %v1112_v2 = vmul.f32 0.125, %v2396_v63  ;;  %v1091_v4 = vpop.f32.mrb[21].mxu0 }
 0x5e1   : > { %v1110_v6 = vmul.f32 0.125, %v1091_v4  ;;  %v2397_v8 = vpop.f32.mrb[22].mxu0 }
 0x5e2   : > { %v2234_v13 = vpack.c.bf16 %v1112_v2, %v1112_v2  ;;  %v3275_v14 = vmul.f32 0.125, %v2397_v8  ;;  %v1094_v15 = vpop.f32.mrb[23].mxu0  ;;  %v1173_v26 = vsel %vm484_vm1, %v1112_v2, -inf }
 0x5e3   : > { %1165 = vmax.xlane.f32.xlu0 %v1164_v12  ;;  %v2232_v24 = vpack.c.bf16 %v1110_v6, %v1110_v6  ;;  %v3277_v25 = vmul.f32 0.125, %v1094_v15  ;;  %v1167_v29 = vsel %vm484_vm1, %v1110_v6, -inf  ;;  %v3332_v15 = vld [vmem:[%s2978_s11 + $0x10] sm:$0xff]  }
 0x5e4   : > { %2163 = vst.msk [vmem:[%s3039_s17 + $0x58] sm:$0xf] %vm475_vm2, %v2234_v13  ;;  %v2235_v27 = vpack.c.bf16 %v3275_v14, %v3275_v14  ;;  %v1176_v30 = vsel %vm484_vm1, %v3275_v14, -inf  ;;  %v3327_v13 = vld [vmem:[%s2978_s11 + $0x8] sm:$0xff]  }
 0x5e5   : > { %2161 = vst.msk [vmem:[%s3039_s17 + $0x50] sm:$0xf] %vm475_vm2, %v2232_v24  ;;  %v2233_v28 = vpack.c.bf16 %v3277_v25, %v3277_v25  ;;  %v1170_v31 = vsel %vm484_vm1, %v3277_v25, -inf }
 0x5e6   : > { %2164 = vst.msk [vmem:[%s3039_s17 + $0x5c] sm:$0xf] %vm475_vm2, %v2235_v27 }
 0x5e7   : > { %1174 = vmax.xlane.f32.xlu0 %v1173_v26  ;;  %2162 = vst.msk [vmem:[%s3039_s17 + $0x54] sm:$0xf] %vm475_vm2, %v2233_v28 }
 0x5eb   : > { %1168 = vmax.xlane.f32.xlu0 %v1167_v29 }
 0x5ef   : > { %1249 = vrot.lane.b32.xlu1 %v2984_v1, %s2880_s7 }
 0x5f3   : > { %1251 = vrot.lane.b32.xlu1 %v3005_v5, %s2880_s7 }
 0x601   : > { %1247 = vrot.lane.b32.xlu0 %v2981_v0, %s2880_s7 }
 0x617   : > { %1177 = vmax.xlane.f32.xlu1 %v1176_v30 }
 0x61b   : > { %1171 = vmax.xlane.f32.xlu1 %v1170_v31 }
 0x62c   : > { %1253 = vrot.lane.b32.xlu1 %v3012_v7, %s2880_s7 }
 0x668   : > { %v1163_v32 = vpop.xlane.xlu0 %1162 }
 0x669   : > { %v1181_v33 = vsub.f32 %v1108_v49, %v1163_v32 }
 0x66b   : > { %v1191_v1 = vmul.f32 1.442695, %v1181_v33  ;;  %v1160_v34 = vpop.xlane.xlu1 %1159 }
 0x66c   : > { %v1157_v35 = vpop.xlane.xlu0 %1156  ;;  %v1180_v37 = vsub.f32 %v1107_v9, %v1160_v34  ;;  %v3341_v34 = vld [vmem:[%s2978_s11] sm:$0xff]  }
 0x66d   : > { %2692 = vpow2.f32 %v1191_v1  ;;  %v1179_v5 = vsub.f32 %v1106_v55, %v1157_v35  ;;  %v2760_v35 = vld [vmem:[%s2989_s14] sm:$0xff]  }
 0x66e   : > { %v1189_v36 = vmul.f32 1.442695, %v1180_v37  ;;  %v2762_v37 = vld [vmem:[%s2989_s14 + $0x10] sm:$0xff]  }
 0x66f   : > { %v1187_v0 = vmul.f32 1.442695, %v1179_v5  ;;  %v2761_v5 = vld [vmem:[%s2989_s14 + $0x8] sm:$0xff]  }
 0x670   : > { %v1166_v38 = vpop.xlane.xlu0 %1165 }
 0x671   : > { %2694 = vpow2.f32 %v1187_v0  ;;  %v1182_v39 = vsub.f32 %v1109_v58, %v1166_v38  ;;  %v1250_v58 = vpop.permute.xlu1 %1249  ;;  %v2763_v0 = vld [vmem:[%s2989_s14 + $0x18] sm:$0xff]   ;;  %s2768_s14 = sshll.u32 %s2883_s13, 4  ;;  %s2769_s14 = int_to_ptr.vmem [resolvable:$false] %s2768_s14 }
 0x673   : > { %v1193_v46 = vmul.f32 1.442695, %v1182_v39 }
 0x674   : > { %v1175_v54 = vpop.xlane.xlu0 %1174 }
 0x675   : > { %2696 = vpow2.f32 %v1193_v46  ;;  %v1185_v56 = vsub.f32 %v1112_v2, %v1175_v54  ;;  %v1252_v63 = vpop.permute.xlu1 %1251 }
 0x676   : > { %2698 = vpow2.f32 %v1189_v36 }
 0x677   : > { %v3305_v57 = vpop.eup %2692  ;;  %v1199_v7 = vmul.f32 1.442695, %v1185_v56 }
 0x678   : > { %v1169_v49 = vpop.xlane.xlu0 %1168  ;;  %v1209_v59 = vsel %vm484_vm1, %v3305_v57, 0.0 }
 0x679   : > { %2700 = vpow2.f32 %v1199_v7  ;;  %v1183_v55 = vsub.f32 %v1110_v6, %v1169_v49  ;;  %1210 = vadd.xlane.f32.xlu0 %v1209_v59 }
 0x67b   : > { %v3309_v60 = vpop.eup %2694  ;;  %v1195_v3 = vmul.f32 1.442695, %v1183_v55 }
 0x67c   : > { %v1248_v9 = vpop.permute.xlu0 %1247  ;;  %v1203_v10 = vsel %vm484_vm1, %v3309_v60, 0.0 }
 0x67d   : > { %2702 = vpow2.f32 %v1195_v3  ;;  %1204 = vadd.xlane.f32.xlu0 %v1203_v10  ;;  %2398 = vmatprep.subr.bf16.mxu1 %v1248_v9 }
 0x67e   : > { %2399 = vmatpush3.bf16.msra.mxu1 %v1248_v9 }
 0x67f   : > { %v3313_v61 = vpop.eup %2696  ;;  %2400 = vmatprep.subr.bf16.mxu1 %v1250_v58 }
 0x680   : > { %v1212_v11 = vsel %vm484_vm1, %v3313_v61, 0.0  ;;  %v2699_v62 = vpop.eup %2698 }
 0x681   : > { %1213 = vadd.xlane.f32.xlu1 %v1212_v11  ;;  %v1206_v6 = vsel %vm484_vm1, %v2699_v62, 0.0 }
 0x682   : > { %2401 = vmatpush3.bf16.msra.mxu1 %v1250_v58 }
 0x683   : > { %v3317_v2 = vpop.eup %2700  ;;  %2402 = vmatprep.subr.bf16.mxu1 %v1252_v63 }
 0x684   : > { %v1221_v4 = vsel %vm484_vm1, %v3317_v2, 0.0 }
 0x685   : > { %1222 = vadd.xlane.f32.xlu0 %v1221_v4  ;;  %1207 = vadd.xlane.f32.xlu1 %v1206_v6 }
 0x686   : > { %2403 = vmatpush3.bf16.msra.mxu1 %v1252_v63 }
 0x687   : > { %v3322_v8 = vpop.eup %2702 }
 0x688   : > { %v1215_v12 = vsel %vm484_vm1, %v3322_v8, 0.0 }
 0x689   : > { %1216 = vadd.xlane.f32.xlu0 %v1215_v12 }
 0x696   : > { %1346 = vrot.lane.b32.xlu1 %v3327_v13, %s2881_s8 }
 0x69a   : > { %1348 = vrot.lane.b32.xlu1 %v3332_v15, %s2881_s8 }
 0x6a4   : > { %v1178_v24 = vpop.xlane.xlu1 %1177 }
 0x6a5   : > { %v1186_v26 = vsub.f32 %v3275_v14, %v1178_v24 }
 0x6a7   : > { %v1201_v27 = vmul.f32 1.442695, %v1186_v26 }
 0x6a8   : > { %v1172_v28 = vpop.xlane.xlu1 %1171 }
 0x6a9   : > { %2704 = vpow2.f32 %v1201_v27  ;;  %v1184_v29 = vsub.f32 %v3277_v25, %v1172_v28  ;;  %v3346_v25 = vld [vmem:[%s2978_s11 + $0x18] sm:$0xff]   ;;  %s1922_s11 = scalar_lea.sflag [#allocation3], %s3034_s15 }
 0x6ab   : > { %v1197_v30 = vmul.f32 1.442695, %v1184_v29 }
 0x6ac   : > { %v1254_v31 = vpop.permute.xlu1 %1253 }
 0x6ad   : > { %2404 = vmatprep.subr.bf16.mxu1 %v1254_v31  ;;  %2706 = vpow2.f32 %v1197_v30 }
 0x6ae   : > { %2405 = vmatpush3.bf16.msra.mxu1 %v1254_v31 }
 0x6b3   : > { %v2705_v32 = vpop.eup %2704 }
 0x6b4   : > { %v1224_v33 = vsel %vm484_vm1, %v2705_v32, 0.0 }
 0x6b5   : > { %1225 = vadd.xlane.f32.xlu0 %v1224_v33 }
 0x6b7   : > { %v2707_v14 = vpop.eup %2706 }
 0x6b8   : > { %v1218_v1 = vsel %vm484_vm1, %v2707_v14, 0.0 }
 0x6be   : > { %1219 = vadd.xlane.f32.xlu1 %v1218_v1 }
 0x6cb   : > { %1344 = vrot.lane.b32.xlu0 %v3341_v34, %s2881_s8 }
 0x6cf   : > { %1350 = vrot.lane.b32.xlu1 %v3346_v25, %s2881_s8  ;;  %1336 = vrot.lane.b32.xlu0 %v2760_v35, %s2881_s8 }
 0x6d3   : > { %1338 = vrot.lane.b32.xlu1 %v2761_v5, %s2881_s8  ;;  %1340 = vrot.lane.b32.xlu0 %v2762_v37, %s2881_s8 }
 0x6d7   : > { %1342 = vrot.lane.b32.xlu1 %v2763_v0, %s2881_s8 }
 0x706   : > { %v1211_v38 = vpop.xlane.xlu0 %1210 }
 0x70a   : > { %v1205_v36 = vpop.xlane.xlu0 %1204 }
 0x70e   : > { %v1214_v39 = vpop.xlane.xlu1 %1213 }
 0x70f   : > { %2708 = vrcp.f32 %v1214_v39 }
 0x710   : > { %2710 = vrcp.f32 %v1205_v36 }
 0x711   : > { %2712 = vrcp.f32 %v1211_v38 }
 0x712   : > { %v1208_v46 = vpop.xlane.xlu1 %1207  ;;  %v1223_v11 = vpop.xlane.xlu0 %1222 }
 0x713   : > { %2714 = vrcp.f32 %v1208_v46 }
 0x716   : > { %v1217_v63 = vpop.xlane.xlu0 %1216  ;;  %v1347_v4 = vpop.permute.xlu1 %1346 }
 0x719   : > { %v2709_v54 = vpop.eup %2708 }
 0x71a   : > { %v2711_v56 = vpop.eup %2710  ;;  %v1238_v59 = vmul.f32 %v2709_v54, %v3313_v61  ;;  %v1349_v24 = vpop.permute.xlu1 %1348 }
 0x71b   : > { %v2713_v7 = vpop.eup %2712  ;;  %v1235_v55 = vmul.f32 %v2711_v56, %v3309_v60  ;;  %v1368_v60 = vsel %vm345_vm0, %v1347_v4, 0  ;;  %v1371_v31 = vsel %vm345_vm0, %v1349_v24, 0 }
 0x71c   : > { %v1237_v58 = vmul.f32 %v2713_v7, %v3305_v57 }
 0x71d   : > { %v2715_v49 = vpop.eup %2714 }
 0x71e   : > { %v1236_v3 = vmul.f32 %v2715_v49, %v2699_v62  ;;  %v1244_v10 = vpack.c.bf16 %v1238_v59, %v1237_v58 }
 0x720   : > { %v1243_v9 = vpack.c.bf16 %v1236_v3, %v1235_v55 }
 0x722   : > { %2406 = vmatprep.mubr.msk.bf16.mxu1 %vm484_vm1, %v1243_v9 }
 0x723   : > { %2407 = vmatmul.mubr.msk.bf16.vlgmr.msra.gmra.mrb[16].mxu1 %vm484_vm1, %v1244_v10 }
 0x742   : > { %v1226_v6 = vpop.xlane.xlu0 %1225 }
 0x743   : > { %2716 = vrcp.f32 %v1226_v6 }
 0x744   : > { %2718 = vrcp.f32 %v1217_v63 }
 0x745   : > { %2720 = vrcp.f32 %v1223_v11 }
 0x746   : > { %v1345_v12 = vpop.permute.xlu0 %1344 }
 0x747   : > { %v1365_v26 = vsel %vm345_vm0, %v1345_v12, 0  ;;  %2482 = vmatprep.subr.msk.bf16.mxu1 %vm345_vm0, %v1345_v12 }
 0x748   : > { %2415 = vmatpush3.bf16.xpose.msra.mxu1 %v1365_v26 }
 0x749   : > { %2483 = vmatprep.subr.msk.bf16.mxu1 %vm345_vm0, %v1347_v4 }
 0x74a   : > { %v1337_v0 = vpop.permute.xlu0 %1336 }
 0x74b   : > { %v1220_v57 = vpop.xlane.xlu1 %1219 }
 0x74c   : > { %2722 = vrcp.f32 %v1220_v57 }
 0x74d   : > { %v2717_v61 = vpop.eup %2716 }
 0x74e   : > { %v2719_v62 = vpop.eup %2718  ;;  %v1242_v29 = vmul.f32 %v2717_v61, %v2705_v32 }
 0x74f   : > { %v2721_v27 = vpop.eup %2720  ;;  %v1351_v30 = vpop.permute.xlu1 %1350  ;;  %v1239_v33 = vmul.f32 %v2719_v62, %v3322_v8 }
 0x750   : > { %2417 = vmatpush3.bf16.xpose.msra.mxu1 %v1368_v60  ;;  %v1241_v35 = vmul.f32 %v2721_v27, %v3317_v2  ;;  %v1374_v32 = vsel %vm345_vm0, %v1351_v30, 0  ;;  %v1341_v8 = vpop.permute.xlu0 %1340 }
 0x751   : > { %2484 = vmatprep.subr.msk.bf16.mxu1 %vm345_vm0, %v1349_v24 }
 0x752   : > { %v1246_v37 = vpack.c.bf16 %v1242_v29, %v1241_v35 }
 0x753   : > { %v1339_v38 = vpop.permute.xlu1 %1338 }
 0x756   : > { %v2723_v28 = vpop.eup %2722 }
 0x757   : > { %v1240_v1 = vmul.f32 %v2723_v28, %v2707_v14  ;;  %v1343_v2 = vpop.permute.xlu1 %1342 }
 0x758   : > { %2419 = vmatpush3.bf16.xpose.msra.mxu1 %v1371_v31 }
 0x759   : > { %v1245_v5 = vpack.c.bf16 %v1240_v1, %v1239_v33  ;;  %2485 = vmatprep.subr.msk.bf16.mxu1 %vm345_vm0, %v1351_v30 }
 0x75b   : > { %2410 = vmatprep.mubr.msk.bf16.mxu1 %vm484_vm1, %v1245_v5 }
 0x75c   : > { %2411 = vmatmul.mubr.msk.bf16.gmra.mrb[20].mxu1 %vm484_vm1, %v1246_v37 }
 0x75d   : > { %2422 = vmatprep.mubr.msk.bf16.mxu1 %vm345_vm0, %v1337_v0 }
 0x760   : > { %2421 = vmatpush3.bf16.xpose.msra.mxu1 %v1374_v32 }
 0x767   : > { %2423 = vmatmul.mubr.msk.bf16.vlgmr.msra.gmra.mrb[24].mxu1 %vm345_vm0, %v1339_v38 }
 0x768   : > { %2426 = vmatprep.mubr.msk.bf16.mxu1 %vm345_vm0, %v1341_v8 }
 0x76f   : > { %2427 = vmatmul.mubr.msk.bf16.gmra.mrb[28].mxu1 %vm345_vm0, %v1343_v2 }
 0x7f6   : > { %v3379_v14 = vpop.f32.mrb[16].mxu1 }
 0x7f7   : > { %v3381_v39 = vpop.f32.mrb[17].mxu1 }
 0x7f8   : > { %v3383_v36 = vpop.f32.mrb[18].mxu1 }
 0x7f9   : > { %v2586_v46 = vpack.i.bf16 %v3383_v36, %v3379_v14  ;;  %v3387_v54 = vpop.f32.mrb[19].mxu1 }
 0x7fa   : > { %v2576_v56 = vpack.i.bf16 %v3387_v54, %v3381_v39 }
 0x82f   : > { %v3391_v7 = vpop.f32.mrb[20].mxu1 }
 0x830   : > { %v3393_v49 = vpop.f32.mrb[21].mxu1 }
 0x831   : > { %v3395_v59 = vpop.f32.mrb[22].mxu1 }
 0x832   : > { %v2591_v55 = vpack.i.bf16 %v3395_v59, %v3391_v7  ;;  %v3399_v3 = vpop.f32.mrb[23].mxu1 }
 0x833   : > { %v2581_v58 = vpack.i.bf16 %v3399_v3, %v3393_v49 }
 0x83a   : > { %v2424_v9 = vpop.f32.mrb[24].mxu1 }
 0x83b   : > { %v1443_v10 = vmul.f32 0.125, %v2424_v9  ;;  %v1410_v11 = vpop.f32.mrb[25].mxu1 }
 0x83c   : > { %v1441_v63 = vmul.f32 0.125, %v1410_v11  ;;  %v2425_v4 = vpop.f32.mrb[26].mxu1 }
 0x83d   : > { %v2238_v6 = vpack.c.bf16 %v1443_v10, %v1443_v10  ;;  %v1444_v12 = vmul.f32 0.125, %v2425_v4  ;;  %v1413_v24 = vpop.f32.mrb[27].mxu1  ;;  %v1496_v29 = vsel %vm484_vm1, %v1443_v10, -inf }
 0x83e   : > { %v2236_v26 = vpack.c.bf16 %v1441_v63, %v1441_v63  ;;  %v1442_v57 = vmul.f32 0.125, %v1413_v24  ;;  %v1490_v60 = vsel %vm484_vm1, %v1441_v63, -inf }
 0x83f   : > { %2183 = vst.msk [vmem:[%s3039_s17 + $0x68] sm:$0xf] %vm475_vm2, %v2238_v6  ;;  %v2239_v61 = vpack.c.bf16 %v1444_v12, %v1444_v12  ;;  %1491 = vmax.xlane.f32.xlu0 %v1490_v60  ;;  %v1499_v38 = vsel %vm484_vm1, %v1444_v12, -inf }
 0x840   : > { %2181 = vst.msk [vmem:[%s3039_s17 + $0x60] sm:$0xf] %vm475_vm2, %v2236_v26  ;;  %v2237_v62 = vpack.c.bf16 %v1442_v57, %v1442_v57  ;;  %v1493_v27 = vsel %vm484_vm1, %v1442_v57, -inf }
 0x841   : > { %2184 = vst.msk [vmem:[%s3039_s17 + $0x6c] sm:$0xf] %vm475_vm2, %v2239_v61  ;;  %1494 = vmax.xlane.f32.xlu1 %v1493_v27 }
 0x842   : > { %2182 = vst.msk [vmem:[%s3039_s17 + $0x64] sm:$0xf] %vm475_vm2, %v2237_v62  ;;  %v2428_v28 = vpop.f32.mrb[28].mxu1 }
 0x843   : > { %v1447_v30 = vmul.f32 0.125, %v2428_v28  ;;  %1497 = vmax.xlane.f32.xlu0 %v1496_v29  ;;  %v1426_v31 = vpop.f32.mrb[29].mxu1 }
 0x844   : > { %v1445_v33 = vmul.f32 0.125, %v1426_v31  ;;  %v2429_v1 = vpop.f32.mrb[30].mxu1 }
 0x845   : > { %v2242_v35 = vpack.c.bf16 %v1447_v30, %v1447_v30  ;;  %v3414_v5 = vmul.f32 0.125, %v2429_v1  ;;  %v1429_v37 = vpop.f32.mrb[31].mxu1  ;;  %v1508_v6 = vsel %vm484_vm1, %v1447_v30, -inf }
 0x846   : > { %v2240_v0 = vpack.c.bf16 %v1445_v33, %v1445_v33  ;;  %v3416_v32 = vmul.f32 0.125, %v1429_v37  ;;  %v1502_v11 = vsel %vm484_vm1, %v1445_v33, -inf }
 0x847   : > { %2187 = vst.msk [vmem:[%s3039_s17 + $0x78] sm:$0xf] %vm475_vm2, %v2242_v35  ;;  %v2243_v8 = vpack.c.bf16 %v3414_v5, %v3414_v5  ;;  %1500 = vmax.xlane.f32.xlu0 %v1499_v38  ;;  %v1511_v4 = vsel %vm484_vm1, %v3414_v5, -inf }
 0x848   : > { %2185 = vst.msk [vmem:[%s3039_s17 + $0x70] sm:$0xf] %vm475_vm2, %v2240_v0  ;;  %v2241_v2 = vpack.c.bf16 %v3416_v32, %v3416_v32  ;;  %v1505_v9 = vsel %vm484_vm1, %v3416_v32, -inf }
 0x849   : > { %2188 = vst.msk [vmem:[%s3039_s17 + $0x7c] sm:$0xf] %vm475_vm2, %v2243_v8  ;;  %1506 = vmax.xlane.f32.xlu1 %v1505_v9 }
 0x84a   : > { %2186 = vst.msk [vmem:[%s3039_s17 + $0x74] sm:$0xf] %vm475_vm2, %v2241_v2 }
 0x84b   : > { %1503 = vmax.xlane.f32.xlu0 %v1502_v11 }
 0x84d   : > { %1512 = vmax.xlane.f32.xlu1 %v1511_v4 }
 0x84f   : > { %1509 = vmax.xlane.f32.xlu0 %v1508_v6 }
 0x8cc   : > { %v1492_v24 = vpop.xlane.xlu0 %1491 }
 0x8cd   : > { %v1514_v26 = vsub.f32 %v1441_v63, %v1492_v24 }
 0x8ce   : > { %v1495_v60 = vpop.xlane.xlu1 %1494 }
 0x8cf   : > { %v1522_v27 = vmul.f32 1.442695, %v1514_v26  ;;  %v1515_v28 = vsub.f32 %v1442_v57, %v1495_v60 }
 0x8d0   : > { %v1498_v61 = vpop.xlane.xlu0 %1497 }
 0x8d1   : > { %v1516_v62 = vsub.f32 %v1443_v10, %v1498_v61  ;;  %v1524_v35 = vmul.f32 1.442695, %v1515_v28 }
 0x8d3   : > { %v1526_v29 = vmul.f32 1.442695, %v1516_v62 }
 0x8d4   : > { %v1501_v31 = vpop.xlane.xlu0 %1500 }
 0x8d5   : > { %2724 = vpow2.f32 %v1526_v29  ;;  %v1517_v1 = vsub.f32 %v1444_v12, %v1501_v31 }
 0x8d6   : > { %2726 = vpow2.f32 %v1522_v27  ;;  %v1507_v62 = vpop.xlane.xlu1 %1506 }
 0x8d7   : > { %v1528_v37 = vmul.f32 1.442695, %v1517_v1  ;;  %v1519_v29 = vsub.f32 %v3416_v32, %v1507_v62 }
 0x8d8   : > { %v1504_v0 = vpop.xlane.xlu0 %1503 }
 0x8d9   : > { %2728 = vpow2.f32 %v1528_v37  ;;  %v1518_v38 = vsub.f32 %v1445_v33, %v1504_v0 }
 0x8da   : > { %2730 = vpow2.f32 %v1524_v35  ;;  %v1513_v27 = vpop.xlane.xlu1 %1512 }
 0x8db   : > { %v1530_v63 = vmul.f32 1.442695, %v1518_v38  ;;  %v1521_v28 = vsub.f32 %v3414_v5, %v1513_v27 }
 0x8dc   : > { %v1510_v8 = vpop.xlane.xlu0 %1509 }
 0x8dd   : > { %v1520_v2 = vsub.f32 %v1447_v30, %v1510_v8  ;;  %v1536_v31 = vmul.f32 1.442695, %v1521_v28 }
 0x8df   : > { %v3437_v9 = vpop.eup %2724  ;;  %v1534_v11 = vmul.f32 1.442695, %v1520_v2 }
 0x8e0   : > { %v1544_v10 = vsel %vm484_vm1, %v3437_v9, 0.0  ;;  %v2727_v57 = vpop.eup %2726 }
 0x8e1   : > { %2732 = vpow2.f32 %v1534_v11  ;;  %1545 = vadd.xlane.f32.xlu0 %v1544_v10  ;;  %v1538_v4 = vsel %vm484_vm1, %v2727_v57, 0.0  ;;  %v2626_v11 = vld [vmem:[%s3654_s2 + $0x10] sm:$0xff]   ;;  %v2627_v10 = vld [vmem:[%s3654_s2 + $0x18] sm:$0xff]  }
 0x8e2   : > { %2734 = vpow2.f32 %v1530_v63  ;;  %v2625_v63 = vld [vmem:[%s3654_s2 + $0x8] sm:$0xff]  }
 0x8e3   : > { %v3441_v12 = vpop.eup %2728  ;;  %2736 = vpow2.f32 %v1536_v31 }
 0x8e4   : > { %v1547_v33 = vsel %vm484_vm1, %v3441_v12, 0.0  ;;  %v2731_v6 = vpop.eup %2730 }
 0x8e5   : > { %1539 = vadd.xlane.f32.xlu0 %v1538_v4  ;;  %1548 = vadd.xlane.f32.xlu1 %v1547_v33  ;;  %v1541_v30 = vsel %vm484_vm1, %v2731_v6, 0.0 }
 0x8e9   : > { %1542 = vadd.xlane.f32.xlu1 %v1541_v30 }
 0x8eb   : > { %v3447_v24 = vpop.eup %2732 }
 0x8ec   : > { %v1556_v26 = vsel %vm484_vm1, %v3447_v24, 0.0  ;;  %v3451_v60 = vpop.eup %2734 }
 0x8ed   : > { %1557 = vadd.xlane.f32.xlu0 %v1556_v26  ;;  %v1550_v61 = vsel %vm484_vm1, %v3451_v60, 0.0  ;;  %v2737_v41 = vpop.eup %2736 }
 0x8ee   : > { %v1559_v40 = vsel %vm484_vm1, %v2737_v41, 0.0 }
 0x8f1   : > { %1551 = vadd.xlane.f32.xlu0 %v1550_v61 }
 0x8fa   : > { %1584 = vrot.lane.b32.xlu1 %v3327_v13, %s2882_s9  ;;  %v1532_v13 = vmul.f32 1.442695, %v1519_v29 }
 0x8fc   : > { %2738 = vpow2.f32 %v1532_v13 }
 0x8fe   : > { %1586 = vrot.lane.b32.xlu1 %v3332_v15, %s2882_s9 }
 0x906   : > { %v2739_v42 = vpop.eup %2738 }
 0x907   : > { %1582 = vrot.lane.b32.xlu0 %v3341_v34, %s2882_s9 }
 0x90b   : > { %2557 = vrot.lane.b32.xlu0 %v2556_v45, %s2882_s9 }
 0x90f   : > { %2567 = vrot.lane.b32.xlu0 %v2566_v43, %s2882_s9  ;;  %v1553_v43 = vsel %vm484_vm1, %v2739_v42, 0.0 }
 0x913   : > { %2577 = vrot.lane.b32.xlu0 %v2576_v56, %s2880_s7 }
 0x917   : > { %2587 = vrot.lane.b32.xlu0 %v2586_v46, %s2880_s7 }
 0x922   : > { %1560 = vadd.xlane.f32.xlu1 %v1559_v40 }
 0x926   : > { %1554 = vadd.xlane.f32.xlu1 %v1553_v43 }
 0x937   : > { %1588 = vrot.lane.b32.xlu1 %v3346_v25, %s2882_s9 }
 0x93b   : > { %2562 = vrot.lane.b32.xlu1 %v2561_v53, %s2882_s9 }
 0x93f   : > { %2572 = vrot.lane.b32.xlu1 %v2571_v51, %s2882_s9 }
 0x943   : > { %2582 = vrot.lane.b32.xlu1 %v2581_v58, %s2880_s7 }
 0x947   : > { %2592 = vrot.lane.b32.xlu1 %v2591_v55, %s2880_s7  ;;  %s1942_s7 = sshll.u32 %s3039_s17, 4  ;;  %s2770_s17 = scalar_lea.vmem %s2769_s14, 4096  ;;  %s3558_s7 = int_to_ptr.vmem [resolvable:$true] %s1942_s7 }
 0x948   : > { %s2764_s12 = scalar_lea.vmem %s3558_s7, 2048  ;;  %p2771_p1 = scmp.lt.s32.totalorder %s3558_s7, %s2769_s14 }
 0x949   : > { %p2765_p12 = scmp.ne.s32.totalorder %s3558_s7, %s2764_s12  ;;  %p2772_p2 = scmp.lt.s32.totalorder %s2770_s17, %s2764_s12 }
 0x94b   : > { %p2766_p13 = pnand %p2765_p12, %p2958_p4  ;;  %p2773_p3 = por %p2772_p2, %p2771_p1 }
 0x94d   : > { %p2767_p0 = pneg %p2766_p13 }
 0x94f   : > { %p2774_p5 = pnand %p2773_p3, %p2767_p0 }
 0x96e   : > { %v1546_v44 = vpop.xlane.xlu0 %1545 }
 0x972   : > { %v1540_v45 = vpop.xlane.xlu0 %1539  ;;  %v1549_v15 = vpop.xlane.xlu1 %1548 }
 0x973   : > { %2740 = vrcp.f32 %v1540_v45 }
 0x976   : > { %v1543_v48 = vpop.xlane.xlu1 %1542 }
 0x977   : > { %2742 = vrcp.f32 %v1543_v48 }
 0x978   : > { %2744 = vrcp.f32 %v1549_v15 }
 0x979   : > { %2746 = vrcp.f32 %v1546_v44 }
 0x97a   : > { %v1558_v52 = vpop.xlane.xlu0 %1557  ;;  %v1585_v51 = vpop.permute.xlu1 %1584 }
 0x97d   : > { %v2741_v47 = vpop.eup %2740 }
 0x97e   : > { %v1552_v53 = vpop.xlane.xlu0 %1551  ;;  %v1570_v25 = vmul.f32 %v2741_v47, %v2727_v57  ;;  %v1587_v36 = vpop.permute.xlu1 %1586 }
 0x981   : > { %v2743_v50 = vpop.eup %2742 }
 0x982   : > { %v1583_v34 = vpop.permute.xlu0 %1582  ;;  %v1571_v14 = vmul.f32 %v2743_v50, %v2731_v6  ;;  %v2745_v54 = vpop.eup %2744 }
 0x983   : > { %2430 = vmatprep.subr.bf16.mxu0 %v1583_v34  ;;  %v2747_v7 = vpop.eup %2746  ;;  %v1573_v49 = vmul.f32 %v2745_v54, %v3441_v12 }
 0x984   : > { %2431 = vmatpush3.bf16.msra.mxu0 %v1583_v34  ;;  %v1578_v39 = vpack.c.bf16 %v1571_v14, %v1570_v25  ;;  %v1572_v55 = vmul.f32 %v2747_v7, %v3437_v9  ;;  %v2624_v9 = vld [vmem:[%s3654_s2] sm:$0xff]  }
 0x985   : > { %2432 = vmatprep.subr.bf16.mxu0 %v1585_v51  ;;  %2462 = vmatprep.subr.bf16.mxu1 %v2624_v9 }
 0x986   : > { %2438 = vmatprep.mubr.msk.bf16.mxu0 %vm484_vm1, %v1578_v39  ;;  %v1579_v3 = vpack.c.bf16 %v1573_v49, %v1572_v55  ;;  %2466 = vmatpush3.bf16.msra.mxu1 %v2624_v9  ;;  %v2558_v28 = vpop.permute.xlu0 %2557 }
 0x987   : > { %2463 = vmatprep.subr.bf16.mxu1 %v2625_v63  ;;  %v2560_v40 = vunpack.i.h.bf16 %v2558_v28 }
 0x988   : > { %2433 = vmatpush3.bf16.msra.mxu0 %v1585_v51 }
 0x989   : > { %2434 = vmatprep.subr.bf16.mxu0 %v1587_v36  ;;  %v1768_v48 = vsel %vm345_vm0, %v3137_v19, %v2560_v40 }
 0x98a   : > { %2467 = vmatpush3.bf16.msra.mxu1 %v2625_v63  ;;  %v2568_v29 = vpop.permute.xlu0 %2567 }
 0x98b   : > { %2464 = vmatprep.subr.bf16.mxu1 %v2626_v11  ;;  %v2570_v47 = vunpack.i.h.bf16 %v2568_v29  ;;  %v2569_v50 = vunpack.i.l.bf16 %v2568_v29 }
 0x98c   : > { %2435 = vmatpush3.bf16.msra.mxu0 %v1587_v36 }
 0x98d   : > { %v1769_v55 = vsel %vm345_vm0, %v3131_v16, %v2569_v50 }
 0x98e   : > { %2468 = vmatpush3.bf16.msra.mxu1 %v2626_v11  ;;  %v2578_v13 = vpop.permute.xlu0 %2577 }
 0x98f   : > { %2465 = vmatprep.subr.bf16.mxu1 %v2627_v10  ;;  %v2580_v44 = vunpack.i.h.bf16 %v2578_v13  ;;  %v2579_v45 = vunpack.i.l.bf16 %v2578_v13 }
 0x991   : > { %v1777_v14 = vsel %vm1775_vm3, %v1768_v48, %v2580_v44 }
 0x992   : > { %2469 = vmatpush3.bf16.msra.mxu1 %v2627_v10  ;;  %v2588_v43 = vpop.permute.xlu0 %2587 }
 0x993   : > { %v2590_v39 = vunpack.i.h.bf16 %v2588_v43  ;;  %v2589_v36 = vunpack.i.l.bf16 %v2588_v43 }
 0x9af   : > { %v1561_v46 = vpop.xlane.xlu1 %1560 }
 0x9b0   : > { %2748 = vrcp.f32 %v1561_v46 }
 0x9b1   : > { %2750 = vrcp.f32 %v1552_v53 }
 0x9b2   : > { %2752 = vrcp.f32 %v1558_v52 }
 0x9b3   : > { %v1555_v56 = vpop.xlane.xlu1 %1554 }
 0x9b4   : > { %2754 = vrcp.f32 %v1555_v56 }
 0x9b7   : > { %v1589_v59 = vpop.permute.xlu1 %1588 }
 0x9b8   : > { %2436 = vmatprep.subr.bf16.mxu0 %v1589_v59 }
 0x9b9   : > { %2437 = vmatpush3.bf16.msra.mxu0 %v1589_v59  ;;  %v1770_v59 = vsel %vm345_vm0, %v3135_v18, %v2570_v47 }
 0x9ba   : > { %v2749_v58 = vpop.eup %2748  ;;  %2446 = vmatprep.subr.bf16.mxu0 %v2624_v9 }
 0x9bb   : > { %v2751_v5 = vpop.eup %2750  ;;  %v1577_v35 = vmul.f32 %v2749_v58, %v2737_v41  ;;  %v2563_v31 = vpop.permute.xlu1 %2562 }
 0x9bc   : > { %2439 = vmatmul.mubr.msk.bf16.vlgmr.msra.gmra.mrb[24].mxu0 %vm484_vm1, %v1579_v3  ;;  %v2753_v32 = vpop.eup %2752  ;;  %v1574_v37 = vmul.f32 %v2751_v5, %v3451_v60  ;;  %v2565_v19 = vunpack.i.h.bf16 %v2563_v31  ;;  %v2564_v56 = vunpack.i.l.bf16 %v2563_v31  ;;  %v1778_v5 = vsel %vm1775_vm3, %v1769_v55, %v2589_v36 }
 0x9bd   : > { %v1576_v38 = vmul.f32 %v2753_v32, %v3447_v24  ;;  %2447 = vmatpush3.bf16.msra.mxu0 %v2624_v9  ;;  %v1779_v32 = vsel %vm1775_vm3, %v1770_v59, %v2590_v39 }
 0x9be   : > { %v2755_v1 = vpop.eup %2754  ;;  %2448 = vmatprep.subr.bf16.mxu0 %v2625_v63  ;;  %v1772_v18 = vsel %vm345_vm0, %v3145_v23, %v2565_v19  ;;  %v1771_v16 = vsel %vm345_vm0, %v3141_v21, %v2564_v56 }
 0x9bf   : > { %v1575_v0 = vmul.f32 %v2755_v1, %v2739_v42  ;;  %v1581_v2 = vpack.c.bf16 %v1577_v35, %v1576_v38  ;;  %v2573_v41 = vpop.permute.xlu1 %2572  ;;  %v2559_v42 = vunpack.i.l.bf16 %v2558_v28 }
 0x9c0   : > { %v2574_v9 = vunpack.i.l.bf16 %v2573_v41 }
 0x9c1   : > { %v1580_v8 = vpack.c.bf16 %v1575_v0, %v1574_v37  ;;  %2449 = vmatpush3.bf16.msra.mxu0 %v2625_v63  ;;  %v1767_v52 = vsel %vm345_vm0, %v3133_v17, %v2559_v42 }
 0x9c2   : > { %2450 = vmatprep.subr.bf16.mxu0 %v2626_v11  ;;  %v1776_v25 = vsel %vm1775_vm3, %v1767_v52, %v2579_v45 }
 0x9c3   : > { %2442 = vmatprep.mubr.msk.bf16.mxu0 %vm484_vm1, %v1580_v8  ;;  %v2583_v15 = vpop.permute.xlu1 %2582 }
 0x9c4   : > { %2443 = vmatmul.mubr.msk.bf16.gmra.mrb[28].mxu0 %vm484_vm1, %v1581_v2  ;;  %v2585_v1 = vunpack.i.h.bf16 %v2583_v15  ;;  %v2584_v35 = vunpack.i.l.bf16 %v2583_v15  ;;  %v2575_v2 = vunpack.i.h.bf16 %v2573_v41 }
 0x9c5   : > { %2451 = vmatpush3.bf16.msra.mxu0 %v2626_v11 }
 0x9c6   : > { %2452 = vmatprep.subr.bf16.mxu0 %v2627_v10 }
 0x9c7   : > { %v2593_v7 = vpop.permute.xlu1 %2592 }
 0x9c9   : > { %2453 = vmatpush3.bf16.msra.mxu0 %v2627_v10  ;;  %v1780_v10 = vsel %vm1775_vm3, %v1771_v16, %v2584_v35 }
 0xa8f   : > { %v2440_v57 = vpop.f32.mrb[24].mxu0 }
 0xa90   : > { %v1640_v12 = vpop.f32.mrb[25].mxu0 }
 0xa91   : > { %v2441_v4 = vpop.f32.mrb[26].mxu0 }
 0xa92   : > { %v2606_v33 = vpack.i.bf16 %v2441_v4, %v2440_v57  ;;  %v1643_v6 = vpop.f32.mrb[27].mxu0  ;;  %v1781_v57 = vsel %vm1775_vm3, %v1772_v18, %v2585_v1  ;;  %v2594_v4 = vunpack.i.l.bf16 %v2593_v7 }
 0xa93   : > { %v2596_v30 = vpack.i.bf16 %v1643_v6, %v1640_v12  ;;  %v2595_v12 = vunpack.i.h.bf16 %v2593_v7 }
 0xa95   : > { %2597 = vrot.lane.b32.xlu0 %v2596_v30, %s2878_s27  ;;  %v1774_v30 = vsel %vm345_vm0, %v3143_v22, %v2575_v2 }
 0xa97   : > { %v2444_v24 = vpop.f32.mrb[28].mxu0 }
 0xa98   : > { %v1656_v26 = vpop.f32.mrb[29].mxu0 }
 0xa99   : > { %2607 = vrot.lane.b32.xlu0 %v2606_v33, %s2878_s27  ;;  %v2445_v60 = vpop.f32.mrb[30].mxu0 }
 0xa9a   : > { %v2611_v61 = vpack.i.bf16 %v2445_v60, %v2444_v24  ;;  %v1659_v62 = vpop.f32.mrb[31].mxu0  ;;  %v1773_v24 = vsel %vm345_vm0, %v3139_v20, %v2574_v9 }
 0xa9b   : > { %v2601_v27 = vpack.i.bf16 %v1659_v62, %v1656_v26  ;;  %v1783_v62 = vsel %vm1775_vm3, %v1774_v30, %v2595_v12 }
 0xa9d   : > { %2602 = vrot.lane.b32.xlu1 %v2601_v27, %s2878_s27 }
 0xaa1   : > { %2612 = vrot.lane.b32.xlu1 %v2611_v61, %s2878_s27  ;;  %v1782_v61 = vsel %vm1775_vm3, %v1773_v24, %v2594_v4  ;;  %s2244_s27 = sshll.u32 %s2866_s21, 11 }
 0xaa2   : > { %s3556_s10 = scalar_lea.hbm %s3656_s4, %s2244_s27 }
 0xb07   : > { %v2598_v53 = vpop.permute.xlu0 %2597 }
 0xb08   : > { %v2600_v51 = vunpack.i.h.bf16 %v2598_v53  ;;  %v2599_v34 = vunpack.i.l.bf16 %v2598_v53 }
 0xb0a   : > { %v1786_v46 = vsel %vm1784_vm4, %v1777_v14, %v2600_v51  ;;  %v1785_v54 = vsel %vm1784_vm4, %v1776_v25, %v2599_v34 }
 0xb0b   : > { %v1793_v17 = vpack.c.bf16 %v1786_v46, %v1785_v54  ;;  %v2608_v49 = vpop.permute.xlu0 %2607 }
 0xb0c   : > { %v2610_v3 = vunpack.i.h.bf16 %v2608_v49  ;;  %v2609_v58 = vunpack.i.l.bf16 %v2608_v49 }
 0xb0d   : > { %2454 = vmatprep.mubr.msk.bf16.mxu0 %vm484_vm1, %v1793_v17 }
 0xb0e   : > { %v1788_v37 = vsel %vm1784_vm4, %v1779_v32, %v2610_v3  ;;  %v1787_v0 = vsel %vm1784_vm4, %v1778_v5, %v2609_v58 }
 0xb0f   : > { %v1794_v38 = vpack.c.bf16 %v1788_v37, %v1787_v0  ;;  %v2603_v8 = vpop.permute.xlu1 %2602 }
 0xb10   : > { %v2605_v63 = vunpack.i.h.bf16 %v2603_v8  ;;  %v2604_v11 = vunpack.i.l.bf16 %v2603_v8 }
 0xb11   : > { %2455 = vmatmul.mubr.msk.bf16.vlgmr.msra.gmra.mrb[32].mxu0 %vm484_vm1, %v1794_v38 }
 0xb12   : > { %v1789_v23 = vsel %vm1784_vm4, %v1780_v10, %v2604_v11  ;;  %v1790_v21 = vsel %vm1784_vm4, %v1781_v57, %v2605_v63 }
 0xb13   : > { %v1795_v33 = vpack.c.bf16 %v1790_v21, %v1789_v23  ;;  %v2613_v6 = vpop.permute.xlu1 %2612 }
 0xb14   : > { %v2615_v26 = vunpack.i.h.bf16 %v2613_v6  ;;  %v2614_v60 = vunpack.i.l.bf16 %v2613_v6 }
 0xb15   : > { %2458 = vmatprep.mubr.msk.bf16.mxu1 %vm484_vm1, %v1795_v33 }
 0xb16   : > { %v1791_v27 = vsel %vm1784_vm4, %v1782_v61, %v2614_v60  ;;  %v1792_v28 = vsel %vm1784_vm4, %v1783_v62, %v2615_v26 }
 0xb17   : > { %v1796_v29 = vpack.c.bf16 %v1792_v28, %v1791_v27 }
 0xb19   : > { %2459 = vmatmul.mubr.msk.bf16.vlgmr.msra.gmra.mrb[32].mxu1 %vm484_vm1, %v1796_v29 }
 0xb1a   : > { %2777 = shalt.err (!%p2774_p5)
}
 0xb1b   : > { %s2778_s16 = scalar_lea.hbm %s3556_s10, 2048  ;;  %s2782_s27 = scalar_lea.hbm %s3656_s4, 4096 }
 0xb1c   : > { %p2779_p6 = scmp.ne.s32.totalorder %s3556_s10, %s2778_s16  ;;  %p2783_p10 = scmp.lt.u32.totalorder %s3556_s10, %s3656_s4 }
 0xb1d   : > { %p2784_p11 = scmp.lt.u32.totalorder %s2782_s27, %s2778_s16  ;;  %p2786_p13 = scmp.lt.u32.totalorder %s2778_s16, %s3556_s10 }
 0xb1e   : > { %p2780_p7 = pnand %p2779_p6, %p2958_p4 }
 0xb1f   : > { %p2785_p12 = por %p2784_p11, %p2783_p10 }
 0xb20   : > { %p2781_p9 = pneg %p2780_p7 }
 0xb21   : > { %p2787_p0 = por %p2786_p13, %p2785_p12 }
 0xb23   : > { %p2788_p1 = pnand %p2787_p0, %p2781_p9 }
 0xb25   : > { %2791 = shalt.err (!%p2788_p1)
}
 0xb26   : > { %s2884_s12 = smov 4   ;;  %s2092_s13 = sshll.u32 %s3034_s15, 6  ;;  %v2193_v20 = vld [vmem:[%s3655_s3] ss:$0 sm:$0xff] }
 0xb27   : > { %2486 = dma.vmem_to_hbm [thread:$0]  (%p2958_p4), %s3558_s7, 2048, %s3556_s10, %s1922_s11, %s2876_s24, %s2876_s24, %s2884_s12  }
 0xb28   : > { %s270_s16 = scalar_lea.vmem [#allocation4], %s2092_s13  ;;  %s2245_s24 = sshll.u32 %s2866_s21, 10 }
 0xb29   : > { %s1960_s7 = sshll.u32 %s270_s16, 4  ;;  %s3599_s25 = scalar_lea.hbm %s3657_s5, %s2245_s24  ;;  %s3601_s7 = int_to_ptr.vmem [resolvable:$true] %s1960_s7 }
 0xb2a   : > { %s1927_s21 = scalar_lea.sflag [#allocation5], %s3034_s15  ;;  %s2792_s29 = scalar_lea.vmem %s3601_s7, 1024 }
 0xb2b   : > { %p2793_p2 = scmp.ne.s32.totalorder %s3601_s7, %s2792_s29  ;;  %s2885_s27 = smov [#allocation4]  }
 0xb2c   : > { %s2796_s8 = sshll.u32 %s2885_s27, 4  ;;  %s2797_s8 = int_to_ptr.vmem [resolvable:$false] %s2796_s8 }
 0xb2d   : > { %p2794_p3 = pnand %p2793_p2, %p2958_p4  ;;  %s2798_s9 = scalar_lea.vmem %s2797_s8, 2048 }
 0xb2e   : > { %p2799_p6 = scmp.lt.s32.totalorder %s3601_s7, %s2797_s8  ;;  %p2800_p7 = scmp.lt.s32.totalorder %s2798_s9, %s2792_s29 }
 0xb2f   : > { %p2795_p5 = pneg %p2794_p3 }
 0xb30   : > { %p2801_p9 = por %p2800_p7, %p2799_p6 }
 0xb32   : > { %p2802_p10 = pnand %p2801_p9, %p2795_p5 }
 0xbe4   : > { %v2456_v22 = vpop.f32.mrb[32].mxu0 }
 0xbe5   : > { %v1891_v31 = vadd.f32 %v2456_v22, %v2193_v20  ;;  %v1882_v13 = vpop.f32.mrb[33].mxu0 }
 0xbe6   : > { %v1883_v41 = vadd.f32 %v2193_v20, %v1882_v13  ;;  %v2457_v40 = vpop.f32.mrb[34].mxu0 }
 0xbe7   : > { %1915 = vst.msk [vmem:[%s270_s16 + $0x10] sm:$0xff] %vm484_vm1, %v1891_v31  ;;  %v1894_v42 = vadd.f32 %v2457_v40, %v2193_v20  ;;  %v1885_v43 = vpop.f32.mrb[35].mxu0 }
 0xbe8   : > { %1913 = vst.msk [vmem:[%s270_s16] sm:$0xff] %vm484_vm1, %v1883_v41  ;;  %v1886_v44 = vadd.f32 %v2193_v20, %v1885_v43 }
 0xbe9   : > { %1916 = vst.msk [vmem:[%s270_s16 + $0x18] sm:$0xff] %vm484_vm1, %v1894_v42 }
 0xbea   : > { %1914 = vst.msk [vmem:[%s270_s16 + $0x8] sm:$0xff] %vm484_vm1, %v1886_v44 }
 0xbec   : > { %v2460_v45 = vpop.f32.mrb[32].mxu1 }
 0xbed   : > { %v1907_v15 = vadd.f32 %v2460_v45, %v2193_v20  ;;  %v1898_v48 = vpop.f32.mrb[33].mxu1 }
 0xbee   : > { %v1899_v52 = vadd.f32 %v2193_v20, %v1898_v48  ;;  %v2461_v53 = vpop.f32.mrb[34].mxu1 }
 0xbef   : > { %1919 = vst.msk [vmem:[%s270_s16 + $0x30] sm:$0xff] %vm484_vm1, %v1907_v15  ;;  %v1910_v47 = vadd.f32 %v2461_v53, %v2193_v20  ;;  %v1901_v50 = vpop.f32.mrb[35].mxu1 }
 0xbf0   : > { %1917 = vst.msk [vmem:[%s270_s16 + $0x20] sm:$0xff] %vm484_vm1, %v1899_v52  ;;  %v1902_v51 = vadd.f32 %v2193_v20, %v1901_v50 }
 0xbf1   : > { %1920 = vst.msk [vmem:[%s270_s16 + $0x38] sm:$0xff] %vm484_vm1, %v1910_v47 }
 0xbf2   : > { %1918 = vst.msk [vmem:[%s270_s16 + $0x28] sm:$0xff] %vm484_vm1, %v1902_v51 }
 0xbf3   : > { %2805 = shalt.err (!%p2802_p10)
}
 0xbf4   : > { %s2806_s12 = scalar_lea.hbm %s3599_s25, 1024  ;;  %s2810_s17 = scalar_lea.hbm %s3657_s5, 2048 }
 0xbf5   : > { %p2807_p11 = scmp.ne.s32.totalorder %s3599_s25, %s2806_s12  ;;  %p2811_p0 = scmp.lt.u32.totalorder %s3599_s25, %s3657_s5 }
 0xbf6   : > { %p2812_p1 = scmp.lt.u32.totalorder %s2810_s17, %s2806_s12  ;;  %p2814_p3 = scmp.lt.u32.totalorder %s2806_s12, %s3599_s25 }
 0xbf7   : > { %p2808_p12 = pnand %p2807_p11, %p2958_p4 }
 0xbf8   : > { %p2813_p2 = por %p2812_p1, %p2811_p0 }
 0xbf9   : > { %p2809_p13 = pneg %p2808_p12 }
 0xbfa   : > { %p2815_p5 = por %p2814_p3, %p2813_p2 }
 0xbfc   : > { %p2816_p6 = pnand %p2815_p5, %p2809_p13 }
 0xbfe   : > { %2819 = shalt.err (!%p2816_p6)
}
 0xbff   : > { %s2886_s10 = smov 128   ;;  %s2887_s11 = smov 8  }
 0xc00   : > { %2487 = dma.vmem_to_hbm [thread:$0]  (%p2958_p4), %s3601_s7, 1024, %s3599_s25, %s1927_s21, %s2886_s10, %s2886_s10, %s2887_s11  }
 0xc01 PF: > { %p2497_p7 = scmp.ge.s32.totalorder %s2874_s23, 2  ;;  %s1975_s29 = sand.u32 1, %s2854_s18  }
 0xc02   : > { %s1976_s27 = scalar_lea.sflag [#allocation3], %s1975_s29 }
 0xc03   : > { %p2491_p9 = pnand %p2497_p7, %p2965_p8 }
 0xc05   : > { %2845 = dma.done.wait (!%p2491_p9), %s1976_s27, 2048  }
 0xc06   : > { %2847 = vsyncadd (!%p2491_p9), %s1976_s27, 4294965248  ;;  %s1985_s8 = scalar_lea.sflag [#allocation5], %s1975_s29 }
 0xc07   : > { %2849 = dma.done.wait (!%p2491_p9), %s1985_s8, 1024  }
 0xc08   : > { %2851 = vsyncadd (!%p2491_p9), %s1985_s8, 4294966272  ;;  %s22_s23 = sadd.s32 1, %s2874_s23   ;;  %s3660_s18 = smov %s2858_s19 }
 0xc09   : > { %p19_p10 = scmp.ge.s32.totalorder %s22_s23, 4   ;;  %s3661_s19 = smov %s2862_s20 }
 0xc0a   : > { %s3662_s20 = smov %s2971_s6  ;;  %s3663_s21 = smov %s2870_s22 }
 0xc0b   : > { %s3664_s22 = smov %s3666_s26  ;;  %21 = sbr.rel (!%p19_p10) target bundleno = 6 (0x6), region = 94 }
 0xc12   :  { %1990 = vsyncpa [#allocation3], 1 }
 0xc13   :  { %1992 = vsyncpa [#allocation3 + $0x1], 1 }
 0xc14   :  { %1993 = vsyncpa [#allocation5], 1 }
 0xc15   :  { %1995 = vsyncpa [#allocation5 + $0x1], 1 }

</bundles_post_ra>
